<compile_context>
chip_gen: v7x
topology: tpu7x:2x2x1
jax: 0.10.0
libtpu: 0.0.40
codegen_flags: <defaults>
</compile_context>

<pallas_src>
import functools

import jax
import jax.numpy as jnp
from jax.experimental import pallas as pl
from jax.experimental.pallas import tpu as pltpu

_EPS = 1e-5
_LANES = 128


def _round_up(v, m):
    return ((v + m - 1) // m) * m


def _conv_stats_kernel(do_affine, do_relu, *refs):
    """Per image: y = conv3x3(maybe_relu(maybe_affine(x))); emit per-channel stats.

    Refs (affine pass):      x, scale, shift, w, y, stats, hpad, taps, acc
    Refs (plain conv pass):  x,               w, y, stats, hpad, taps, acc

    x_ref    : (1, H, W, Cp)       f32/bf16  one image (channel-padded NHWC)
    s_ref    : (1, Cp)             f32       per-channel scale (bn1 folded)
    t_ref    : (1, Cp)             f32       per-channel shift (bn1 folded)
    w_ref    : (3, 3*Cp, Cp)       bf16      conv weights, (kx, cin) folded into K per ky
    y_ref    : (1, H, W, Cp)       bf16      conv output (pre-batchnorm)
    stats_ref: (1, 2, Cp)          f32       row 0 = sum over H*W, row 1 = sum of squares
    hpad_ref : (H+2, W+2, Cp)      bf16      scratch: zero-halo padded activation
    taps_ref : (H+2, W, 3*Cp)      bf16      scratch: kx-folded im2col slab (full height)
    acc_ref  : (H*W, Cp)           f32       scratch: MXU accumulator
    """
    if do_affine:
        x_ref, s_ref, t_ref, w_ref, y_ref, stats_ref, hpad_ref, taps_ref, acc_ref = refs
    else:
        x_ref, w_ref, y_ref, stats_ref, hpad_ref, taps_ref, acc_ref = refs
        s_ref = t_ref = None
    _, H, W, Cp = x_ref.shape

    # (1) optional per-channel affine (+ ReLU) in f32, then ONE f32->bf16 cast.
    h = x_ref[0]
    if do_affine:
        h = (h.astype(jnp.float32) * s_ref[...].reshape(1, 1, Cp)
             + t_ref[...].reshape(1, 1, Cp))
    if do_relu:
        h = jnp.maximum(h, 0.0)
    h = h.astype(jnp.bfloat16)

    # (2) zero ONLY the 1-wide halo border (interior is fully overwritten each step;
    #     no whole-buffer memset).  Done every step so correctness does not depend on
    #     which TensorCore processes which grid step.
    hpad_ref[0:1, :, :] = jnp.zeros((1, W + 2, Cp), jnp.bfloat16)
    hpad_ref[H + 1:H + 2, :, :] = jnp.zeros((1, W + 2, Cp), jnp.bfloat16)
    hpad_ref[1:H + 1, 0:1, :] = jnp.zeros((H, 1, Cp), jnp.bfloat16)
    hpad_ref[1:H + 1, W + 1:W + 2, :] = jnp.zeros((H, 1, Cp), jnp.bfloat16)
    hpad_ref[1:H + 1, 1:W + 1, :] = h

    # (3) kx-folded im2col slab built ONCE per image at full height:
    #     taps[r, c, kx*Cp:(kx+1)*Cp] = hpad[r, c + kx, :]   (3 window copies, not 9).
    for kx in range(3):
        taps_ref[:, :, kx * Cp:(kx + 1) * Cp] = hpad_ref[:, kx:kx + W, :]

    # (4) 3x3 conv = 3 bf16 MXU dots (f32 acc) on row-offset windows of the taps
    #     slab (K = 3*Cp).  The last ky accumulate is fused with the output/stats so
    #     the accumulator is not read-modify-written an extra time.
    #     (W is a multiple of the sublane tile here, so the reshapes are free views.)
    t0 = taps_ref[0:H, :, :].reshape(H * W, 3 * Cp)
    acc_ref[...] = jnp.dot(t0, w_ref[0], preferred_element_type=jnp.float32)
    t1 = taps_ref[1:H + 1, :, :].reshape(H * W, 3 * Cp)
    acc_ref[...] += jnp.dot(t1, w_ref[1], preferred_element_type=jnp.float32)
    t2 = taps_ref[2:H + 2, :, :].reshape(H * W, 3 * Cp)
    y = acc_ref[...] + jnp.dot(t2, w_ref[2], preferred_element_type=jnp.float32)

    # (5) bf16 conv output + fused single-pass partial BN stats (f32), one store each.
    y_ref[...] = y.reshape(1, H, W, Cp).astype(y_ref.dtype)
    ssum = jnp.sum(y, axis=0, keepdims=True)
    ssq = jnp.sum(y * y, axis=0, keepdims=True)
    stats_ref[...] = jnp.concatenate([ssum, ssq], axis=0).reshape(1, 2, Cp)


def _bn_residual_kernel(y_ref, s_ref, t_ref, xid_ref, out_ref):
    """out = y*scale + shift + identity  (bn2 folded into scale/shift; NO final ReLU)."""
    Cp = y_ref.shape[-1]
    out_ref[...] = (y_ref[...].astype(jnp.float32) * s_ref[...].reshape(1, 1, 1, Cp)
                    + t_ref[...].reshape(1, 1, 1, Cp)
                    + xid_ref[...])


@jax.jit
def no_relu_basic_block(x_nchw, w1_oihw, w2_oihw, g1, b1, g2, b2):
    """NCHW in / NCHW out (matches the PyTorch module's convention).

    TODO(synk): if the surrounding model can consume/produce NHWC, drop the boundary
    NCHW<->NHWC transposes and channel pad/slice (pure layout plumbing).
    """
    N, C, H, W = x_nchw.shape
    Cout = w1_oihw.shape[0]
    Cp = _round_up(max(C, Cout), _LANES)          # lane-dense channel dim

    # NCHW -> NHWC + channel pad (boundary layout plumbing only; internal passes
    # never re-transpose and the conv halo is built inside the kernels).
    # Identity/residual path kept in f32 for accuracy; the convs cast to bf16
    # internally anyway.
    x_nhwc = jnp.transpose(x_nchw, (0, 2, 3, 1)).astype(jnp.float32)
    x_nhwc = jnp.pad(x_nhwc, ((0, 0), (0, 0), (0, 0), (0, Cp - C)))

    def fold_w(w_oihw):
        o, i = w_oihw.shape[0], w_oihw.shape[1]
        w = jnp.transpose(w_oihw, (2, 3, 1, 0)).astype(jnp.float32)       # HWIO
        w = jnp.pad(w, ((0, 0), (0, 0), (0, Cp - i), (0, Cp - o)))
        return w.reshape(3, 3 * Cp, Cp).astype(jnp.bfloat16)              # (ky, kx*cin, cout)

    w1f, w2f = fold_w(w1_oihw), fold_w(w2_oihw)

    def pad_vec(v):
        return jnp.pad(v.astype(jnp.float32), (0, Cp - v.shape[0])).reshape(1, Cp)

    g1p, b1p, g2p, b2p = pad_vec(g1), pad_vec(b1), pad_vec(g2), pad_vec(b2)

    def conv_pass(do_affine, do_relu):
        in_specs = [pl.BlockSpec((1, H, W, Cp), lambda n: (n, 0, 0, 0))]
        if do_affine:
            in_specs += [pl.BlockSpec((1, Cp), lambda n: (0, 0)),
                         pl.BlockSpec((1, Cp), lambda n: (0, 0))]
        in_specs += [pl.BlockSpec((3, 3 * Cp, Cp), lambda n: (0, 0, 0))]
        return pl.pallas_call(
            functools.partial(_conv_stats_kernel, do_affine, do_relu),
            out_shape=(jax.ShapeDtypeStruct((N, H, W, Cp), jnp.bfloat16),
                       jax.ShapeDtypeStruct((N, 2, Cp), jnp.float32)),
            grid=(N,),
            in_specs=in_specs,
            out_specs=(pl.BlockSpec((1, H, W, Cp), lambda n: (n, 0, 0, 0)),
                       pl.BlockSpec((1, 2, Cp), lambda n: (n, 0, 0))),
            scratch_shapes=[pltpu.VMEM((H + 2, W + 2, Cp), jnp.bfloat16),
                            pltpu.VMEM((H + 2, W, 3 * Cp), jnp.bfloat16),
                            pltpu.VMEM((H * W, Cp), jnp.float32)],
            compiler_params=pltpu.CompilerParams(
                dimension_semantics=("parallel",)),
        )

    n_elems = float(N * H * W)

    def bn_coeffs(stats, gamma, beta):
        # Global batch statistics from per-image partial sums; all f32.
        # NOTE: single-pass var = E[x^2]-E[x]^2 (clamped at 0); adequate at this
        # tolerance, switch to a two-pass/Welford variant if tolerance tightens.
        ssum = jnp.sum(stats[:, 0, :], axis=0)
        ssq = jnp.sum(stats[:, 1, :], axis=0)
        mean = ssum / n_elems
        var = jnp.maximum(ssq / n_elems - mean * mean, 0.0)   # biased variance
        scale = gamma[0] * jax.lax.rsqrt(var + _EPS)
        shift = beta[0] - mean * scale
        return scale.reshape(1, Cp), shift.reshape(1, Cp)

    # pass 1: conv1 (affine compiled out) + per-image partial stats
    y1, st1 = conv_pass(False, False)(x_nhwc, w1f)
    sc1, sh1 = bn_coeffs(st1, g1p, b1p)

    # pass 2: bn1 + ReLU + conv2 + per-image partial stats
    y2, st2 = conv_pass(True, True)(y1, sc1, sh1, w2f)
    sc2, sh2 = bn_coeffs(st2, g2p, b2p)

    # pass 3: bn2 + residual add (no final ReLU)
    out_nhwc = pl.pallas_call(
        _bn_residual_kernel,
        out_shape=jax.ShapeDtypeStruct((N, H, W, Cp), jnp.float32),
        grid=(N,),
        in_specs=[pl.BlockSpec((1, H, W, Cp), lambda n: (n, 0, 0, 0)),
                  pl.BlockSpec((1, Cp), lambda n: (0, 0)),
                  pl.BlockSpec((1, Cp), lambda n: (0, 0)),
                  pl.BlockSpec((1, H, W, Cp), lambda n: (n, 0, 0, 0))],
        out_specs=pl.BlockSpec((1, H, W, Cp), lambda n: (n, 0, 0, 0)),
        compiler_params=pltpu.CompilerParams(
            dimension_semantics=("parallel",)),
    )(y2, sc2, sh2, x_nhwc)

    return jnp.transpose(out_nhwc[:, :, :, :Cout], (0, 3, 1, 2))


def _reference(x, w1, w2, g1, b1, g2, b2):
    """Pure-JAX reference (NCHW, training-mode BN, f32 HIGHEST-precision convs)."""
    def conv(y, w):
        return jax.lax.conv_general_dilated(
            y, w, window_strides=(1, 1), padding=((1, 1), (1, 1)),
            dimension_numbers=("NCHW", "OIHW", "NCHW"),
            precision=jax.lax.Precision.HIGHEST)

    def bn(y, g, b):
        mean = jnp.mean(y, axis=(0, 2, 3), keepdims=True)
        var = jnp.mean(jnp.square(y - mean), axis=(0, 2, 3), keepdims=True)
        return ((y - mean) * jax.lax.rsqrt(var + _EPS)
                * g.reshape(1, -1, 1, 1) + b.reshape(1, -1, 1, 1))

    out = jnp.maximum(bn(conv(x, w1), g1, b1), 0.0)
    out = bn(conv(out, w2), g2, b2)
    return out + x


if __name__ == "__main__":
    # Small shapes consistent with the module (inplanes == planes, stride=1).
    N, C, H, W = 2, 4, 16, 16
    planes = C

    key = jax.random.PRNGKey(0)
    kx, kw1, kw2, kg1, kb1, kg2, kb2 = jax.random.split(key, 7)

    x = jax.random.normal(kx, (N, C, H, W), jnp.float32)
    w1 = 0.2 * jax.random.normal(kw1, (planes, C, 3, 3), jnp.float32)       # conv1 (OIHW)
    w2 = 0.2 * jax.random.normal(kw2, (planes, planes, 3, 3), jnp.float32)  # conv2 (OIHW)
    g1 = 1.0 + 0.1 * jax.random.normal(kg1, (planes,), jnp.float32)
    b1 = 0.1 * jax.random.normal(kb1, (planes,), jnp.float32)
    g2 = 1.0 + 0.1 * jax.random.normal(kg2, (planes,), jnp.float32)
    b2 = 0.1 * jax.random.normal(kb2, (planes,), jnp.float32)

    out = jax.block_until_ready(no_relu_basic_block(x, w1, w2, g1, b1, g2, b2))
    ref = jax.block_until_ready(_reference(x, w1, w2, g1, b1, g2, b2))

    err_max = float(jnp.max(jnp.abs(out - ref)))
    err_mean = float(jnp.mean(jnp.abs(out - ref)))
    # Tolerance reflects bf16 MXU operands (f32 accumulation) AND bf16 storage of the
    # conv intermediates through two stacked convs + batchnorms, compared against an
    # f32 HIGHEST-precision reference.
    if out.shape != (N, planes, H, W) or not (err_max < 1e-1 and err_mean < 2e-2):
        raise AssertionError(
            f"mismatch: shape={out.shape} max_abs_err={err_max} mean_abs_err={err_mean}")

    print("KERNEL_OK")
</pallas_src>

<mosaic_0001>
module attributes {stable_mosaic.version = 11 : i64} {
  func.func @_conv_stats_kernel(%arg0: i32, %arg1: memref<1x16x16x128xf32, #tpu.memory_space<vmem>>, %arg2: memref<3x384x128xbf16, #tpu.memory_space<vmem>>, %arg3: memref<1x16x16x128xbf16, #tpu.memory_space<vmem>>, %arg4: memref<1x2x128xf32, #tpu.memory_space<vmem>>, %arg5: memref<18x18x128xbf16, #tpu.memory_space<vmem>>, %arg6: memref<18x16x384xbf16, #tpu.memory_space<vmem>>, %arg7: memref<256x128xf32, #tpu.memory_space<vmem>>) attributes {dimension_semantics = [#tpu.dimension_semantics<parallel>], iteration_bounds = array<i64: 2>, scalar_prefetch = 0 : i64, scratch_operands = 3 : i64, tpu.core_type = #tpu.core_type<tc>, window_params = [{transform_indices = @transform_0, window_bounds = array<i64: 1, 16, 16, 128>}, {pipeline_mode = #tpu.pipeline_mode<synchronous>, transform_indices = @transform_1, window_bounds = array<i64: 3, 384, 128>}, {transform_indices = @transform_2, window_bounds = array<i64: 1, 16, 16, 128>}, {transform_indices = @transform_3, window_bounds = array<i64: 1, 2, 128>}]} {
    %c0 = arith.constant 0 : index
    %c0_0 = arith.constant 0 : index
    %c0_1 = arith.constant 0 : index
    %c0_2 = arith.constant 0 : index
    %0 = vector.load %arg1[%c0, %c0_0, %c0_1, %c0_2] : memref<1x16x16x128xf32, #tpu.memory_space<vmem>>, vector<1x16x16x128xf32>
    %1 = vector.shape_cast %0 : vector<1x16x16x128xf32> to vector<16x16x128xf32>
    %2 = arith.truncf %1 : vector<16x16x128xf32> to vector<16x16x128xbf16>
    %cst = arith.constant 0.000000e+00 : bf16
    %3 = vector.broadcast %cst : bf16 to vector<1x18x128xbf16>
    %c0_3 = arith.constant 0 : index
    %c0_4 = arith.constant 0 : index
    %c0_5 = arith.constant 0 : index
    %4 = vector.load %arg5[%c0_3, %c0_4, %c0_5] : memref<18x18x128xbf16, #tpu.memory_space<vmem>>, vector<1x18x128xbf16>
    tpu.vector_store %arg5[%c0_3, %c0_4, %c0_5], %3 {strides = array<i32>} : memref<18x18x128xbf16, #tpu.memory_space<vmem>>, vector<1x18x128xbf16>,
    %cst_6 = arith.constant 0.000000e+00 : bf16
    %5 = vector.broadcast %cst_6 : bf16 to vector<1x18x128xbf16>
    %c17 = arith.constant 17 : index
    %c0_7 = arith.constant 0 : index
    %c0_8 = arith.constant 0 : index
    %6 = vector.load %arg5[%c17, %c0_7, %c0_8] : memref<18x18x128xbf16, #tpu.memory_space<vmem>>, vector<1x18x128xbf16>
    tpu.vector_store %arg5[%c17, %c0_7, %c0_8], %5 {strides = array<i32>} : memref<18x18x128xbf16, #tpu.memory_space<vmem>>, vector<1x18x128xbf16>,
    %cst_9 = arith.constant 0.000000e+00 : bf16
    %7 = vector.broadcast %cst_9 : bf16 to vector<16x1x128xbf16>
    %c1 = arith.constant 1 : index
    %c0_10 = arith.constant 0 : index
    %c0_11 = arith.constant 0 : index
    %8 = vector.load %arg5[%c1, %c0_10, %c0_11] : memref<18x18x128xbf16, #tpu.memory_space<vmem>>, vector<16x1x128xbf16>
    tpu.vector_store %arg5[%c1, %c0_10, %c0_11], %7 {strides = array<i32>} : memref<18x18x128xbf16, #tpu.memory_space<vmem>>, vector<16x1x128xbf16>,
    %cst_12 = arith.constant 0.000000e+00 : bf16
    %9 = vector.broadcast %cst_12 : bf16 to vector<16x1x128xbf16>
    %c1_13 = arith.constant 1 : index
    %c17_14 = arith.constant 17 : index
    %c0_15 = arith.constant 0 : index
    %10 = vector.load %arg5[%c1_13, %c17_14, %c0_15] : memref<18x18x128xbf16, #tpu.memory_space<vmem>>, vector<16x1x128xbf16>
    tpu.vector_store %arg5[%c1_13, %c17_14, %c0_15], %9 {strides = array<i32>} : memref<18x18x128xbf16, #tpu.memory_space<vmem>>, vector<16x1x128xbf16>,
    %c1_16 = arith.constant 1 : index
    %c1_17 = arith.constant 1 : index
    %c0_18 = arith.constant 0 : index
    %11 = vector.load %arg5[%c1_16, %c1_17, %c0_18] : memref<18x18x128xbf16, #tpu.memory_space<vmem>>, vector<16x16x128xbf16>
    tpu.vector_store %arg5[%c1_16, %c1_17, %c0_18], %2 {strides = array<i32>} : memref<18x18x128xbf16, #tpu.memory_space<vmem>>, vector<16x16x128xbf16>,
    %c0_19 = arith.constant 0 : index
    %c0_20 = arith.constant 0 : index
    %c0_21 = arith.constant 0 : index
    %12 = vector.load %arg5[%c0_19, %c0_20, %c0_21] : memref<18x18x128xbf16, #tpu.memory_space<vmem>>, vector<18x16x128xbf16>
    %c0_22 = arith.constant 0 : index
    %c0_23 = arith.constant 0 : index
    %c0_24 = arith.constant 0 : index
    %13 = vector.load %arg6[%c0_22, %c0_23, %c0_24] : memref<18x16x384xbf16, #tpu.memory_space<vmem>>, vector<18x16x128xbf16>
    tpu.vector_store %arg6[%c0_22, %c0_23, %c0_24], %12 {strides = array<i32>} : memref<18x16x384xbf16, #tpu.memory_space<vmem>>, vector<18x16x128xbf16>,
    %c0_25 = arith.constant 0 : index
    %c1_26 = arith.constant 1 : index
    %c0_27 = arith.constant 0 : index
    %14 = vector.load %arg5[%c0_25, %c1_26, %c0_27] : memref<18x18x128xbf16, #tpu.memory_space<vmem>>, vector<18x16x128xbf16>
    %c0_28 = arith.constant 0 : index
    %c0_29 = arith.constant 0 : index
    %c128 = arith.constant 128 : index
    %15 = vector.load %arg6[%c0_28, %c0_29, %c128] : memref<18x16x384xbf16, #tpu.memory_space<vmem>>, vector<18x16x128xbf16>
    tpu.vector_store %arg6[%c0_28, %c0_29, %c128], %14 {strides = array<i32>} : memref<18x16x384xbf16, #tpu.memory_space<vmem>>, vector<18x16x128xbf16>,
    %c0_30 = arith.constant 0 : index
    %c2 = arith.constant 2 : index
    %c0_31 = arith.constant 0 : index
    %16 = vector.load %arg5[%c0_30, %c2, %c0_31] : memref<18x18x128xbf16, #tpu.memory_space<vmem>>, vector<18x16x128xbf16>
    %c0_32 = arith.constant 0 : index
    %c0_33 = arith.constant 0 : index
    %c256 = arith.constant 256 : index
    %17 = vector.load %arg6[%c0_32, %c0_33, %c256] : memref<18x16x384xbf16, #tpu.memory_space<vmem>>, vector<18x16x128xbf16>
    tpu.vector_store %arg6[%c0_32, %c0_33, %c256], %16 {strides = array<i32>} : memref<18x16x384xbf16, #tpu.memory_space<vmem>>, vector<18x16x128xbf16>,
    %c0_34 = arith.constant 0 : index
    %c0_35 = arith.constant 0 : index
    %c0_36 = arith.constant 0 : index
    %18 = vector.load %arg6[%c0_34, %c0_35, %c0_36] : memref<18x16x384xbf16, #tpu.memory_space<vmem>>, vector<16x16x384xbf16>
    %19 = vector.shape_cast %18 : vector<16x16x384xbf16> to vector<256x384xbf16>
    %c0_37 = arith.constant 0 : index
    %c0_38 = arith.constant 0 : index
    %c0_39 = arith.constant 0 : index
    %20 = vector.load %arg2[%c0_37, %c0_38, %c0_39] : memref<3x384x128xbf16, #tpu.memory_space<vmem>>, vector<1x384x128xbf16>
    %21 = vector.shape_cast %20 : vector<1x384x128xbf16> to vector<384x128xbf16>
    %cst_40 = arith.constant dense<0.000000e+00> : vector<256x128xf32>
    %22 = tpu.matmul %19, %21, %cst_40 {dimension_numbers = #tpu.dot_dimension_numbers<[1], [0], [0], [1], [0, 0, 1, 1], [], []>} : vector<256x384xbf16>, vector<384x128xbf16>, vector<256x128xf32> -> vector<256x128xf32>
    %c0_41 = arith.constant 0 : index
    %c0_42 = arith.constant 0 : index
    %23 = vector.load %arg7[%c0_41, %c0_42] : memref<256x128xf32, #tpu.memory_space<vmem>>, vector<256x128xf32>
    tpu.vector_store %arg7[%c0_41, %c0_42], %22 {strides = array<i32>} : memref<256x128xf32, #tpu.memory_space<vmem>>, vector<256x128xf32>,
    %c1_43 = arith.constant 1 : index
    %c0_44 = arith.constant 0 : index
    %c0_45 = arith.constant 0 : index
    %24 = vector.load %arg6[%c1_43, %c0_44, %c0_45] : memref<18x16x384xbf16, #tpu.memory_space<vmem>>, vector<16x16x384xbf16>
    %25 = vector.shape_cast %24 : vector<16x16x384xbf16> to vector<256x384xbf16>
    %c0_46 = arith.constant 0 : index
    %c0_47 = arith.constant 0 : index
    %26 = vector.load %arg7[%c0_46, %c0_47] : memref<256x128xf32, #tpu.memory_space<vmem>>, vector<256x128xf32>
    %c1_48 = arith.constant 1 : index
    %c0_49 = arith.constant 0 : index
    %c0_50 = arith.constant 0 : index
    %27 = vector.load %arg2[%c1_48, %c0_49, %c0_50] : memref<3x384x128xbf16, #tpu.memory_space<vmem>>, vector<1x384x128xbf16>
    %28 = vector.shape_cast %27 : vector<1x384x128xbf16> to vector<384x128xbf16>
    %cst_51 = arith.constant dense<0.000000e+00> : vector<256x128xf32>
    %29 = tpu.matmul %25, %28, %cst_51 {dimension_numbers = #tpu.dot_dimension_numbers<[1], [0], [0], [1], [0, 0, 1, 1], [], []>} : vector<256x384xbf16>, vector<384x128xbf16>, vector<256x128xf32> -> vector<256x128xf32>
    %30 = arith.addf %26, %29 : vector<256x128xf32>
    %c0_52 = arith.constant 0 : index
    %c0_53 = arith.constant 0 : index
    %31 = vector.load %arg7[%c0_52, %c0_53] : memref<256x128xf32, #tpu.memory_space<vmem>>, vector<256x128xf32>
    tpu.vector_store %arg7[%c0_52, %c0_53], %30 {strides = array<i32>} : memref<256x128xf32, #tpu.memory_space<vmem>>, vector<256x128xf32>,
    %c2_54 = arith.constant 2 : index
    %c0_55 = arith.constant 0 : index
    %c0_56 = arith.constant 0 : index
    %32 = vector.load %arg6[%c2_54, %c0_55, %c0_56] : memref<18x16x384xbf16, #tpu.memory_space<vmem>>, vector<16x16x384xbf16>
    %33 = vector.shape_cast %32 : vector<16x16x384xbf16> to vector<256x384xbf16>
    %c0_57 = arith.constant 0 : index
    %c0_58 = arith.constant 0 : index
    %34 = vector.load %arg7[%c0_57, %c0_58] : memref<256x128xf32, #tpu.memory_space<vmem>>, vector<256x128xf32>
    %c2_59 = arith.constant 2 : index
    %c0_60 = arith.constant 0 : index
    %c0_61 = arith.constant 0 : index
    %35 = vector.load %arg2[%c2_59, %c0_60, %c0_61] : memref<3x384x128xbf16, #tpu.memory_space<vmem>>, vector<1x384x128xbf16>
    %36 = vector.shape_cast %35 : vector<1x384x128xbf16> to vector<384x128xbf16>
    %cst_62 = arith.constant dense<0.000000e+00> : vector<256x128xf32>
    %37 = tpu.matmul %33, %36, %cst_62 {dimension_numbers = #tpu.dot_dimension_numbers<[1], [0], [0], [1], [0, 0, 1, 1], [], []>} : vector<256x384xbf16>, vector<384x128xbf16>, vector<256x128xf32> -> vector<256x128xf32>
    %38 = arith.addf %34, %37 : vector<256x128xf32>
    %39 = vector.shape_cast %38 : vector<256x128xf32> to vector<1x16x16x128xf32>
    %40 = arith.truncf %39 : vector<1x16x16x128xf32> to vector<1x16x16x128xbf16>
    %c0_63 = arith.constant 0 : index
    %c0_64 = arith.constant 0 : index
    %c0_65 = arith.constant 0 : index
    %c0_66 = arith.constant 0 : index
    %41 = vector.load %arg3[%c0_63, %c0_64, %c0_65, %c0_66] : memref<1x16x16x128xbf16, #tpu.memory_space<vmem>>, vector<1x16x16x128xbf16>
    tpu.vector_store %arg3[%c0_63, %c0_64, %c0_65, %c0_66], %40 {strides = array<i32>} : memref<1x16x16x128xbf16, #tpu.memory_space<vmem>>, vector<1x16x16x128xbf16>,
    %cst_67 = arith.constant dense<0.000000e+00> : vector<128xf32>
    %42 = vector.multi_reduction <add>, %38, %cst_67 [0] : vector<256x128xf32> to vector<128xf32>
    %43 = vector.shape_cast %42 : vector<128xf32> to vector<1x128xf32>
    %44 = arith.mulf %38, %38 : vector<256x128xf32>
    %cst_68 = arith.constant dense<0.000000e+00> : vector<128xf32>
    %45 = vector.multi_reduction <add>, %44, %cst_68 [0] : vector<256x128xf32> to vector<128xf32>
    %46 = vector.shape_cast %45 : vector<128xf32> to vector<1x128xf32>
    %47 = tpu.concatenate %43, %46 in 0 : vector<1x128xf32>, vector<1x128xf32> -> vector<2x128xf32>
    %48 = vector.shape_cast %47 : vector<2x128xf32> to vector<1x2x128xf32>
    %c0_69 = arith.constant 0 : index
    %c0_70 = arith.constant 0 : index
    %c0_71 = arith.constant 0 : index
    %49 = vector.load %arg4[%c0_69, %c0_70, %c0_71] : memref<1x2x128xf32, #tpu.memory_space<vmem>>, vector<1x2x128xf32>
    tpu.vector_store %arg4[%c0_69, %c0_70, %c0_71], %48 {strides = array<i32>} : memref<1x2x128xf32, #tpu.memory_space<vmem>>, vector<1x2x128xf32>,
    return
  }
  func.func @transform_0(%arg0: i32) -> (i32, i32, i32, i32) {
    %c0_i32 = arith.constant 0 : i32
    %c0_i32_0 = arith.constant 0 : i32
    %c0_i32_1 = arith.constant 0 : i32
    %c0_i32_2 = arith.constant 0 : i32
    return %arg0, %c0_i32, %c0_i32_0, %c0_i32_1 : i32, i32, i32, i32
  }
  func.func @transform_1(%arg0: i32) -> (i32, i32, i32) {
    %c0_i32 = arith.constant 0 : i32
    %c0_i32_0 = arith.constant 0 : i32
    %c0_i32_1 = arith.constant 0 : i32
    %c0_i32_2 = arith.constant 0 : i32
    return %c0_i32, %c0_i32_0, %c0_i32_1 : i32, i32, i32
  }
  func.func @transform_2(%arg0: i32) -> (i32, i32, i32, i32) {
    %c0_i32 = arith.constant 0 : i32
    %c0_i32_0 = arith.constant 0 : i32
    %c0_i32_1 = arith.constant 0 : i32
    %c0_i32_2 = arith.constant 0 : i32
    return %arg0, %c0_i32, %c0_i32_0, %c0_i32_1 : i32, i32, i32, i32
  }
  func.func @transform_3(%arg0: i32) -> (i32, i32, i32) {
    %c0_i32 = arith.constant 0 : i32
    %c0_i32_0 = arith.constant 0 : i32
    %c0_i32_1 = arith.constant 0 : i32
    return %arg0, %c0_i32, %c0_i32_0 : i32, i32, i32
  }
}

module attributes {stable_mosaic.version = 11 : i64} {
  func.func @_conv_stats_kernel(%arg0: i32, %arg1: memref<1x16x16x128xbf16, #tpu.memory_space<vmem>>, %arg2: memref<1x128xf32, #tpu.memory_space<vmem>>, %arg3: memref<1x128xf32, #tpu.memory_space<vmem>>, %arg4: memref<3x384x128xbf16, #tpu.memory_space<vmem>>, %arg5: memref<1x16x16x128xbf16, #tpu.memory_space<vmem>>, %arg6: memref<1x2x128xf32, #tpu.memory_space<vmem>>, %arg7: memref<18x18x128xbf16, #tpu.memory_space<vmem>>, %arg8: memref<18x16x384xbf16, #tpu.memory_space<vmem>>, %arg9: memref<256x128xf32, #tpu.memory_space<vmem>>) attributes {dimension_semantics = [#tpu.dimension_semantics<parallel>], iteration_bounds = array<i64: 2>, scalar_prefetch = 0 : i64, scratch_operands = 3 : i64, tpu.core_type = #tpu.core_type<tc>, window_params = [{transform_indices = @transform_0, window_bounds = array<i64: 1, 16, 16, 128>}, {pipeline_mode = #tpu.pipeline_mode<synchronous>, transform_indices = @transform_1, window_bounds = array<i64: 1, 128>}, {pipeline_mode = #tpu.pipeline_mode<synchronous>, transform_indices = @transform_2, window_bounds = array<i64: 1, 128>}, {pipeline_mode = #tpu.pipeline_mode<synchronous>, transform_indices = @transform_3, window_bounds = array<i64: 3, 384, 128>}, {transform_indices = @transform_4, window_bounds = array<i64: 1, 16, 16, 128>}, {transform_indices = @transform_5, window_bounds = array<i64: 1, 2, 128>}]} {
    %c0 = arith.constant 0 : index
    %c0_0 = arith.constant 0 : index
    %c0_1 = arith.constant 0 : index
    %c0_2 = arith.constant 0 : index
    %0 = vector.load %arg1[%c0, %c0_0, %c0_1, %c0_2] : memref<1x16x16x128xbf16, #tpu.memory_space<vmem>>, vector<1x16x16x128xbf16>
    %1 = vector.shape_cast %0 : vector<1x16x16x128xbf16> to vector<16x16x128xbf16>
    %2 = arith.extf %1 : vector<16x16x128xbf16> to vector<16x16x128xf32>
    %c0_3 = arith.constant 0 : index
    %c0_4 = arith.constant 0 : index
    %3 = vector.load %arg2[%c0_3, %c0_4] : memref<1x128xf32, #tpu.memory_space<vmem>>, vector<1x128xf32>
    %4 = vector.shape_cast %3 : vector<1x128xf32> to vector<1x1x128xf32>
    %5 = vector.broadcast %4 : vector<1x1x128xf32> to vector<16x16x128xf32>
    %6 = arith.mulf %2, %5 : vector<16x16x128xf32>
    %c0_5 = arith.constant 0 : index
    %c0_6 = arith.constant 0 : index
    %7 = vector.load %arg3[%c0_5, %c0_6] : memref<1x128xf32, #tpu.memory_space<vmem>>, vector<1x128xf32>
    %8 = vector.shape_cast %7 : vector<1x128xf32> to vector<1x1x128xf32>
    %9 = vector.broadcast %8 : vector<1x1x128xf32> to vector<16x16x128xf32>
    %10 = arith.addf %6, %9 : vector<16x16x128xf32>
    %cst = arith.constant 0.000000e+00 : f32
    %11 = vector.broadcast %cst : f32 to vector<16x16x128xf32>
    %12 = arith.maximumf %10, %11 : vector<16x16x128xf32>
    %13 = arith.truncf %12 : vector<16x16x128xf32> to vector<16x16x128xbf16>
    %cst_7 = arith.constant 0.000000e+00 : bf16
    %14 = vector.broadcast %cst_7 : bf16 to vector<1x18x128xbf16>
    %c0_8 = arith.constant 0 : index
    %c0_9 = arith.constant 0 : index
    %c0_10 = arith.constant 0 : index
    %15 = vector.load %arg7[%c0_8, %c0_9, %c0_10] : memref<18x18x128xbf16, #tpu.memory_space<vmem>>, vector<1x18x128xbf16>
    tpu.vector_store %arg7[%c0_8, %c0_9, %c0_10], %14 {strides = array<i32>} : memref<18x18x128xbf16, #tpu.memory_space<vmem>>, vector<1x18x128xbf16>,
    %cst_11 = arith.constant 0.000000e+00 : bf16
    %16 = vector.broadcast %cst_11 : bf16 to vector<1x18x128xbf16>
    %c17 = arith.constant 17 : index
    %c0_12 = arith.constant 0 : index
    %c0_13 = arith.constant 0 : index
    %17 = vector.load %arg7[%c17, %c0_12, %c0_13] : memref<18x18x128xbf16, #tpu.memory_space<vmem>>, vector<1x18x128xbf16>
    tpu.vector_store %arg7[%c17, %c0_12, %c0_13], %16 {strides = array<i32>} : memref<18x18x128xbf16, #tpu.memory_space<vmem>>, vector<1x18x128xbf16>,
    %cst_14 = arith.constant 0.000000e+00 : bf16
    %18 = vector.broadcast %cst_14 : bf16 to vector<16x1x128xbf16>
    %c1 = arith.constant 1 : index
    %c0_15 = arith.constant 0 : index
    %c0_16 = arith.constant 0 : index
    %19 = vector.load %arg7[%c1, %c0_15, %c0_16] : memref<18x18x128xbf16, #tpu.memory_space<vmem>>, vector<16x1x128xbf16>
    tpu.vector_store %arg7[%c1, %c0_15, %c0_16], %18 {strides = array<i32>} : memref<18x18x128xbf16, #tpu.memory_space<vmem>>, vector<16x1x128xbf16>,
    %cst_17 = arith.constant 0.000000e+00 : bf16
    %20 = vector.broadcast %cst_17 : bf16 to vector<16x1x128xbf16>
    %c1_18 = arith.constant 1 : index
    %c17_19 = arith.constant 17 : index
    %c0_20 = arith.constant 0 : index
    %21 = vector.load %arg7[%c1_18, %c17_19, %c0_20] : memref<18x18x128xbf16, #tpu.memory_space<vmem>>, vector<16x1x128xbf16>
    tpu.vector_store %arg7[%c1_18, %c17_19, %c0_20], %20 {strides = array<i32>} : memref<18x18x128xbf16, #tpu.memory_space<vmem>>, vector<16x1x128xbf16>,
    %c1_21 = arith.constant 1 : index
    %c1_22 = arith.constant 1 : index
    %c0_23 = arith.constant 0 : index
    %22 = vector.load %arg7[%c1_21, %c1_22, %c0_23] : memref<18x18x128xbf16, #tpu.memory_space<vmem>>, vector<16x16x128xbf16>
    tpu.vector_store %arg7[%c1_21, %c1_22, %c0_23], %13 {strides = array<i32>} : memref<18x18x128xbf16, #tpu.memory_space<vmem>>, vector<16x16x128xbf16>,
    %c0_24 = arith.constant 0 : index
    %c0_25 = arith.constant 0 : index
    %c0_26 = arith.constant 0 : index
    %23 = vector.load %arg7[%c0_24, %c0_25, %c0_26] : memref<18x18x128xbf16, #tpu.memory_space<vmem>>, vector<18x16x128xbf16>
    %c0_27 = arith.constant 0 : index
    %c0_28 = arith.constant 0 : index
    %c0_29 = arith.constant 0 : index
    %24 = vector.load %arg8[%c0_27, %c0_28, %c0_29] : memref<18x16x384xbf16, #tpu.memory_space<vmem>>, vector<18x16x128xbf16>
    tpu.vector_store %arg8[%c0_27, %c0_28, %c0_29], %23 {strides = array<i32>} : memref<18x16x384xbf16, #tpu.memory_space<vmem>>, vector<18x16x128xbf16>,
    %c0_30 = arith.constant 0 : index
    %c1_31 = arith.constant 1 : index
    %c0_32 = arith.constant 0 : index
    %25 = vector.load %arg7[%c0_30, %c1_31, %c0_32] : memref<18x18x128xbf16, #tpu.memory_space<vmem>>, vector<18x16x128xbf16>
    %c0_33 = arith.constant 0 : index
    %c0_34 = arith.constant 0 : index
    %c128 = arith.constant 128 : index
    %26 = vector.load %arg8[%c0_33, %c0_34, %c128] : memref<18x16x384xbf16, #tpu.memory_space<vmem>>, vector<18x16x128xbf16>
    tpu.vector_store %arg8[%c0_33, %c0_34, %c128], %25 {strides = array<i32>} : memref<18x16x384xbf16, #tpu.memory_space<vmem>>, vector<18x16x128xbf16>,
    %c0_35 = arith.constant 0 : index
    %c2 = arith.constant 2 : index
    %c0_36 = arith.constant 0 : index
    %27 = vector.load %arg7[%c0_35, %c2, %c0_36] : memref<18x18x128xbf16, #tpu.memory_space<vmem>>, vector<18x16x128xbf16>
    %c0_37 = arith.constant 0 : index
    %c0_38 = arith.constant 0 : index
    %c256 = arith.constant 256 : index
    %28 = vector.load %arg8[%c0_37, %c0_38, %c256] : memref<18x16x384xbf16, #tpu.memory_space<vmem>>, vector<18x16x128xbf16>
    tpu.vector_store %arg8[%c0_37, %c0_38, %c256], %27 {strides = array<i32>} : memref<18x16x384xbf16, #tpu.memory_space<vmem>>, vector<18x16x128xbf16>,
    %c0_39 = arith.constant 0 : index
    %c0_40 = arith.constant 0 : index
    %c0_41 = arith.constant 0 : index
    %29 = vector.load %arg8[%c0_39, %c0_40, %c0_41] : memref<18x16x384xbf16, #tpu.memory_space<vmem>>, vector<16x16x384xbf16>
    %30 = vector.shape_cast %29 : vector<16x16x384xbf16> to vector<256x384xbf16>
    %c0_42 = arith.constant 0 : index
    %c0_43 = arith.constant 0 : index
    %c0_44 = arith.constant 0 : index
    %31 = vector.load %arg4[%c0_42, %c0_43, %c0_44] : memref<3x384x128xbf16, #tpu.memory_space<vmem>>, vector<1x384x128xbf16>
    %32 = vector.shape_cast %31 : vector<1x384x128xbf16> to vector<384x128xbf16>
    %cst_45 = arith.constant dense<0.000000e+00> : vector<256x128xf32>
    %33 = tpu.matmul %30, %32, %cst_45 {dimension_numbers = #tpu.dot_dimension_numbers<[1], [0], [0], [1], [0, 0, 1, 1], [], []>} : vector<256x384xbf16>, vector<384x128xbf16>, vector<256x128xf32> -> vector<256x128xf32>
    %c0_46 = arith.constant 0 : index
    %c0_47 = arith.constant 0 : index
    %34 = vector.load %arg9[%c0_46, %c0_47] : memref<256x128xf32, #tpu.memory_space<vmem>>, vector<256x128xf32>
    tpu.vector_store %arg9[%c0_46, %c0_47], %33 {strides = array<i32>} : memref<256x128xf32, #tpu.memory_space<vmem>>, vector<256x128xf32>,
    %c1_48 = arith.constant 1 : index
    %c0_49 = arith.constant 0 : index
    %c0_50 = arith.constant 0 : index
    %35 = vector.load %arg8[%c1_48, %c0_49, %c0_50] : memref<18x16x384xbf16, #tpu.memory_space<vmem>>, vector<16x16x384xbf16>
    %36 = vector.shape_cast %35 : vector<16x16x384xbf16> to vector<256x384xbf16>
    %c0_51 = arith.constant 0 : index
    %c0_52 = arith.constant 0 : index
    %37 = vector.load %arg9[%c0_51, %c0_52] : memref<256x128xf32, #tpu.memory_space<vmem>>, vector<256x128xf32>
    %c1_53 = arith.constant 1 : index
    %c0_54 = arith.constant 0 : index
    %c0_55 = arith.constant 0 : index
    %38 = vector.load %arg4[%c1_53, %c0_54, %c0_55] : memref<3x384x128xbf16, #tpu.memory_space<vmem>>, vector<1x384x128xbf16>
    %39 = vector.shape_cast %38 : vector<1x384x128xbf16> to vector<384x128xbf16>
    %cst_56 = arith.constant dense<0.000000e+00> : vector<256x128xf32>
    %40 = tpu.matmul %36, %39, %cst_56 {dimension_numbers = #tpu.dot_dimension_numbers<[1], [0], [0], [1], [0, 0, 1, 1], [], []>} : vector<256x384xbf16>, vector<384x128xbf16>, vector<256x128xf32> -> vector<256x128xf32>
    %41 = arith.addf %37, %40 : vector<256x128xf32>
    %c0_57 = arith.constant 0 : index
    %c0_58 = arith.constant 0 : index
    %42 = vector.load %arg9[%c0_57, %c0_58] : memref<256x128xf32, #tpu.memory_space<vmem>>, vector<256x128xf32>
    tpu.vector_store %arg9[%c0_57, %c0_58], %41 {strides = array<i32>} : memref<256x128xf32, #tpu.memory_space<vmem>>, vector<256x128xf32>,
    %c2_59 = arith.constant 2 : index
    %c0_60 = arith.constant 0 : index
    %c0_61 = arith.constant 0 : index
    %43 = vector.load %arg8[%c2_59, %c0_60, %c0_61] : memref<18x16x384xbf16, #tpu.memory_space<vmem>>, vector<16x16x384xbf16>
    %44 = vector.shape_cast %43 : vector<16x16x384xbf16> to vector<256x384xbf16>
    %c0_62 = arith.constant 0 : index
    %c0_63 = arith.constant 0 : index
    %45 = vector.load %arg9[%c0_62, %c0_63] : memref<256x128xf32, #tpu.memory_space<vmem>>, vector<256x128xf32>
    %c2_64 = arith.constant 2 : index
    %c0_65 = arith.constant 0 : index
    %c0_66 = arith.constant 0 : index
    %46 = vector.load %arg4[%c2_64, %c0_65, %c0_66] : memref<3x384x128xbf16, #tpu.memory_space<vmem>>, vector<1x384x128xbf16>
    %47 = vector.shape_cast %46 : vector<1x384x128xbf16> to vector<384x128xbf16>
    %cst_67 = arith.constant dense<0.000000e+00> : vector<256x128xf32>
    %48 = tpu.matmul %44, %47, %cst_67 {dimension_numbers = #tpu.dot_dimension_numbers<[1], [0], [0], [1], [0, 0, 1, 1], [], []>} : vector<256x384xbf16>, vector<384x128xbf16>, vector<256x128xf32> -> vector<256x128xf32>
    %49 = arith.addf %45, %48 : vector<256x128xf32>
    %50 = vector.shape_cast %49 : vector<256x128xf32> to vector<1x16x16x128xf32>
    %51 = arith.truncf %50 : vector<1x16x16x128xf32> to vector<1x16x16x128xbf16>
    %c0_68 = arith.constant 0 : index
    %c0_69 = arith.constant 0 : index
    %c0_70 = arith.constant 0 : index
    %c0_71 = arith.constant 0 : index
    %52 = vector.load %arg5[%c0_68, %c0_69, %c0_70, %c0_71] : memref<1x16x16x128xbf16, #tpu.memory_space<vmem>>, vector<1x16x16x128xbf16>
    tpu.vector_store %arg5[%c0_68, %c0_69, %c0_70, %c0_71], %51 {strides = array<i32>} : memref<1x16x16x128xbf16, #tpu.memory_space<vmem>>, vector<1x16x16x128xbf16>,
    %cst_72 = arith.constant dense<0.000000e+00> : vector<128xf32>
    %53 = vector.multi_reduction <add>, %49, %cst_72 [0] : vector<256x128xf32> to vector<128xf32>
    %54 = vector.shape_cast %53 : vector<128xf32> to vector<1x128xf32>
    %55 = arith.mulf %49, %49 : vector<256x128xf32>
    %cst_73 = arith.constant dense<0.000000e+00> : vector<128xf32>
    %56 = vector.multi_reduction <add>, %55, %cst_73 [0] : vector<256x128xf32> to vector<128xf32>
    %57 = vector.shape_cast %56 : vector<128xf32> to vector<1x128xf32>
    %58 = tpu.concatenate %54, %57 in 0 : vector<1x128xf32>, vector<1x128xf32> -> vector<2x128xf32>
    %59 = vector.shape_cast %58 : vector<2x128xf32> to vector<1x2x128xf32>
    %c0_74 = arith.constant 0 : index
    %c0_75 = arith.constant 0 : index
    %c0_76 = arith.constant 0 : index
    %60 = vector.load %arg6[%c0_74, %c0_75, %c0_76] : memref<1x2x128xf32, #tpu.memory_space<vmem>>, vector<1x2x128xf32>
    tpu.vector_store %arg6[%c0_74, %c0_75, %c0_76], %59 {strides = array<i32>} : memref<1x2x128xf32, #tpu.memory_space<vmem>>, vector<1x2x128xf32>,
    return
  }
  func.func @transform_0(%arg0: i32) -> (i32, i32, i32, i32) {
    %c0_i32 = arith.constant 0 : i32
    %c0_i32_0 = arith.constant 0 : i32
    %c0_i32_1 = arith.constant 0 : i32
    %c0_i32_2 = arith.constant 0 : i32
    return %arg0, %c0_i32, %c0_i32_0, %c0_i32_1 : i32, i32, i32, i32
  }
  func.func @transform_1(%arg0: i32) -> (i32, i32) {
    %c0_i32 = arith.constant 0 : i32
    %c0_i32_0 = arith.constant 0 : i32
    %c0_i32_1 = arith.constant 0 : i32
    return %c0_i32, %c0_i32_0 : i32, i32
  }
  func.func @transform_2(%arg0: i32) -> (i32, i32) {
    %c0_i32 = arith.constant 0 : i32
    %c0_i32_0 = arith.constant 0 : i32
    %c0_i32_1 = arith.constant 0 : i32
    return %c0_i32, %c0_i32_0 : i32, i32
  }
  func.func @transform_3(%arg0: i32) -> (i32, i32, i32) {
    %c0_i32 = arith.constant 0 : i32
    %c0_i32_0 = arith.constant 0 : i32
    %c0_i32_1 = arith.constant 0 : i32
    %c0_i32_2 = arith.constant 0 : i32
    return %c0_i32, %c0_i32_0, %c0_i32_1 : i32, i32, i32
  }
  func.func @transform_4(%arg0: i32) -> (i32, i32, i32, i32) {
    %c0_i32 = arith.constant 0 : i32
    %c0_i32_0 = arith.constant 0 : i32
    %c0_i32_1 = arith.constant 0 : i32
    %c0_i32_2 = arith.constant 0 : i32
    return %arg0, %c0_i32, %c0_i32_0, %c0_i32_1 : i32, i32, i32, i32
  }
  func.func @transform_5(%arg0: i32) -> (i32, i32, i32) {
    %c0_i32 = arith.constant 0 : i32
    %c0_i32_0 = arith.constant 0 : i32
    %c0_i32_1 = arith.constant 0 : i32
    return %arg0, %c0_i32, %c0_i32_0 : i32, i32, i32
  }
}

module attributes {stable_mosaic.version = 11 : i64} {
  func.func @_bn_residual_kernel(%arg0: i32, %arg1: memref<1x16x16x128xbf16, #tpu.memory_space<vmem>>, %arg2: memref<1x128xf32, #tpu.memory_space<vmem>>, %arg3: memref<1x128xf32, #tpu.memory_space<vmem>>, %arg4: memref<1x16x16x128xf32, #tpu.memory_space<vmem>>, %arg5: memref<1x16x16x128xf32, #tpu.memory_space<vmem>>) attributes {dimension_semantics = [#tpu.dimension_semantics<parallel>], iteration_bounds = array<i64: 2>, scalar_prefetch = 0 : i64, scratch_operands = 0 : i64, tpu.core_type = #tpu.core_type<tc>, window_params = [{transform_indices = @transform_0, window_bounds = array<i64: 1, 16, 16, 128>}, {pipeline_mode = #tpu.pipeline_mode<synchronous>, transform_indices = @transform_1, window_bounds = array<i64: 1, 128>}, {pipeline_mode = #tpu.pipeline_mode<synchronous>, transform_indices = @transform_2, window_bounds = array<i64: 1, 128>}, {transform_indices = @transform_3, window_bounds = array<i64: 1, 16, 16, 128>}, {transform_indices = @transform_4, window_bounds = array<i64: 1, 16, 16, 128>}]} {
    %c0 = arith.constant 0 : index
    %c0_0 = arith.constant 0 : index
    %c0_1 = arith.constant 0 : index
    %c0_2 = arith.constant 0 : index
    %0 = vector.load %arg1[%c0, %c0_0, %c0_1, %c0_2] : memref<1x16x16x128xbf16, #tpu.memory_space<vmem>>, vector<1x16x16x128xbf16>
    %1 = arith.extf %0 : vector<1x16x16x128xbf16> to vector<1x16x16x128xf32>
    %c0_3 = arith.constant 0 : index
    %c0_4 = arith.constant 0 : index
    %2 = vector.load %arg2[%c0_3, %c0_4] : memref<1x128xf32, #tpu.memory_space<vmem>>, vector<1x128xf32>
    %3 = vector.shape_cast %2 : vector<1x128xf32> to vector<1x1x1x128xf32>
    %4 = vector.broadcast %3 : vector<1x1x1x128xf32> to vector<1x16x16x128xf32>
    %5 = arith.mulf %1, %4 : vector<1x16x16x128xf32>
    %c0_5 = arith.constant 0 : index
    %c0_6 = arith.constant 0 : index
    %6 = vector.load %arg3[%c0_5, %c0_6] : memref<1x128xf32, #tpu.memory_space<vmem>>, vector<1x128xf32>
    %7 = vector.shape_cast %6 : vector<1x128xf32> to vector<1x1x1x128xf32>
    %8 = vector.broadcast %7 : vector<1x1x1x128xf32> to vector<1x16x16x128xf32>
    %9 = arith.addf %5, %8 : vector<1x16x16x128xf32>
    %c0_7 = arith.constant 0 : index
    %c0_8 = arith.constant 0 : index
    %c0_9 = arith.constant 0 : index
    %c0_10 = arith.constant 0 : index
    %10 = vector.load %arg4[%c0_7, %c0_8, %c0_9, %c0_10] : memref<1x16x16x128xf32, #tpu.memory_space<vmem>>, vector<1x16x16x128xf32>
    %11 = arith.addf %9, %10 : vector<1x16x16x128xf32>
    %c0_11 = arith.constant 0 : index
    %c0_12 = arith.constant 0 : index
    %c0_13 = arith.constant 0 : index
    %c0_14 = arith.constant 0 : index
    %12 = vector.load %arg5[%c0_11, %c0_12, %c0_13, %c0_14] : memref<1x16x16x128xf32, #tpu.memory_space<vmem>>, vector<1x16x16x128xf32>
    tpu.vector_store %arg5[%c0_11, %c0_12, %c0_13, %c0_14], %11 {strides = array<i32>} : memref<1x16x16x128xf32, #tpu.memory_space<vmem>>, vector<1x16x16x128xf32>,
    return
  }
  func.func @transform_0(%arg0: i32) -> (i32, i32, i32, i32) {
    %c0_i32 = arith.constant 0 : i32
    %c0_i32_0 = arith.constant 0 : i32
    %c0_i32_1 = arith.constant 0 : i32
    %c0_i32_2 = arith.constant 0 : i32
    return %arg0, %c0_i32, %c0_i32_0, %c0_i32_1 : i32, i32, i32, i32
  }
  func.func @transform_1(%arg0: i32) -> (i32, i32) {
    %c0_i32 = arith.constant 0 : i32
    %c0_i32_0 = arith.constant 0 : i32
    %c0_i32_1 = arith.constant 0 : i32
    return %c0_i32, %c0_i32_0 : i32, i32
  }
  func.func @transform_2(%arg0: i32) -> (i32, i32) {
    %c0_i32 = arith.constant 0 : i32
    %c0_i32_0 = arith.constant 0 : i32
    %c0_i32_1 = arith.constant 0 : i32
    return %c0_i32, %c0_i32_0 : i32, i32
  }
  func.func @transform_3(%arg0: i32) -> (i32, i32, i32, i32) {
    %c0_i32 = arith.constant 0 : i32
    %c0_i32_0 = arith.constant 0 : i32
    %c0_i32_1 = arith.constant 0 : i32
    %c0_i32_2 = arith.constant 0 : i32
    return %arg0, %c0_i32, %c0_i32_0, %c0_i32_1 : i32, i32, i32, i32
  }
  func.func @transform_4(%arg0: i32) -> (i32, i32, i32, i32) {
    %c0_i32 = arith.constant 0 : i32
    %c0_i32_0 = arith.constant 0 : i32
    %c0_i32_1 = arith.constant 0 : i32
    %c0_i32_2 = arith.constant 0 : i32
    return %arg0, %c0_i32, %c0_i32_0, %c0_i32_1 : i32, i32, i32, i32
  }
}

</mosaic_0001>

<bundles_post_ra>
// kernel: no_relu_basic_block.5
= control target key start
LH: loop header
LB: loop body
LE: loop exit
PB: predicated region body
PF: predicated region fallthrough
CT: control target
= control target key end

     0   :  { %s661_s15 = smov 0   ;;  %s849_s0 = inlined_call_operand.vmem [shape: bf16[2,16,16,128], index: 0, kind: input, shape index: {}]   ;;  %s850_s1 = inlined_call_operand.vmem [shape: f32[1,128], index: 1, kind: input, shape index: {}]   ;;  %s851_s2 = inlined_call_operand.vmem [shape: f32[1,128], index: 2, kind: input, shape index: {}]   ;;  %s852_s3 = inlined_call_operand.vmem [shape: f32[2,16,16,128], index: 3, kind: input, shape index: {}]   ;;  %s853_s4 = inlined_call_operand.vmem [shape: f32[2,16,16,128], index: 4, kind: output, shape index: {}]  }
   0x1 LB: > { %s523_s16 = sadd.s32 4294967295, %s634_s15   ;;  %p527_p0 = scmp.ge.s32.totalorder %s634_s15, 1  ;;  %s634_s15 = sphi %s661_s15, %s14_s15  }
   0x2   : > { %p172_p1 = scmp.lt.s32.totalorder %s634_s15, 3 }
   0x4   : > { %p173_p2 = pnand %p527_p0, %p172_p1 }
   0x5   : > { %p203_p3 = scmp.lt.s32.totalorder (!%p173_p2), %s523_s16, 1  ;;  %v682_v1 = vld [vmem:[%s850_s1] ss:$0 sm:$0xff] (!%p173_p2) }
   0x6   : > { %176 = sbr.rel (%p173_p2) target bundleno = 52 (0x34), region = 36  ;;  %v695_v5 = vld [vmem:[%s851_s2] ss:$0 sm:$0xff] (!%p173_p2) }
   0xd   : > { %s855_s16 = smov (!%p203_p3, %s523_s16), 1 }
   0xe   : > { %s538_s17 = sshll.u32 %s855_s16, 7  ;;  %s539_s18 = sshll.u32 %s855_s16, 8 }
   0xf   : > { %s676_s21 = scalar_lea.vmem %s849_s0, %s538_s17  ;;  %s689_s26 = scalar_lea.vmem %s852_s3, %s539_s18 }
  0x10   : > { %v542_v0 = vld [vmem:[%s676_s21] sm:$0xff]   ;;  %v605_v4 = vld [vmem:[%s676_s21 + $0x8] sm:$0xff]   ;;  %v606_v8 = vld [vmem:[%s676_s21 + $0x10] sm:$0xff]   ;;  %s716_s5 = scalar_lea.vmem %s853_s4, %s539_s18 }
  0x11   : > { %v543_v2 = vunpack.c.l.bf16 %v542_v0  ;;  %v544_v3 = vunpack.c.h.bf16 %v542_v0  ;;  %v547_v6 = vunpack.c.l.bf16 %v605_v4  ;;  %v548_v7 = vunpack.c.h.bf16 %v605_v4  ;;  %v607_v13 = vld [vmem:[%s676_s21 + $0x18] sm:$0xff]   ;;  %v360_v14 = vld [vmem:[%s689_s26] sm:$0xff]  ;;  %v361_v15 = vld [vmem:[%s689_s26 + $0x8] sm:$0xff] }
  0x12   : > { %v551_v11 = vunpack.c.l.bf16 %v606_v8  ;;  %v552_v12 = vunpack.c.h.bf16 %v606_v8  ;;  %v555_v18 = vunpack.c.l.bf16 %v607_v13  ;;  %v556_v19 = vunpack.c.h.bf16 %v607_v13  ;;  %v362_v22 = vld [vmem:[%s689_s26 + $0x10] sm:$0xff]  ;;  %v363_v23 = vld [vmem:[%s689_s26 + $0x18] sm:$0xff]  ;;  %v364_v28 = vld [vmem:[%s689_s26 + $0x20] sm:$0xff] }
  0x13   : > { %v289_v9 = vmul.f32 %v543_v2, %v682_v1  ;;  %v290_v10 = vmul.f32 %v544_v3, %v682_v1  ;;  %v291_v16 = vmul.f32 %v547_v6, %v682_v1  ;;  %v292_v17 = vmul.f32 %v548_v7, %v682_v1  ;;  %v365_v29 = vld [vmem:[%s689_s26 + $0x28] sm:$0xff]  ;;  %v608_v32 = vld [vmem:[%s676_s21 + $0x20] sm:$0xff]   ;;  %v366_v37 = vld [vmem:[%s689_s26 + $0x30] sm:$0xff] }
  0x14   : > { %v293_v24 = vmul.f32 %v551_v11, %v682_v1  ;;  %v294_v25 = vmul.f32 %v552_v12, %v682_v1  ;;  %v295_v30 = vmul.f32 %v555_v18, %v682_v1  ;;  %v296_v31 = vmul.f32 %v556_v19, %v682_v1  ;;  %v367_v38 = vld [vmem:[%s689_s26 + $0x38] sm:$0xff]  ;;  %v609_v39 = vld [vmem:[%s676_s21 + $0x28] sm:$0xff]   ;;  %v610_v44 = vld [vmem:[%s676_s21 + $0x30] sm:$0xff]  }
  0x15   : > { %v328_v20 = vadd.f32 %v695_v5, %v289_v9  ;;  %v329_v21 = vadd.f32 %v695_v5, %v290_v10  ;;  %v330_v26 = vadd.f32 %v695_v5, %v291_v16  ;;  %v331_v27 = vadd.f32 %v695_v5, %v292_v17  ;;  %v611_v49 = vld [vmem:[%s676_s21 + $0x38] sm:$0xff]   ;;  %v368_v58 = vld [vmem:[%s689_s26 + $0x40] sm:$0xff]  ;;  %v369_v59 = vld [vmem:[%s689_s26 + $0x48] sm:$0xff] }
  0x16   : > { %v332_v35 = vadd.f32 %v695_v5, %v293_v24  ;;  %v333_v36 = vadd.f32 %v695_v5, %v294_v25  ;;  %v334_v42 = vadd.f32 %v695_v5, %v295_v30  ;;  %v335_v43 = vadd.f32 %v695_v5, %v296_v31  ;;  %v370_v3 = vld [vmem:[%s689_s26 + $0x50] sm:$0xff]  ;;  %v371_v4 = vld [vmem:[%s689_s26 + $0x58] sm:$0xff]  ;;  %v372_v10 = vld [vmem:[%s689_s26 + $0x60] sm:$0xff] }
  0x17   : > { %v392_v33 = vadd.f32 %v360_v14, %v328_v20  ;;  %v393_v34 = vadd.f32 %v361_v15, %v329_v21  ;;  %v394_v40 = vadd.f32 %v362_v22, %v330_v26  ;;  %v395_v41 = vadd.f32 %v363_v23, %v331_v27  ;;  %v373_v11 = vld [vmem:[%s689_s26 + $0x68] sm:$0xff]  ;;  %v612_v14 = vld [vmem:[%s676_s21 + $0x40] sm:$0xff]   ;;  %v374_v19 = vld [vmem:[%s689_s26 + $0x70] sm:$0xff] }
  0x18   : > { %v396_v45 = vadd.f32 %v364_v28, %v332_v35  ;;  %v397_v46 = vadd.f32 %v365_v29, %v333_v36  ;;  %v559_v47 = vunpack.c.l.bf16 %v608_v32  ;;  %v560_v48 = vunpack.c.h.bf16 %v608_v32  ;;  %v375_v20 = vld [vmem:[%s689_s26 + $0x78] sm:$0xff]  ;;  %v613_v21 = vld [vmem:[%s676_s21 + $0x48] sm:$0xff]   ;;  %v614_v26 = vld [vmem:[%s676_s21 + $0x50] sm:$0xff]  }
  0x19   : > { %424 = vst [vmem:[%s716_s5] sm:$0xff] %v392_v33  ;;  %425 = vst [vmem:[%s716_s5 + $0x8] sm:$0xff] %v393_v34  ;;  %v398_v50 = vadd.f32 %v366_v37, %v334_v42  ;;  %v399_v51 = vadd.f32 %v367_v38, %v335_v43  ;;  %v563_v52 = vunpack.c.l.bf16 %v609_v39  ;;  %v564_v53 = vunpack.c.h.bf16 %v609_v39  ;;  %v615_v31 = vld [vmem:[%s676_s21 + $0x58] sm:$0xff]  }
  0x1a   : > { %426 = vst [vmem:[%s716_s5 + $0x10] sm:$0xff] %v394_v40  ;;  %427 = vst [vmem:[%s716_s5 + $0x18] sm:$0xff] %v395_v41  ;;  %v297_v54 = vmul.f32 %v559_v47, %v682_v1  ;;  %v298_v55 = vmul.f32 %v560_v48, %v682_v1  ;;  %v567_v56 = vunpack.c.l.bf16 %v610_v44  ;;  %v568_v57 = vunpack.c.h.bf16 %v610_v44  ;;  %v376_v40 = vld [vmem:[%s689_s26 + $0x80] sm:$0xff]  ;;  %v377_v41 = vld [vmem:[%s689_s26 + $0x88] sm:$0xff] }
  0x1b   : > { %428 = vst [vmem:[%s716_s5 + $0x20] sm:$0xff] %v396_v45  ;;  %429 = vst [vmem:[%s716_s5 + $0x28] sm:$0xff] %v397_v46  ;;  %v299_v60 = vmul.f32 %v563_v52, %v682_v1  ;;  %v300_v61 = vmul.f32 %v564_v53, %v682_v1  ;;  %v571_v62 = vunpack.c.l.bf16 %v611_v49  ;;  %v572_v63 = vunpack.c.h.bf16 %v611_v49  ;;  %v378_v48 = vld [vmem:[%s689_s26 + $0x90] sm:$0xff]  ;;  %v379_v49 = vld [vmem:[%s689_s26 + $0x98] sm:$0xff] }
  0x1c   : > { %430 = vst [vmem:[%s716_s5 + $0x30] sm:$0xff] %v398_v50  ;;  %431 = vst [vmem:[%s716_s5 + $0x38] sm:$0xff] %v399_v51  ;;  %v336_v0 = vadd.f32 %v695_v5, %v297_v54  ;;  %v337_v2 = vadd.f32 %v695_v5, %v298_v55  ;;  %v301_v6 = vmul.f32 %v567_v56, %v682_v1  ;;  %v575_v29 = vunpack.c.l.bf16 %v612_v14  ;;  %v380_v54 = vld [vmem:[%s689_s26 + $0xa0] sm:$0xff]  ;;  %v381_v55 = vld [vmem:[%s689_s26 + $0xa8] sm:$0xff] }
  0x1d   : > { %v302_v7 = vmul.f32 %v568_v57, %v682_v1  ;;  %v338_v8 = vadd.f32 %v695_v5, %v299_v60  ;;  %v339_v9 = vadd.f32 %v695_v5, %v300_v61  ;;  %v303_v12 = vmul.f32 %v571_v62, %v682_v1 }
  0x1e   : > { %v304_v13 = vmul.f32 %v572_v63, %v682_v1  ;;  %v400_v15 = vadd.f32 %v368_v58, %v336_v0  ;;  %v401_v16 = vadd.f32 %v369_v59, %v337_v2  ;;  %v340_v17 = vadd.f32 %v695_v5, %v301_v6  ;;  %v616_v58 = vld [vmem:[%s676_s21 + $0x60] sm:$0xff]   ;;  %v382_v63 = vld [vmem:[%s689_s26 + $0xb0] sm:$0xff]  ;;  %v383_v0 = vld [vmem:[%s689_s26 + $0xb8] sm:$0xff] }
  0x1f   : > { %v341_v18 = vadd.f32 %v695_v5, %v302_v7  ;;  %v402_v22 = vadd.f32 %v370_v3, %v338_v8  ;;  %v403_v23 = vadd.f32 %v371_v4, %v339_v9  ;;  %v342_v24 = vadd.f32 %v695_v5, %v303_v12  ;;  %v617_v2 = vld [vmem:[%s676_s21 + $0x68] sm:$0xff]   ;;  %v618_v8 = vld [vmem:[%s676_s21 + $0x70] sm:$0xff]  }
  0x20   : > { %v343_v25 = vadd.f32 %v695_v5, %v304_v13  ;;  %432 = vst [vmem:[%s716_s5 + $0x40] sm:$0xff] %v400_v15  ;;  %433 = vst [vmem:[%s716_s5 + $0x48] sm:$0xff] %v401_v16  ;;  %v404_v27 = vadd.f32 %v372_v10, %v340_v17  ;;  %v576_v30 = vunpack.c.h.bf16 %v612_v14  ;;  %v579_v34 = vunpack.c.l.bf16 %v613_v21  ;;  %v619_v13 = vld [vmem:[%s676_s21 + $0x78] sm:$0xff]  }
  0x21   : > { %v405_v28 = vadd.f32 %v373_v11, %v341_v18  ;;  %434 = vst [vmem:[%s716_s5 + $0x50] sm:$0xff] %v402_v22  ;;  %435 = vst [vmem:[%s716_s5 + $0x58] sm:$0xff] %v403_v23  ;;  %v406_v32 = vadd.f32 %v374_v19, %v342_v24  ;;  %v580_v35 = vunpack.c.h.bf16 %v613_v21  ;;  %v305_v36 = vmul.f32 %v575_v29, %v682_v1  ;;  %v384_v22 = vld [vmem:[%s689_s26 + $0xc0] sm:$0xff]  ;;  %v385_v23 = vld [vmem:[%s689_s26 + $0xc8] sm:$0xff] }
  0x22   : > { %v407_v33 = vadd.f32 %v375_v20, %v343_v25  ;;  %436 = vst [vmem:[%s716_s5 + $0x60] sm:$0xff] %v404_v27  ;;  %v306_v37 = vmul.f32 %v576_v30, %v682_v1  ;;  %v583_v38 = vunpack.c.l.bf16 %v614_v26  ;;  %v584_v39 = vunpack.c.h.bf16 %v614_v26  ;;  %v386_v30 = vld [vmem:[%s689_s26 + $0xd0] sm:$0xff] }
  0x23   : > { %437 = vst [vmem:[%s716_s5 + $0x68] sm:$0xff] %v405_v28  ;;  %438 = vst [vmem:[%s716_s5 + $0x70] sm:$0xff] %v406_v32  ;;  %v307_v42 = vmul.f32 %v579_v34, %v682_v1  ;;  %v308_v43 = vmul.f32 %v580_v35, %v682_v1  ;;  %v587_v44 = vunpack.c.l.bf16 %v615_v31  ;;  %v588_v45 = vunpack.c.h.bf16 %v615_v31  ;;  %v387_v31 = vld [vmem:[%s689_s26 + $0xd8] sm:$0xff] }
  0x24   : > { %439 = vst [vmem:[%s716_s5 + $0x78] sm:$0xff] %v407_v33  ;;  %v344_v46 = vadd.f32 %v695_v5, %v305_v36  ;;  %v345_v47 = vadd.f32 %v695_v5, %v306_v37  ;;  %v309_v50 = vmul.f32 %v583_v38, %v682_v1  ;;  %v310_v51 = vmul.f32 %v584_v39, %v682_v1  ;;  %v388_v36 = vld [vmem:[%s689_s26 + $0xe0] sm:$0xff]  ;;  %v389_v37 = vld [vmem:[%s689_s26 + $0xe8] sm:$0xff] }
  0x25   : > { %v346_v52 = vadd.f32 %v695_v5, %v307_v42  ;;  %v347_v53 = vadd.f32 %v695_v5, %v308_v43  ;;  %v311_v56 = vmul.f32 %v587_v44, %v682_v1  ;;  %v312_v57 = vmul.f32 %v588_v45, %v682_v1  ;;  %v390_v44 = vld [vmem:[%s689_s26 + $0xf0] sm:$0xff]  ;;  %v391_v45 = vld [vmem:[%s689_s26 + $0xf8] sm:$0xff] }
  0x26   : > { %v408_v59 = vadd.f32 %v376_v40, %v344_v46  ;;  %v409_v60 = vadd.f32 %v377_v41, %v345_v47  ;;  %v348_v61 = vadd.f32 %v695_v5, %v309_v50  ;;  %v349_v62 = vadd.f32 %v695_v5, %v310_v51 }
  0x27   : > { %v410_v3 = vadd.f32 %v378_v48, %v346_v52  ;;  %v411_v4 = vadd.f32 %v379_v49, %v347_v53  ;;  %v350_v6 = vadd.f32 %v695_v5, %v311_v56  ;;  %v351_v7 = vadd.f32 %v695_v5, %v312_v57 }
  0x28   : > { %440 = vst [vmem:[%s716_s5 + $0x80] sm:$0xff] %v408_v59  ;;  %441 = vst [vmem:[%s716_s5 + $0x88] sm:$0xff] %v409_v60  ;;  %v412_v9 = vadd.f32 %v380_v54, %v348_v61  ;;  %v413_v10 = vadd.f32 %v381_v55, %v349_v62  ;;  %v591_v11 = vunpack.c.l.bf16 %v616_v58  ;;  %v592_v12 = vunpack.c.h.bf16 %v616_v58 }
  0x29   : > { %442 = vst [vmem:[%s716_s5 + $0x90] sm:$0xff] %v410_v3  ;;  %443 = vst [vmem:[%s716_s5 + $0x98] sm:$0xff] %v411_v4  ;;  %v414_v14 = vadd.f32 %v382_v63, %v350_v6  ;;  %v415_v15 = vadd.f32 %v383_v0, %v351_v7  ;;  %v595_v16 = vunpack.c.l.bf16 %v617_v2  ;;  %v596_v17 = vunpack.c.h.bf16 %v617_v2 }
  0x2a   : > { %444 = vst [vmem:[%s716_s5 + $0xa0] sm:$0xff] %v412_v9  ;;  %445 = vst [vmem:[%s716_s5 + $0xa8] sm:$0xff] %v413_v10  ;;  %v313_v18 = vmul.f32 %v591_v11, %v682_v1  ;;  %v314_v19 = vmul.f32 %v592_v12, %v682_v1  ;;  %v599_v20 = vunpack.c.l.bf16 %v618_v8  ;;  %v600_v21 = vunpack.c.h.bf16 %v618_v8 }
  0x2b   : > { %446 = vst [vmem:[%s716_s5 + $0xb0] sm:$0xff] %v414_v14  ;;  %447 = vst [vmem:[%s716_s5 + $0xb8] sm:$0xff] %v415_v15  ;;  %v315_v24 = vmul.f32 %v595_v16, %v682_v1  ;;  %v316_v25 = vmul.f32 %v596_v17, %v682_v1  ;;  %v603_v26 = vunpack.c.l.bf16 %v619_v13  ;;  %v604_v27 = vunpack.c.h.bf16 %v619_v13 }
  0x2c   : > { %v352_v28 = vadd.f32 %v695_v5, %v313_v18  ;;  %v353_v29 = vadd.f32 %v695_v5, %v314_v19  ;;  %v317_v32 = vmul.f32 %v599_v20, %v682_v1  ;;  %v318_v33 = vmul.f32 %v600_v21, %v682_v1 }
  0x2d   : > { %v354_v34 = vadd.f32 %v695_v5, %v315_v24  ;;  %v355_v35 = vadd.f32 %v695_v5, %v316_v25  ;;  %v319_v38 = vmul.f32 %v603_v26, %v682_v1  ;;  %v320_v39 = vmul.f32 %v604_v27, %v682_v1 }
  0x2e   : > { %v416_v40 = vadd.f32 %v384_v22, %v352_v28  ;;  %v417_v41 = vadd.f32 %v385_v23, %v353_v29  ;;  %v356_v42 = vadd.f32 %v695_v5, %v317_v32  ;;  %v357_v43 = vadd.f32 %v695_v5, %v318_v33 }
  0x2f   : > { %v418_v46 = vadd.f32 %v386_v30, %v354_v34  ;;  %v419_v47 = vadd.f32 %v387_v31, %v355_v35  ;;  %v358_v48 = vadd.f32 %v695_v5, %v319_v38  ;;  %v359_v49 = vadd.f32 %v695_v5, %v320_v39 }
  0x30   : > { %448 = vst [vmem:[%s716_s5 + $0xc0] sm:$0xff] %v416_v40  ;;  %449 = vst [vmem:[%s716_s5 + $0xc8] sm:$0xff] %v417_v41  ;;  %v420_v1 = vadd.f32 %v388_v36, %v356_v42  ;;  %v421_v50 = vadd.f32 %v389_v37, %v357_v43 }
  0x31   : > { %450 = vst [vmem:[%s716_s5 + $0xd0] sm:$0xff] %v418_v46  ;;  %451 = vst [vmem:[%s716_s5 + $0xd8] sm:$0xff] %v419_v47  ;;  %v422_v51 = vadd.f32 %v390_v44, %v358_v48  ;;  %v423_v52 = vadd.f32 %v391_v45, %v359_v49 }
  0x32   : > { %452 = vst [vmem:[%s716_s5 + $0xe0] sm:$0xff] %v420_v1  ;;  %453 = vst [vmem:[%s716_s5 + $0xe8] sm:$0xff] %v421_v50 }
  0x33   : > { %454 = vst [vmem:[%s716_s5 + $0xf0] sm:$0xff] %v422_v51  ;;  %455 = vst [vmem:[%s716_s5 + $0xf8] sm:$0xff] %v423_v52 }
  0x34 PF: > { %s14_s15 = sadd.s32 1, %s634_s15  }
  0x35   : > { %p11_p4 = scmp.ge.s32.totalorder %s14_s15, 4  }
  0x37   :  { %13 = sbr.rel (!%p11_p4) target bundleno = 1 (0x1), region = 69 }

// kernel: no_relu_basic_block.3
= control target key start
LH: loop header
LB: loop body
LE: loop exit
PB: predicated region body
PF: predicated region fallthrough
CT: control target
= control target key end

     0   :  { %s5420_s12 = smov 0   ;;  %s6454_s0 = inlined_call_operand.vmem [shape: f32[2,16,16,128], index: 0, kind: input, shape index: {}]   ;;  %s6455_s1 = inlined_call_operand.vmem [shape: bf16[3,384,128], index: 1, kind: input, shape index: {}]   ;;  %s6456_s2 = inlined_call_operand.vmem [shape: bf16[2,16,16,128], index: 2, kind: output, shape index: {0}]   ;;  %s6457_s3 = inlined_call_operand.vmem [shape: f32[2,2,128], index: 3, kind: output, shape index: {1}]  }
   0x1 LB: > { %s3995_s13 = sadd.s32 4294967295, %s5397_s12   ;;  %p3999_p0 = scmp.ge.s32.totalorder %s5397_s12, 1  ;;  %s5397_s12 = sphi %s5420_s12, %s14_s12  }
   0x2   : > { %p140_p1 = scmp.lt.s32.totalorder %s5397_s12, 3 }
   0x4   : > { %p141_p2 = pnand %p3999_p0, %p140_p1 }
   0x6   : > { %144 = sbr.rel (%p141_p2) target bundleno = 614 (0x266), region = 28 }
   0xd   : > { %v5227_v0 = vld [vmem:[%s6455_s1 + $0x40] sm:$0xff]   ;;  %v5399_v2 = vmov 0   ;;  %v5230_v4 = vld [vmem:[%s6455_s1 + $0x48] sm:$0xff]   ;;  %v5233_v7 = vld [vmem:[%s6455_s1 + $0x50] sm:$0xff]   ;;  %p168_p3 = scmp.lt.s32.totalorder %s3995_s13, 1  ;;  %vm239_vm0 = vcmask 1040384  }
   0xe   : > { %v5434_v1 = vld [vmem:[%s6455_s1 + $0x80] sm:$0xff]   ;;  %231 = vst [vmem:[#allocation2] sm:$0xf] %v5399_v2  ;;  %232 = vst [vmem:[#allocation2 + $0x4] sm:$0xf] %v5399_v2  ;;  %4490 = vmatprep.subr.bf16.mxu0 %v5227_v0  ;;  %v5447_v5 = vld [vmem:[%s6455_s1 + $0x88] sm:$0xff]  }
   0xf   : > { %233 = vst [vmem:[#allocation2 + $0x8] sm:$0x1] %v5399_v2  ;;  %235 = vst [vmem:[#allocation2 + $0xcc] sm:$0xf] %v5399_v2  ;;  %v5229_v3 = vld [vmem:[%s6455_s1] sm:$0xff]   ;;  %5042 = vmatprep.subr.bf16.mxu1 %v5434_v1  ;;  %v5232_v6 = vld [vmem:[%s6455_s1 + $0x8] sm:$0xff]  }
  0x10   : > { %236 = vst [vmem:[#allocation2 + $0xd0] sm:$0xf] %v5399_v2  ;;  %237 = vst [vmem:[#allocation2 + $0xd4] sm:$0x1] %v5399_v2  ;;  %4491 = vmatpush3.bf16.msra.mxu0 %v5229_v3  ;;  %5050 = vmatpush3.bf16.msra.mxu1 %v5434_v1  ;;  %v5459_v8 = vld [vmem:[%s6455_s1 + $0x90] sm:$0xff]   ;;  %v5236_v10 = vld [vmem:[%s6455_s1 + $0x58] sm:$0xff]  }
  0x11   : > { %4492 = vmatprep.subr.bf16.mxu0 %v5230_v4  ;;  %5043 = vmatprep.subr.bf16.mxu1 %v5447_v5  ;;  %v5235_v9 = vld [vmem:[%s6455_s1 + $0x10] sm:$0xff]   ;;  %v5472_v11 = vld [vmem:[%s6455_s1 + $0x98] sm:$0xff]   ;;  %v5239_v13 = vld [vmem:[%s6455_s1 + $0x60] sm:$0xff]   ;;  %s6469_s13 = smov (!%p168_p3, %s3995_s13), 1  ;;  %vm742_vm1 = vcmask 1043456   ;;  %vm1667_vm10 = vcmask 1046528  }
  0x12   : > { %v5238_v12 = vld [vmem:[%s6455_s1 + $0x18] sm:$0xff]   ;;  %v5487_v14 = vld [vmem:[%s6455_s1 + $0xa0] sm:$0xff]   ;;  %v5242_v16 = vld [vmem:[%s6455_s1 + $0x68] sm:$0xff]   ;;  %s4329_s27 = sshll.u32 %s6469_s13, 8  ;;  %vm1216_vm2 = vsmask.f32 7424 }
  0x13   : > { %v5241_v15 = vld [vmem:[%s6455_s1 + $0x20] sm:$0xff]   ;;  %v5504_v17 = vld [vmem:[%s6455_s1 + $0xa8] sm:$0xff]   ;;  %v5245_v19 = vld [vmem:[%s6455_s1 + $0x70] sm:$0xff]   ;;  %s5534_s11 = scalar_lea.vmem %s6454_s0, %s4329_s27  ;;  %vm240_vm3 = vsmask.f32 256  ;;  %s4330_s14 = sshll.u32 %s6469_s13, 7 }
  0x14   : > { %4493 = vmatpush3.bf16.msra.mxu0 %v5232_v6  ;;  %5051 = vmatpush3.bf16.msra.mxu1 %v5447_v5  ;;  %v5244_v18 = vld [vmem:[%s6455_s1 + $0x28] sm:$0xff]   ;;  %v5518_v20 = vld [vmem:[%s6455_s1 + $0xb0] sm:$0xff]   ;;  %v5248_v22 = vld [vmem:[%s6455_s1 + $0x78] sm:$0xff]   ;;  %vm290_vm5 = vsmask.f32 7938  ;;  %s6391_s17 = scalar_lea.vmem %s6456_s2, %s4330_s14 }
  0x15   : > { %4494 = vmatprep.subr.bf16.mxu0 %v5233_v7  ;;  %5044 = vmatprep.subr.bf16.mxu1 %v5459_v8  ;;  %v5247_v21 = vld [vmem:[%s6455_s1 + $0x30] sm:$0xff]   ;;  %v5529_v23 = vld [vmem:[%s6455_s1 + $0xb8] sm:$0xff]   ;;  %v5251_v24 = vld [vmem:[#allocation2] sm:$0xff]   ;;  %vm420_vm7 = vsmask.f32 4368 }
  0x16   : > { %v5252_v25 = vld [vmem:[#allocation2 + $0x8] ss:$0 sps:$4 sm:$0x11]   ;;  %v197_v26 = vld [vmem:[%s5534_s11 + $0x70] sm:$0xff]  ;;  %v198_v27 = vld [vmem:[%s5534_s11 + $0x78] sm:$0xff]  ;;  %v1218_v30 = vshrl.u32 %v5251_v24, 16 }
  0x17   : > { %v263_v28 = vld [vmem:[#allocation2 + $0x60] sm:$0x1]  ;;  %v5250_v29 = vld [vmem:[%s6455_s1 + $0x38] sm:$0xff]   ;;  %v1220_v31 = vshll.u32 %v5251_v24, 16  ;;  %v1225_v32 = vshll.u32 %v5252_v25, 16  ;;  %vm5545_vm4 = vmand %vm239_vm0, %vm240_vm3  ;;  %v4345_v37 = vpack.c.bf16 %v197_v26, %v197_v26  ;;  %v4346_v38 = vpack.c.bf16 %v198_v27, %v198_v27 }
  0x18   : > { %4495 = vmatpush3.bf16.msra.mxu0 %v5235_v9  ;;  %5052 = vmatpush3.bf16.msra.mxu1 %v5459_v8  ;;  %v264_v34 = vsel %vm5545_vm4, 0, %v263_v28  ;;  %vm5554_vm6 = vmand %vm239_vm0, %vm290_vm5  ;;  %v313_v36 = vld [vmem:[#allocation2 + $0x68] sm:$0x1]  ;;  %v199_v39 = vld [vmem:[%s5534_s11 + $0x80] sm:$0xff] }
  0x19   : > { %4496 = vmatprep.subr.bf16.mxu0 %v5236_v10  ;;  %5045 = vmatprep.subr.bf16.mxu1 %v5472_v11  ;;  %v1222_v40 = vrot.slane %v1220_v31, 1  ;;  %v1227_v41 = vrot.slane %v1225_v32, 1  ;;  %265 = vst [vmem:[#allocation2 + $0x60] sm:$0x1] %v264_v34  ;;  %v314_v42 = vsel %vm5554_vm6, 0, %v313_v36  ;;  %v5255_v43 = vld [vmem:[#allocation2] sm:$0xff]   ;;  %v4347_v45 = vpack.c.bf16 %v199_v39, %v199_v39  ;;  %vm5571_vm8 = vmor %vm240_vm3, %vm420_vm7 }
  0x1a   : > { %v200_v44 = vld [vmem:[%s5534_s11 + $0x88] sm:$0xff]  ;;  %315 = vst [vmem:[#allocation2 + $0x68] sm:$0x1] %v314_v42  ;;  %v542_v46 = vshrl.u32 %v4345_v37, 16  ;;  %v545_v47 = vshll.u32 %v4345_v37, 16  ;;  %v550_v48 = vshrl.u32 %v4346_v38, 16  ;;  %vm5581_vm9 = vmand %vm742_vm1, %vm290_vm5 }
  0x1b   : > { %v553_v49 = vshll.u32 %v4346_v38, 16  ;;  %v1223_v50 = vor.u32 %v1222_v40, %v1218_v30  ;;  %v266_v51 = vld [vmem:[#allocation2 + $0x6c] sm:$0x1]  ;;  %v316_v52 = vld [vmem:[#allocation2 + $0x74] sm:$0x1]  ;;  %v4348_v53 = vpack.c.bf16 %v200_v44, %v200_v44  ;;  %v559_v54 = vshrl.u32 %v4347_v45, 16 }
  0x1c   : > { %4497 = vmatpush3.bf16.msra.mxu0 %v5238_v12  ;;  %5053 = vmatpush3.bf16.msra.mxu1 %v5472_v11  ;;  %v562_v55 = vshll.u32 %v4347_v45, 16  ;;  %v544_v56 = vrot.slane %v542_v46, 7  ;;  %v552_v57 = vrot.slane %v550_v48, 7  ;;  %v267_v58 = vsel %vm5545_vm4, 0, %v266_v51  ;;  %v5258_v2 = vld [vmem:[%s6455_s1 + $0x100] sm:$0xff]   ;;  %v184_v26 = vld [vmem:[%s5534_s11 + $0x8] sm:$0xff] }
  0x1d   : > { %4498 = vmatprep.subr.bf16.mxu0 %v5239_v13  ;;  %5046 = vmatprep.subr.bf16.mxu1 %v5487_v14  ;;  %v317_v59 = vsel %vm5554_vm6, 0, %v316_v52  ;;  %v1228_v60 = vsel %vm1216_vm2, %v1223_v50, %v1227_v41  ;;  %268 = vst [vmem:[#allocation2 + $0x6c] sm:$0x1] %v267_v58  ;;  %v561_v62 = vrot.slane %v559_v54, 7  ;;  %v567_v63 = vshrl.u32 %v4348_v53, 16  ;;  %v183_v25 = vld [vmem:[%s5534_s11] sm:$0xff] }
  0x1e   : > { %318 = vst [vmem:[#allocation2 + $0x74] sm:$0x1] %v317_v59  ;;  %v570_v0 = vshll.u32 %v4348_v53, 16  ;;  %2030 = vmatprep.mubr.bf16.mxu0 %v1228_v60  ;;  %v547_v3 = vor.u32 %v545_v47, %v544_v56  ;;  %v548_v4 = vrot.slane %v544_v56, 4  ;;  %v555_v6 = vor.u32 %v553_v49, %v552_v57  ;;  %v242_v27 = vld [vmem:[#allocation2 + $0xc] sm:$0x1] }
  0x1f   : > { %v557_v7 = vrot.slane %v552_v57, 4  ;;  %v565_v10 = vrot.slane %v561_v62, 4  ;;  %v569_v12 = vrot.slane %v567_v63, 7  ;;  %v243_v28 = vsel %vm5545_vm4, 0, %v242_v27  ;;  %v201_v32 = vld [vmem:[%s5534_s11 + $0x90] sm:$0xff]  ;;  %v202_v34 = vld [vmem:[%s5534_s11 + $0x98] sm:$0xff] }
  0x20   : > { %4499 = vmatpush3.bf16.msra.mxu0 %v5241_v15  ;;  %5054 = vmatpush3.bf16.msra.mxu1 %v5487_v14  ;;  %v556_v13 = vsel %vm5571_vm8, %v548_v4, %v555_v6  ;;  %v793_v15 = vld [vmem:[#allocation2 + $0x60] sm:$0xf]  ;;  %v4331_v30 = vpack.c.bf16 %v183_v25, %v183_v25  ;;  %v4332_v31 = vpack.c.bf16 %v184_v26, %v184_v26  ;;  %v269_v45 = vld [vmem:[#allocation2 + $0x78] sm:$0x1]  ;;  %v272_v54 = vld [vmem:[#allocation2 + $0x84] sm:$0x1] }
  0x21   : > { %4500 = vmatprep.subr.bf16.mxu0 %v5242_v16  ;;  %5047 = vmatprep.subr.bf16.mxu1 %v5504_v17  ;;  %v794_v16 = vsel %vm5581_vm9, %v547_v3, %v793_v15  ;;  %796 = vst [vmem:[#allocation2 + $0x64] sm:$0xf] %v556_v13  ;;  %244 = vst [vmem:[#allocation2 + $0xc] sm:$0x1] %v243_v28  ;;  %v4349_v39 = vpack.c.bf16 %v201_v32, %v201_v32  ;;  %v319_v46 = vld [vmem:[#allocation2 + $0x80] sm:$0x1] }
  0x22   : > { %795 = vst [vmem:[#allocation2 + $0x60] sm:$0xf] %v794_v16  ;;  %v4350_v40 = vpack.c.bf16 %v202_v34, %v202_v34  ;;  %v426_v44 = vshll.u32 %v4331_v30, 16  ;;  %v431_v47 = vshrl.u32 %v4332_v31, 16  ;;  %v434_v48 = vshll.u32 %v4332_v31, 16  ;;  %v203_v53 = vld [vmem:[%s5534_s11 + $0xa0] sm:$0xff] }
  0x23   : > { %v320_v49 = vsel %vm5554_vm6, 0, %v319_v46  ;;  %v576_v51 = vshrl.u32 %v4349_v39, 16  ;;  %v579_v52 = vshll.u32 %v4349_v39, 16  ;;  %v204_v58 = vld [vmem:[%s5534_s11 + $0xa8] sm:$0xff]  ;;  %v273_v59 = vsel %vm5545_vm4, 0, %v272_v54 }
  0x24   : > { %4501 = vmatpush3.bf16.msra.mxu0 %v5244_v18  ;;  %5055 = vmatpush3.bf16.msra.mxu1 %v5504_v17  ;;  %v797_v18 = vld [vmem:[#allocation2 + $0x68] sm:$0x1]  ;;  %v800_v36 = vld [vmem:[#allocation2 + $0x6c] sm:$0xf]  ;;  %321 = vst [vmem:[#allocation2 + $0x80] sm:$0x1] %v320_v49  ;;  %v4351_v13 = vpack.c.bf16 %v203_v53, %v203_v53  ;;  %v4352_v25 = vpack.c.bf16 %v204_v58, %v204_v58 }
  0x25   : > { %4502 = vmatprep.subr.bf16.mxu0 %v5245_v19  ;;  %5048 = vmatprep.subr.bf16.mxu1 %v5518_v20  ;;  %v564_v19 = vor.u32 %v562_v55, %v561_v62  ;;  %v798_v24 = vsel %vm5545_vm4, %v557_v7, %v797_v18  ;;  %v804_v37 = vld [vmem:[#allocation2 + $0x74] sm:$0x1]  ;;  %v433_v55 = vrot.slane %v431_v47, 7  ;;  %v584_v56 = vshrl.u32 %v4350_v40, 16  ;;  %274 = vst [vmem:[#allocation2 + $0x84] sm:$0x1] %v273_v59 }
  0x26   : > { %799 = vst [vmem:[#allocation2 + $0x68] sm:$0x1] %v798_v24  ;;  %v587_v57 = vshll.u32 %v4350_v40, 16  ;;  %v596_v40 = vshll.u32 %v4351_v13, 16  ;;  %v5261_v47 = vld [vmem:[%s6455_s1 + $0xc8] sm:$0xff]   ;;  %v5269_v53 = vld [vmem:[%s6455_s1 + $0x110] sm:$0xff]  }
  0x27   : > { %v801_v41 = vsel %vm5581_vm9, %v564_v19, %v800_v36  ;;  %v436_v3 = vor.u32 %v434_v48, %v433_v55  ;;  %v438_v4 = vrot.slane %v433_v55, 4  ;;  %v586_v19 = vrot.slane %v584_v56, 7 }
  0x28   : > { %4503 = vmatpush3.bf16.msra.mxu0 %v5247_v21  ;;  %5056 = vmatpush3.bf16.msra.mxu1 %v5518_v20  ;;  %v572_v21 = vor.u32 %v570_v0, %v569_v12  ;;  %802 = vst [vmem:[#allocation2 + $0x6c] sm:$0xf] %v801_v41  ;;  %v578_v0 = vrot.slane %v576_v51, 7  ;;  %v744_v7 = vld [vmem:[#allocation2 + $0xc] sm:$0xf]  ;;  %v593_v36 = vshrl.u32 %v4351_v13, 16 }
  0x29   : > { %4504 = vmatprep.subr.bf16.mxu0 %v5248_v22  ;;  %5049 = vmatprep.subr.bf16.mxu1 %v5529_v23  ;;  %v574_v22 = vrot.slane %v569_v12, 4  ;;  %v5253_v60 = vld [vmem:[#allocation2 + $0x60] sm:$0xfe]   ;;  %v591_v28 = vrot.slane %v586_v19, 4  ;;  %v186_v13 = vld [vmem:[%s5534_s11 + $0x18] sm:$0xff] }
  0x2a   : > { %v1692_v6 = vrot.slane %v5253_v60, 1  ;;  %v582_v12 = vrot.slane %v578_v0, 4  ;;  %v5271_v60 = vld [vmem:[%s6455_s1 + $0x118] sm:$0xff]  }
  0x2b   : > { %v805_v42 = vsel %vm5545_vm4, %v574_v22, %v804_v37  ;;  %v811_v32 = vld [vmem:[#allocation2 + $0x80] sm:$0x1] }
  0x2c   : > { %4505 = vmatpush3.bf16.msra.mxu0 %v5250_v29  ;;  %5057 = vmatpush3.bf16.msra.mxu1 %v5529_v23  ;;  %v292_v29 = vld [vmem:[#allocation2 + $0x14] sm:$0x1]  ;;  %806 = vst [vmem:[#allocation2 + $0x74] sm:$0x1] %v805_v42  ;;  %v812_v39 = vsel %vm5545_vm4, %v591_v28, %v811_v32  ;;  %v814_v41 = vld [vmem:[#allocation2 + $0x84] sm:$0xf] }
  0x2d   : > { %4898 = vmatprep.subr.bf16.mxu0 %v5434_v1  ;;  %4626 = vmatprep.subr.bf16.mxu1 %v5258_v2  ;;  %v293_v38 = vsel %vm5554_vm6, 0, %v292_v29  ;;  %v5254_v2 = vld [vmem:[#allocation2 + $0x68] ss:$0 sps:$4 sm:$0x11]   ;;  %813 = vst [vmem:[#allocation2 + $0x80] sm:$0x1] %v812_v39 }
  0x2e   : > { %294 = vst [vmem:[#allocation2 + $0x14] sm:$0x1] %v293_v38  ;;  %v1693_v15 = vrot.slane %v5254_v2, 1  ;;  %v5260_v42 = vld [vmem:[%s6455_s1 + $0x108] sm:$0xff]   ;;  %v275_v28 = vld [vmem:[#allocation2 + $0x90] sm:$0x1] }
  0x2f   : > { %2031 = vmatmul.mubr.bf16.vlgmr.msra.gmra.mrb[0].mxu0 %v5255_v43  ;;  %v423_v43 = vshrl.u32 %v4331_v30, 16  ;;  %v5259_v30 = vld [vmem:[%s6455_s1 + $0xc0] sm:$0xff]   ;;  %v278_v39 = vld [vmem:[#allocation2 + $0x9c] sm:$0x1] }
  0x30   : > { %4899 = vmatpush3.bf16.msra.mxu0 %v5434_v1  ;;  %v573_v1 = vsel %vm5571_vm8, %v565_v10, %v572_v21  ;;  %v581_v10 = vor.u32 %v579_v52, %v578_v0  ;;  %v322_v21 = vld [vmem:[#allocation2 + $0x8c] sm:$0x1]  ;;  %v5628_v26 = vsel %vm1667_vm10, %v1692_v6, %v1693_v15  ;;  %v185_v0 = vld [vmem:[%s5534_s11 + $0x10] sm:$0xff]  ;;  %v207_v32 = vld [vmem:[%s5534_s11 + $0xc0] sm:$0xff] }
  0x31   : > { %4900 = vmatprep.subr.bf16.mxu0 %v5447_v5  ;;  %803 = vst [vmem:[#allocation2 + $0x70] sm:$0xf] %v573_v1  ;;  %v425_v50 = vrot.slane %v423_v43, 7  ;;  %v589_v1 = vor.u32 %v587_v57, %v586_v19  ;;  %4930 = vmatprep.mubr.bf16.mxu1 %v5628_v26  ;;  %v323_v34 = vsel %vm5554_vm6, 0, %v322_v21  ;;  %v595_v43 = vrot.slane %v593_v36, 7  ;;  %v205_v21 = vld [vmem:[%s5534_s11 + $0xb0] sm:$0xff] }
  0x32   : > { %324 = vst [vmem:[#allocation2 + $0x8c] sm:$0x1] %v323_v34  ;;  %v4334_v19 = vpack.c.bf16 %v186_v13, %v186_v13  ;;  %v4353_v36 = vpack.c.bf16 %v205_v21, %v205_v21 }
  0x33   : > { %v428_v62 = vor.u32 %v426_v44, %v425_v50  ;;  %v429_v63 = vrot.slane %v425_v50, 4  ;;  %v5257_v27 = vld [vmem:[#allocation2 + $0x74] ss:$0 sps:$4 sm:$0x11]   ;;  %v590_v38 = vsel %vm5571_vm8, %v582_v12, %v589_v1  ;;  %v601_v44 = vshrl.u32 %v4352_v25, 16  ;;  %v5272_v12 = vld [vmem:[%s6455_s1 + $0xd8] sm:$0xff]  }
  0x34   : > { %4901 = vmatpush3.bf16.msra.mxu0 %v5447_v5  ;;  %v270_v5 = vsel %vm5545_vm4, 0, %v269_v45  ;;  %v1696_v37 = vrot.slane %v5257_v27, 1  ;;  %810 = vst [vmem:[#allocation2 + $0x7c] sm:$0xf] %v590_v38  ;;  %v604_v45 = vshll.u32 %v4352_v25, 16  ;;  %v599_v48 = vrot.slane %v595_v43, 4 }
  0x35   : > { %4902 = vmatprep.subr.bf16.mxu0 %v5459_v8  ;;  %271 = vst [vmem:[#allocation2 + $0x78] sm:$0x1] %v270_v5  ;;  %v437_v16 = vsel %vm5571_vm8, %v429_v63, %v436_v3  ;;  %v748_v18 = vld [vmem:[#allocation2 + $0x14] sm:$0x1]  ;;  %v603_v5 = vrot.slane %v601_v44, 7  ;;  %v206_v1 = vld [vmem:[%s5534_s11 + $0xb8] sm:$0xff] }
  0x36   : > { %747 = vst [vmem:[#allocation2 + $0x10] sm:$0xf] %v437_v16  ;;  %v749_v24 = vsel %vm5545_vm4, %v438_v4, %v748_v18  ;;  %v5265_v4 = vld [vmem:[#allocation2 + $0x80] ss:$0 sps:$4 sm:$0x11]   ;;  %v208_v38 = vld [vmem:[%s5534_s11 + $0xc8] sm:$0xff] }
  0x37   : > { %750 = vst [vmem:[#allocation2 + $0x14] sm:$0x1] %v749_v24  ;;  %v606_v51 = vor.u32 %v604_v45, %v603_v5  ;;  %v608_v58 = vrot.slane %v603_v5, 4  ;;  %v1699_v16 = vrot.slane %v5265_v4, 1  ;;  %v295_v18 = vld [vmem:[#allocation2 + $0x20] sm:$0x1] }
  0x38   : > { %4903 = vmatpush3.bf16.msra.mxu0 %v5459_v8  ;;  %v745_v8 = vsel %vm5581_vm9, %v428_v62, %v744_v7  ;;  %v5256_v22 = vld [vmem:[#allocation2 + $0x6c] sm:$0xfe]   ;;  %v4333_v7 = vpack.c.bf16 %v185_v0, %v185_v0  ;;  %v296_v24 = vsel %vm5554_vm6, 0, %v295_v18  ;;  %v610_v45 = vshrl.u32 %v4353_v36, 16 }
  0x39   : > { %4904 = vmatprep.subr.bf16.mxu0 %v5472_v11  ;;  %746 = vst [vmem:[#allocation2 + $0xc] sm:$0xf] %v745_v8  ;;  %v607_v57 = vsel %vm5571_vm8, %v599_v48, %v606_v51  ;;  %v818_v59 = vld [vmem:[#allocation2 + $0x8c] sm:$0x1]  ;;  %297 = vst [vmem:[#allocation2 + $0x20] sm:$0x1] %v296_v24  ;;  %v4355_v51 = vpack.c.bf16 %v207_v32, %v207_v32 }
  0x3a   : > { %817 = vst [vmem:[#allocation2 + $0x88] sm:$0xf] %v607_v57  ;;  %v819_v6 = vsel %vm5545_vm4, %v608_v58, %v818_v59  ;;  %v440_v25 = vshrl.u32 %v4333_v7, 16  ;;  %v443_v27 = vshll.u32 %v4333_v7, 16  ;;  %v5280_v48 = vld [vmem:[%s6455_s1 + $0x120] sm:$0xff]   ;;  %v279_v59 = vsel %vm5545_vm4, 0, %v278_v39 }
  0x3b   : > { %820 = vst [vmem:[#allocation2 + $0x8c] sm:$0x1] %v819_v6  ;;  %280 = vst [vmem:[#allocation2 + $0x9c] sm:$0x1] %v279_v59  ;;  %v627_v13 = vshrl.u32 %v4355_v51, 16  ;;  %v187_v32 = vld [vmem:[%s5534_s11 + $0x20] sm:$0xff] }
  0x3c   : > { %4905 = vmatpush3.bf16.msra.mxu0 %v5472_v11  ;;  %v807_v29 = vld [vmem:[#allocation2 + $0x78] sm:$0xf]  ;;  %v1695_v11 = vrot.slane %v5256_v22, 1  ;;  %v442_v34 = vrot.slane %v440_v25, 7 }
  0x3d   : > { %4906 = vmatprep.subr.bf16.mxu0 %v5487_v14  ;;  %v808_v31 = vsel %vm5581_vm9, %v581_v10, %v807_v29  ;;  %v629_v21 = vrot.slane %v627_v13, 7 }
  0x3e   : > { %809 = vst [vmem:[#allocation2 + $0x78] sm:$0xf] %v808_v31  ;;  %v5648_v46 = vsel %vm1667_vm10, %v1695_v11, %v1696_v37  ;;  %v5263_v50 = vld [vmem:[#allocation2 + $0x14] ss:$0 sps:$4 sm:$0x11]   ;;  %v448_v11 = vshrl.u32 %v4334_v19, 16  ;;  %v4354_v37 = vpack.c.bf16 %v206_v1, %v206_v1 }
  0x3f   : > { %4931 = vmatmul.mubr.bf16.vlgmr.msra.gmra.mrb[0].mxu1 %v5648_v46  ;;  %v1237_v56 = vshll.u32 %v5263_v50, 16  ;;  %v276_v31 = vsel %vm5545_vm4, 0, %v275_v28  ;;  %v446_v44 = vrot.slane %v442_v34, 4  ;;  %v5282_v28 = vld [vmem:[%s6455_s1 + $0x128] sm:$0xff]  }
  0x40   : > { %4907 = vmatpush3.bf16.msra.mxu0 %v5487_v14  ;;  %v598_v14 = vor.u32 %v596_v40, %v595_v43  ;;  %4627 = vmatpush3.bf16.msra.mxu1 %v5259_v30  ;;  %v5262_v49 = vld [vmem:[#allocation2 + $0xc] sm:$0xff]   ;;  %v451_v30 = vshll.u32 %v4334_v19, 16  ;;  %277 = vst [vmem:[#allocation2 + $0x90] sm:$0x1] %v276_v31  ;;  %v445_v43 = vor.u32 %v443_v27, %v442_v34 }
  0x41   : > { %4908 = vmatprep.subr.bf16.mxu0 %v5504_v17  ;;  %4628 = vmatprep.subr.bf16.mxu1 %v5260_v42  ;;  %v1230_v54 = vshrl.u32 %v5262_v49, 16  ;;  %v1232_v55 = vshll.u32 %v5262_v49, 16  ;;  %v5669_v63 = vld [vmem:[#allocation2 + $0xc] sm:$0xff]   ;;  %v1239_v2 = vrot.slane %v1237_v56, 1 }
  0x42   : > { %v815_v52 = vsel %vm5581_vm9, %v598_v14, %v814_v41  ;;  %v450_v41 = vrot.slane %v448_v11, 7  ;;  %v328_v14 = vld [vmem:[#allocation2 + $0xa4] sm:$0x1]  ;;  %v5268_v5 = vld [vmem:[#allocation2 + $0x8c] ss:$0 sps:$4 sm:$0x11]  }
  0x43   : > { %816 = vst [vmem:[#allocation2 + $0x84] sm:$0xf] %v815_v52  ;;  %v1234_v62 = vrot.slane %v1232_v55, 1  ;;  %v4356_v52 = vpack.c.bf16 %v208_v38, %v208_v38  ;;  %v618_v55 = vshrl.u32 %v4354_v37, 16  ;;  %v1702_v56 = vrot.slane %v5268_v5, 1  ;;  %v5283_v31 = vld [vmem:[%s6455_s1 + $0xe8] sm:$0xff]  }
  0x44   : > { %4909 = vmatpush3.bf16.msra.mxu0 %v5504_v17  ;;  %v5270_v17 = vld [vmem:[%s6455_s1 + $0xd0] sm:$0xff]   ;;  %4629 = vmatpush3.bf16.msra.mxu1 %v5261_v47  ;;  %v613_v47 = vshll.u32 %v4353_v36, 16  ;;  %v453_v50 = vor.u32 %v451_v30, %v450_v41  ;;  %v633_v30 = vrot.slane %v629_v21, 4  ;;  %v188_v36 = vld [vmem:[%s5534_s11 + $0x28] sm:$0xff]  ;;  %v828_v39 = vld [vmem:[#allocation2 + $0x9c] sm:$0xf] }
  0x45   : > { %4910 = vmatprep.subr.bf16.mxu0 %v5518_v20  ;;  %v5264_v3 = vld [vmem:[#allocation2 + $0x78] sm:$0xfe]   ;;  %4630 = vmatprep.subr.bf16.mxu1 %v5269_v53  ;;  %v1235_v10 = vor.u32 %v1234_v62, %v1230_v54  ;;  %v455_v53 = vrot.slane %v450_v41, 4  ;;  %v612_v54 = vrot.slane %v610_v45, 7  ;;  %v5281_v62 = vld [vmem:[%s6455_s1 + $0xe0] sm:$0xff]   ;;  %v620_v6 = vrot.slane %v618_v55, 7 }
  0x46   : > { %v1698_v15 = vrot.slane %v5264_v3, 1  ;;  %v454_v57 = vsel %vm5571_vm8, %v446_v44, %v453_v50  ;;  %v635_v18 = vshrl.u32 %v4356_v52, 16  ;;  %v638_v24 = vshll.u32 %v4356_v52, 16  ;;  %v298_v38 = vld [vmem:[#allocation2 + $0x2c] sm:$0x1] }
  0x47   : > { %v5684_v22 = vsel %vm1216_vm2, %v1235_v10, %v1239_v2  ;;  %754 = vst [vmem:[#allocation2 + $0x1c] sm:$0xf] %v454_v57  ;;  %v755_v2 = vld [vmem:[#allocation2 + $0x20] sm:$0x1]  ;;  %v615_v3 = vor.u32 %v613_v47, %v612_v54  ;;  %v616_v4 = vrot.slane %v612_v54, 4  ;;  %v209_v47 = vld [vmem:[%s5534_s11 + $0xd0] sm:$0xff] }
  0x48   : > { %4911 = vmatpush3.bf16.msra.mxu0 %v5518_v20  ;;  %v245_v20 = vld [vmem:[#allocation2 + $0x18] sm:$0x1]  ;;  %4631 = vmatpush3.bf16.msra.mxu1 %v5270_v17  ;;  %v5692_v29 = vsel %vm1667_vm10, %v1698_v15, %v1699_v16  ;;  %v621_v17 = vshll.u32 %v4354_v37, 16  ;;  %v756_v10 = vsel %vm5545_vm4, %v455_v53, %v755_v2  ;;  %v625_v16 = vrot.slane %v620_v6, 4  ;;  %v248_v37 = vld [vmem:[#allocation2 + $0x24] sm:$0x1] }
  0x49   : > { %4912 = vmatprep.subr.bf16.mxu0 %v5529_v23  ;;  %v246_v8 = vsel %vm5545_vm4, 0, %v245_v20  ;;  %2038 = vmatprep.mubr.bf16.mxu0 %v5684_v22  ;;  %v630_v20 = vshll.u32 %v4355_v51, 16  ;;  %757 = vst [vmem:[#allocation2 + $0x20] sm:$0x1] %v756_v10  ;;  %v637_v1 = vrot.slane %v635_v18, 7  ;;  %v249_v44 = vsel %vm5545_vm4, 0, %v248_v37 }
  0x4a   : > { %247 = vst [vmem:[#allocation2 + $0x18] sm:$0x1] %v246_v8  ;;  %4632 = vmatprep.subr.bf16.mxu1 %v5271_v60  ;;  %4934 = vmatprep.mubr.bf16.mxu1 %v5692_v29  ;;  %v5267_v40 = vld [vmem:[#allocation2 + $0x84] sm:$0xfe]   ;;  %v329_v60 = vsel %vm5554_vm6, 0, %v328_v14  ;;  %v623_v15 = vor.u32 %v621_v17, %v620_v6  ;;  %v299_v52 = vsel %vm5554_vm6, 0, %v298_v38 }
  0x4b   : > { %2039 = vmatmul.mubr.bf16.gmra.mrb[4].mxu0 %v5669_v63  ;;  %v1701_v49 = vrot.slane %v5267_v40, 1  ;;  %330 = vst [vmem:[#allocation2 + $0xa4] sm:$0x1] %v329_v60  ;;  %v632_v11 = vor.u32 %v630_v20, %v629_v21  ;;  %v640_v34 = vor.u32 %v638_v24, %v637_v1  ;;  %v4335_v40 = vpack.c.bf16 %v187_v32, %v187_v32  ;;  %v210_v54 = vld [vmem:[%s5534_s11 + $0xd8] sm:$0xff]  ;;  %v281_v55 = vld [vmem:[#allocation2 + $0xa8] sm:$0x1] }
  0x4c   : > { %4913 = vmatpush3.bf16.msra.mxu0 %v5529_v23  ;;  %v325_v23 = vld [vmem:[#allocation2 + $0x98] sm:$0x1]  ;;  %4633 = vmatpush3.bf16.msra.mxu1 %v5272_v12  ;;  %v821_v12 = vld [vmem:[#allocation2 + $0x90] sm:$0xf]  ;;  %v624_v25 = vsel %vm5571_vm8, %v616_v4, %v623_v15  ;;  %250 = vst [vmem:[#allocation2 + $0x24] sm:$0x1] %v249_v44 }
  0x4d   : > { %v326_v42 = vsel %vm5554_vm6, 0, %v325_v23  ;;  %4634 = vmatprep.subr.bf16.mxu1 %v5280_v48  ;;  %v5717_v7 = vsel %vm1667_vm10, %v1701_v49, %v1702_v56  ;;  %v822_v8 = vsel %vm5581_vm9, %v615_v3, %v821_v12  ;;  %824 = vst [vmem:[#allocation2 + $0x94] sm:$0xf] %v624_v25  ;;  %v642_v23 = vrot.slane %v637_v1, 4  ;;  %300 = vst [vmem:[#allocation2 + $0x2c] sm:$0x1] %v299_v52 }
  0x4e   : > { %327 = vst [vmem:[#allocation2 + $0x98] sm:$0x1] %v326_v42  ;;  %4935 = vmatmul.mubr.bf16.gmra.mrb[4].mxu1 %v5717_v7  ;;  %823 = vst [vmem:[#allocation2 + $0x90] sm:$0xf] %v822_v8  ;;  %v641_v42 = vsel %vm5571_vm8, %v633_v30, %v640_v34  ;;  %v4336_v49 = vpack.c.bf16 %v188_v36, %v188_v36  ;;  %v457_v53 = vshrl.u32 %v4335_v40, 16  ;;  %v460_v57 = vshll.u32 %v4335_v40, 16 }
  0x4f   : > { %831 = vst [vmem:[#allocation2 + $0xa0] sm:$0xf] %v641_v42  ;;  %v331_v10 = vld [vmem:[#allocation2 + $0xb0] sm:$0x1]  ;;  %v211_v12 = vld [vmem:[%s5534_s11 + $0xe0] sm:$0xff]  ;;  %v282_v15 = vsel %vm5545_vm4, 0, %v281_v55 }
  0x50   : > { %4635 = vmatpush3.bf16.msra.mxu1 %v5281_v62  ;;  %v5274_v45 = vld [vmem:[#allocation2 + $0x20] ss:$0 sps:$4 sm:$0x11]   ;;  %v4357_v62 = vpack.c.bf16 %v209_v47, %v209_v47  ;;  %v459_v3 = vrot.slane %v457_v53, 7  ;;  %v465_v4 = vshrl.u32 %v4336_v49, 16  ;;  %v468_v6 = vshll.u32 %v4336_v49, 16 }
  0x51   : > { %v751_v58 = vld [vmem:[#allocation2 + $0x18] sm:$0xf]  ;;  %4636 = vmatprep.subr.bf16.mxu1 %v5282_v28  ;;  %v1249_v50 = vshll.u32 %v5274_v45, 16  ;;  %v212_v8 = vld [vmem:[%s5534_s11 + $0xe8] sm:$0xff]  ;;  %v5291_v18 = vld [vmem:[%s6455_s1 + $0x130] sm:$0xff]   ;;  %v4359_v25 = vpack.c.bf16 %v211_v12, %v211_v12 }
  0x52   : > { %v752_v0 = vsel %vm5581_vm9, %v445_v43, %v751_v58  ;;  %v829_v43 = vsel %vm5581_vm9, %v632_v11, %v828_v39  ;;  %v832_v5 = vld [vmem:[#allocation2 + $0xa4] sm:$0x1]  ;;  %v462_v24 = vor.u32 %v460_v57, %v459_v3  ;;  %283 = vst [vmem:[#allocation2 + $0xa8] sm:$0x1] %v282_v15  ;;  %v463_v1 = vrot.slane %v459_v3, 4  ;;  %v5293_v38 = vld [vmem:[%s6455_s1 + $0x138] sm:$0xff]  }
  0x53   : > { %753 = vst [vmem:[#allocation2 + $0x18] sm:$0xf] %v752_v0  ;;  %830 = vst [vmem:[#allocation2 + $0x9c] sm:$0xf] %v829_v43  ;;  %v833_v51 = vsel %vm5545_vm4, %v642_v23, %v832_v5  ;;  %v1251_v58 = vrot.slane %v1249_v50, 1  ;;  %v4358_v0 = vpack.c.bf16 %v210_v54, %v210_v54  ;;  %v467_v28 = vrot.slane %v465_v4, 7 }
  0x54   : > { %4637 = vmatpush3.bf16.msra.mxu1 %v5283_v31  ;;  %834 = vst [vmem:[#allocation2 + $0xa4] sm:$0x1] %v833_v51  ;;  %v758_v11 = vld [vmem:[#allocation2 + $0x24] sm:$0xf]  ;;  %v644_v30 = vshrl.u32 %v4357_v62, 16  ;;  %v5292_v31 = vld [vmem:[%s6455_s1 + $0xf0] sm:$0xff]   ;;  %v4360_v42 = vpack.c.bf16 %v212_v8, %v212_v8 }
  0x55   : > { %v825_v19 = vld [vmem:[#allocation2 + $0x98] sm:$0x1]  ;;  %v5275_v59 = vld [vmem:[#allocation2 + $0x90] sm:$0xfe]   ;;  %4638 = vmatprep.subr.bf16.mxu1 %v5291_v18  ;;  %v759_v34 = vsel %vm5581_vm9, %v462_v24, %v758_v11  ;;  %v647_v23 = vshll.u32 %v4357_v62, 16  ;;  %v652_v36 = vshrl.u32 %v4358_v0, 16  ;;  %v470_v40 = vor.u32 %v468_v6, %v467_v28 }
  0x56   : > { %v826_v27 = vsel %vm5545_vm4, %v625_v16, %v825_v19  ;;  %v1704_v13 = vrot.slane %v5275_v59, 1  ;;  %v332_v16 = vsel %vm5554_vm6, 0, %v331_v10  ;;  %v284_v37 = vld [vmem:[#allocation2 + $0xb4] sm:$0x1]  ;;  %760 = vst [vmem:[#allocation2 + $0x24] sm:$0xf] %v759_v34 }
  0x57   : > { %827 = vst [vmem:[#allocation2 + $0x98] sm:$0x1] %v826_v27  ;;  %333 = vst [vmem:[#allocation2 + $0xb0] sm:$0x1] %v332_v16  ;;  %v762_v43 = vld [vmem:[#allocation2 + $0x2c] sm:$0x1]  ;;  %v471_v5 = vsel %vm5571_vm8, %v463_v1, %v470_v40 }
  0x58   : > { %4639 = vmatpush3.bf16.msra.mxu1 %v5292_v31  ;;  %v646_v44 = vrot.slane %v644_v30, 7  ;;  %v654_v45 = vrot.slane %v652_v36, 7  ;;  %v655_v47 = vshll.u32 %v4358_v0, 16  ;;  %v334_v50 = vld [vmem:[#allocation2 + $0xbc] sm:$0x1]  ;;  %v661_v51 = vshrl.u32 %v4359_v25, 16 }
  0x59   : > { %4640 = vmatprep.subr.bf16.mxu1 %v5293_v38  ;;  %761 = vst [vmem:[#allocation2 + $0x28] sm:$0xf] %v471_v5  ;;  %v835_v57 = vld [vmem:[#allocation2 + $0xa8] sm:$0xf]  ;;  %v335_v59 = vsel %vm5554_vm6, 0, %v334_v50  ;;  %v664_v3 = vshll.u32 %v4359_v25, 16 }
  0x5a   : > { %v5273_v41 = vld [vmem:[#allocation2 + $0x18] sm:$0xff]   ;;  %v649_v52 = vor.u32 %v647_v23, %v646_v44  ;;  %v650_v53 = vrot.slane %v646_v44, 4  ;;  %v657_v54 = vor.u32 %v655_v47, %v654_v45  ;;  %v659_v55 = vrot.slane %v654_v45, 4  ;;  %336 = vst [vmem:[#allocation2 + $0xbc] sm:$0x1] %v335_v59  ;;  %v5810_v40 = vld [vmem:[%s6455_s1 + $0x140] sm:$0xff]  }
  0x5b   : > { %v1242_v14 = vshrl.u32 %v5273_v41, 16  ;;  %v1244_v48 = vshll.u32 %v5273_v41, 16  ;;  %v5748_v56 = vld [vmem:[#allocation2 + $0x18] sm:$0xff]   ;;  %v5279_v39 = vld [vmem:[#allocation2 + $0xa4] ss:$0 sps:$4 sm:$0x11]  }
  0x5c   : > { %v5278_v21 = vld [vmem:[#allocation2 + $0x9c] sm:$0xfe]   ;;  %v472_v41 = vrot.slane %v467_v28, 4  ;;  %v658_v62 = vsel %vm5571_vm8, %v650_v53, %v657_v54  ;;  %v836_v0 = vsel %vm5581_vm9, %v649_v52, %v835_v57  ;;  %v669_v10 = vshrl.u32 %v4360_v42, 16  ;;  %v251_v18 = vld [vmem:[#allocation2 + $0x30] sm:$0x1] }
  0x5d   : > { %v1246_v17 = vrot.slane %v1244_v48, 1  ;;  %v1707_v32 = vrot.slane %v5278_v21, 1  ;;  %v1708_v48 = vrot.slane %v5279_v39, 1  ;;  %v5294_v4 = vld [vmem:[%s6455_s1 + $0xf8] sm:$0xff]   ;;  %837 = vst [vmem:[#allocation2 + $0xa8] sm:$0xf] %v836_v0 }
  0x5e   : > { %v5276_v60 = vld [vmem:[#allocation2 + $0x98] ss:$0 sps:$4 sm:$0x11]   ;;  %v763_v49 = vsel %vm5545_vm4, %v472_v41, %v762_v43  ;;  %838 = vst [vmem:[#allocation2 + $0xac] sm:$0xf] %v658_v62  ;;  %v672_v12 = vshll.u32 %v4360_v42, 16  ;;  %4641 = vmatpush3.bf16.msra.mxu1 %v5294_v4 }
  0x5f   : > { %v1247_v2 = vor.u32 %v1246_v17, %v1242_v14  ;;  %v1705_v20 = vrot.slane %v5276_v60, 1  ;;  %v285_v14 = vsel %vm5545_vm4, 0, %v284_v37  ;;  %764 = vst [vmem:[#allocation2 + $0x2c] sm:$0x1] %v763_v49  ;;  %v5783_v17 = vsel %vm1667_vm10, %v1707_v32, %v1708_v48  ;;  %v190_v8 = vld [vmem:[%s5534_s11 + $0x38] sm:$0xff]  ;;  %4946 = vmatprep.subr.bf16.mxu1 %v5810_v40  ;;  %v191_v59 = vld [vmem:[%s5534_s11 + $0x40] sm:$0xff] }
  0x60   : > { %286 = vst [vmem:[#allocation2 + $0xb4] sm:$0x1] %v285_v14  ;;  %v663_v60 = vrot.slane %v661_v51, 7  ;;  %v671_v16 = vrot.slane %v669_v10, 7  ;;  %v252_v24 = vsel %vm5545_vm4, 0, %v251_v18  ;;  %v5284_v28 = vld [vmem:[#allocation2 + $0x24] sm:$0xff]   ;;  %v4338_v34 = vpack.c.bf16 %v190_v8, %v190_v8 }
  0x61   : > { %v5760_v19 = vsel %vm1216_vm2, %v1247_v2, %v1251_v58  ;;  %v5764_v27 = vsel %vm1667_vm10, %v1704_v13, %v1705_v20  ;;  %v839_v58 = vld [vmem:[#allocation2 + $0xb0] sm:$0x1]  ;;  %v301_v25 = vld [vmem:[#allocation2 + $0x38] sm:$0x1]  ;;  %253 = vst [vmem:[#allocation2 + $0x30] sm:$0x1] %v252_v24  ;;  %v4339_v4 = vpack.c.bf16 %v191_v59, %v191_v59 }
  0x62   : > { %2046 = vmatprep.mubr.bf16.mxu0 %v5760_v19  ;;  %4938 = vmatprep.mubr.bf16.mxu1 %v5764_v27  ;;  %v840_v2 = vsel %vm5545_vm4, %v659_v55, %v839_v58  ;;  %v667_v6 = vrot.slane %v663_v60, 4  ;;  %v189_v13 = vld [vmem:[%s5534_s11 + $0x30] sm:$0xff]  ;;  %v666_v20 = vor.u32 %v664_v3, %v663_v60  ;;  %v674_v11 = vor.u32 %v672_v12, %v671_v16  ;;  %v846_v38 = vld [vmem:[#allocation2 + $0xbc] sm:$0x1]  ;;  %v5814_v47 = vld [vmem:[#allocation2 + $0x24] sm:$0xff]  }
  0x63   : > { %2047 = vmatmul.mubr.bf16.gmra.mrb[8].mxu0 %v5748_v56  ;;  %4939 = vmatmul.mubr.bf16.gmra.mrb[8].mxu1 %v5783_v17  ;;  %841 = vst [vmem:[#allocation2 + $0xb0] sm:$0x1] %v840_v2  ;;  %v4337_v15 = vpack.c.bf16 %v189_v13, %v189_v13  ;;  %v676_v30 = vrot.slane %v671_v16, 4  ;;  %v1254_v23 = vshrl.u32 %v5284_v28, 16  ;;  %v1256_v36 = vshll.u32 %v5284_v28, 16  ;;  %v192_v60 = vld [vmem:[%s5534_s11 + $0x48] sm:$0xff] }
  0x64   : > { %v675_v37 = vsel %vm5571_vm8, %v667_v6, %v674_v11  ;;  %v302_v39 = vsel %vm5554_vm6, 0, %v301_v25  ;;  %v482_v50 = vshrl.u32 %v4338_v34, 16  ;;  %v485_v54 = vshll.u32 %v4338_v34, 16  ;;  %v254_v2 = vld [vmem:[#allocation2 + $0x3c] sm:$0x1] }
  0x65   : > { %v474_v1 = vshrl.u32 %v4337_v15, 16  ;;  %845 = vst [vmem:[#allocation2 + $0xb8] sm:$0xf] %v675_v37  ;;  %v847_v42 = vsel %vm5545_vm4, %v676_v30, %v846_v38  ;;  %303 = vst [vmem:[#allocation2 + $0x38] sm:$0x1] %v302_v39  ;;  %v1258_v44 = vrot.slane %v1256_v36, 1  ;;  %v4340_v6 = vpack.c.bf16 %v192_v60, %v192_v60 }
  0x66   : > { %v5285_v32 = vld [vmem:[#allocation2 + $0x2c] ss:$0 sps:$4 sm:$0x11]   ;;  %848 = vst [vmem:[#allocation2 + $0xbc] sm:$0x1] %v847_v42  ;;  %v477_v14 = vshll.u32 %v4337_v15, 16 }
  0x67   : > { %v842_v21 = vld [vmem:[#allocation2 + $0xb4] sm:$0xf]  ;;  %v1261_v41 = vshll.u32 %v5285_v32, 16  ;;  %v476_v43 = vrot.slane %v474_v1, 7  ;;  %v5286_v45 = vld [vmem:[#allocation2 + $0xa8] sm:$0xfe]   ;;  %v1259_v51 = vor.u32 %v1258_v44, %v1254_v23 }
  0x68   : > { %v843_v31 = vsel %vm5581_vm9, %v666_v20, %v842_v21  ;;  %v1710_v52 = vrot.slane %v5286_v45, 1  ;;  %v484_v57 = vrot.slane %v482_v50, 7  ;;  %v765_v58 = vld [vmem:[#allocation2 + $0x30] sm:$0xf]  ;;  %v304_v3 = vld [vmem:[#allocation2 + $0x44] sm:$0x1] }
  0x69   : > { %844 = vst [vmem:[#allocation2 + $0xb4] sm:$0xf] %v843_v31  ;;  %v1263_v48 = vrot.slane %v1261_v41, 1  ;;  %v480_v49 = vrot.slane %v476_v43, 4  ;;  %v479_v53 = vor.u32 %v477_v14, %v476_v43  ;;  %v255_v20 = vsel %vm5545_vm4, 0, %v254_v2  ;;  %v193_v15 = vld [vmem:[%s5534_s11 + $0x50] sm:$0xff] }
  0x6a   : > { %v5287_v5 = vld [vmem:[#allocation2 + $0xb0] ss:$0 sps:$4 sm:$0x11]   ;;  %v487_v12 = vor.u32 %v485_v54, %v484_v57  ;;  %v489_v13 = vrot.slane %v484_v57, 4  ;;  %v194_v16 = vld [vmem:[%s5534_s11 + $0x58] sm:$0xff]  ;;  %v4341_v24 = vpack.c.bf16 %v193_v15, %v193_v15  ;;  %v305_v11 = vsel %vm5554_vm6, 0, %v304_v3 }
  0x6b   : > { %v1711_v55 = vrot.slane %v5287_v5, 1  ;;  %v5820_v62 = vsel %vm1216_vm2, %v1259_v51, %v1263_v48  ;;  %v766_v0 = vsel %vm5581_vm9, %v479_v53, %v765_v58  ;;  %v257_v8 = vld [vmem:[#allocation2 + $0x48] sm:$0x1]  ;;  %256 = vst [vmem:[#allocation2 + $0x3c] sm:$0x1] %v255_v20  ;;  %v4342_v30 = vpack.c.bf16 %v194_v16, %v194_v16 }
  0x6c   : > { %2054 = vmatprep.mubr.bf16.mxu0 %v5820_v62  ;;  %767 = vst [vmem:[#allocation2 + $0x30] sm:$0xf] %v766_v0  ;;  %v769_v21 = vld [vmem:[#allocation2 + $0x38] sm:$0x1]  ;;  %v488_v1 = vsel %vm5571_vm8, %v480_v49, %v487_v12  ;;  %306 = vst [vmem:[#allocation2 + $0x44] sm:$0x1] %v305_v11 }
  0x6d   : > { %v5826_v10 = vsel %vm1667_vm10, %v1710_v52, %v1711_v55  ;;  %2055 = vmatmul.mubr.bf16.gmra.mrb[12].mxu0 %v5814_v47  ;;  %v5290_v25 = vld [vmem:[#allocation2 + $0xbc] ss:$0 sps:$4 sm:$0x11]   ;;  %v770_v28 = vsel %vm5545_vm4, %v489_v13, %v769_v21  ;;  %768 = vst [vmem:[#allocation2 + $0x34] sm:$0xf] %v488_v1  ;;  %v491_v32 = vshrl.u32 %v4339_v4, 16 }
  0x6e   : > { %4942 = vmatprep.mubr.bf16.mxu1 %v5826_v10  ;;  %771 = vst [vmem:[#allocation2 + $0x38] sm:$0x1] %v770_v28  ;;  %v494_v34 = vshll.u32 %v4339_v4, 16  ;;  %v499_v23 = vshrl.u32 %v4340_v6, 16  ;;  %v307_v36 = vld [vmem:[#allocation2 + $0x50] sm:$0x1] }
  0x6f   : > { %v1714_v37 = vrot.slane %v5290_v25, 1  ;;  %v502_v38 = vshll.u32 %v4340_v6, 16  ;;  %v258_v39 = vsel %vm5545_vm4, 0, %v257_v8  ;;  %v308_v41 = vsel %vm5554_vm6, 0, %v307_v36  ;;  %v195_v49 = vld [vmem:[%s5534_s11 + $0x60] sm:$0xff]  ;;  %v196_v53 = vld [vmem:[%s5534_s11 + $0x68] sm:$0xff] }
  0x70   : > { %v5289_v18 = vld [vmem:[#allocation2 + $0xb4] sm:$0xfe]   ;;  %v493_v42 = vrot.slane %v491_v32, 7  ;;  %v501_v43 = vrot.slane %v499_v23, 7  ;;  %259 = vst [vmem:[#allocation2 + $0x48] sm:$0x1] %v258_v39  ;;  %v4343_v13 = vpack.c.bf16 %v195_v49, %v195_v49  ;;  %v4344_v15 = vpack.c.bf16 %v196_v53, %v196_v53 }
  0x71   : > { %v1713_v31 = vrot.slane %v5289_v18, 1  ;;  %309 = vst [vmem:[#allocation2 + $0x50] sm:$0x1] %v308_v41  ;;  %v508_v44 = vshrl.u32 %v4341_v24, 16  ;;  %v511_v14 = vshll.u32 %v4341_v24, 16  ;;  %v516_v48 = vshrl.u32 %v4342_v30, 16 }
  0x72   : > { %v519_v5 = vshll.u32 %v4342_v30, 16  ;;  %v496_v50 = vor.u32 %v494_v34, %v493_v42  ;;  %v497_v51 = vrot.slane %v493_v42, 4  ;;  %v504_v52 = vor.u32 %v502_v38, %v501_v43  ;;  %v772_v54 = vld [vmem:[#allocation2 + $0x3c] sm:$0xf]  ;;  %v260_v58 = vld [vmem:[#allocation2 + $0x54] sm:$0x1] }
  0x73   : > { %v5845_v45 = vsel %vm1667_vm10, %v1713_v31, %v1714_v37  ;;  %v510_v55 = vrot.slane %v508_v44, 7  ;;  %v518_v57 = vrot.slane %v516_v48, 7  ;;  %v506_v60 = vrot.slane %v501_v43, 4  ;;  %v310_v3 = vld [vmem:[#allocation2 + $0x5c] sm:$0x1]  ;;  %v5305_v25 = vld [vmem:[%s6455_s1 + $0x148] sm:$0xff]  }
  0x74   : > { %4943 = vmatmul.mubr.bf16.gmra.mrb[12].mxu1 %v5845_v45  ;;  %v505_v59 = vsel %vm5571_vm8, %v497_v51, %v504_v52  ;;  %v773_v0 = vsel %vm5581_vm9, %v496_v50, %v772_v54  ;;  %v261_v2 = vsel %vm5545_vm4, 0, %v260_v58  ;;  %v5295_v4 = vld [vmem:[#allocation2 + $0x30] sm:$0xff]   ;;  %v776_v18 = vld [vmem:[#allocation2 + $0x44] sm:$0x1]  ;;  %v311_v31 = vsel %vm5554_vm6, 0, %v310_v3 }
  0x75   : > { %2658 = vmatprep.mubr.bf16.mxu1 %v5684_v22  ;;  %774 = vst [vmem:[#allocation2 + $0x3c] sm:$0xf] %v773_v0  ;;  %775 = vst [vmem:[#allocation2 + $0x40] sm:$0xf] %v505_v59  ;;  %v513_v6 = vor.u32 %v511_v14, %v510_v55  ;;  %v514_v22 = vrot.slane %v510_v55, 4  ;;  %v521_v12 = vor.u32 %v519_v5, %v518_v57  ;;  %v1266_v16 = vshrl.u32 %v5295_v4, 16 }
  0x76   : > { %262 = vst [vmem:[#allocation2 + $0x54] sm:$0x1] %v261_v2  ;;  %v5296_v20 = vld [vmem:[#allocation2 + $0x38] ss:$0 sps:$4 sm:$0x11]   ;;  %v1268_v8 = vshll.u32 %v5295_v4, 16  ;;  %v777_v28 = vsel %vm5545_vm4, %v506_v60, %v776_v18 }
  0x77   : > { %v522_v21 = vsel %vm5571_vm8, %v514_v22, %v521_v12  ;;  %v523_v24 = vrot.slane %v518_v57, 4  ;;  %v1273_v1 = vshll.u32 %v5296_v20, 16  ;;  %v779_v11 = vld [vmem:[#allocation2 + $0x48] sm:$0xf]  ;;  %778 = vst [vmem:[#allocation2 + $0x44] sm:$0x1] %v777_v28 }
  0x78   : > { %782 = vst [vmem:[#allocation2 + $0x4c] sm:$0xf] %v522_v21  ;;  %v783_v30 = vld [vmem:[#allocation2 + $0x50] sm:$0x1]  ;;  %v1270_v32 = vrot.slane %v1268_v8, 1  ;;  %v780_v34 = vsel %vm5581_vm9, %v513_v6, %v779_v11  ;;  %v525_v36 = vshrl.u32 %v4343_v13, 16 }
  0x79   : > { %v784_v23 = vsel %vm5545_vm4, %v523_v24, %v783_v30  ;;  %312 = vst [vmem:[#allocation2 + $0x5c] sm:$0x1] %v311_v31  ;;  %v1275_v37 = vrot.slane %v1273_v1, 1  ;;  %781 = vst [vmem:[#allocation2 + $0x48] sm:$0xf] %v780_v34  ;;  %v528_v38 = vshll.u32 %v4343_v13, 16 }
  0x7a   : > { %785 = vst [vmem:[#allocation2 + $0x50] sm:$0x1] %v784_v23  ;;  %v533_v39 = vshrl.u32 %v4344_v15, 16  ;;  %v536_v41 = vshll.u32 %v4344_v15, 16  ;;  %v1271_v42 = vor.u32 %v1270_v32, %v1266_v16  ;;  %v5871_v43 = vld [vmem:[#allocation2 + $0x30] sm:$0xff]   ;;  %v527_v44 = vrot.slane %v525_v36, 7 }
  0x7b   : > { %v5309_v8 = vld [vmem:[#allocation2 + $0x60] sm:$0xff]   ;;  %v5310_v1 = vld [vmem:[#allocation2 + $0x68] ss:$0 sps:$4 sm:$0x11]  }
  0x7c   : > { %2659 = vmatmul.mubr.bf16.vlgmr.msra.gmra.mrb[16].mxu1 %v5669_v63  ;;  %v5299_v14 = vld [vmem:[#allocation2 + $0x3c] sm:$0xff]   ;;  %v535_v48 = vrot.slane %v533_v39, 7  ;;  %v5876_v5 = vsel %vm1216_vm2, %v1271_v42, %v1275_v37  ;;  %v530_v63 = vor.u32 %v528_v38, %v527_v44  ;;  %v531_v49 = vrot.slane %v527_v44, 4  ;;  %v5313_v38 = vld [vmem:[#allocation2 + $0x6c] sm:$0xff]  }
  0x7d   : > { %4947 = vmatpush3.bf16.msra.mxu1 %v5810_v40  ;;  %2666 = vmatprep.mubr.bf16.mxu1 %v5760_v19  ;;  %v1278_v50 = vshrl.u32 %v5299_v14, 16  ;;  %v1280_v51 = vshll.u32 %v5299_v14, 16  ;;  %v786_v53 = vld [vmem:[#allocation2 + $0x54] sm:$0xf]  ;;  %v5888_v4 = vld [vmem:[#allocation2 + $0x3c] sm:$0xff]   ;;  %v1316_v28 = vshll.u32 %v5309_v8, 16 }
  0x7e   : > { %4948 = vmatprep.subr.bf16.mxu1 %v5305_v25  ;;  %2062 = vmatprep.mubr.bf16.mxu0 %v5876_v5  ;;  %v538_v52 = vor.u32 %v536_v41, %v535_v48  ;;  %v5312_v40 = vld [vmem:[%s6455_s1 + $0x150] sm:$0xff]   ;;  %v540_v54 = vrot.slane %v535_v48, 4  ;;  %v787_v55 = vsel %vm5581_vm9, %v530_v63, %v786_v53  ;;  %v5300_v57 = vld [vmem:[#allocation2 + $0x44] ss:$0 sps:$4 sm:$0x11]   ;;  %v1314_v23 = vshrl.u32 %v5309_v8, 16 }
  0x7f   : > { %2063 = vmatmul.mubr.bf16.gmra.mrb[16].mxu0 %v5871_v43  ;;  %v1282_v58 = vrot.slane %v1280_v51, 1  ;;  %788 = vst [vmem:[#allocation2 + $0x54] sm:$0xf] %v787_v55  ;;  %v1285_v2 = vshll.u32 %v5300_v57, 16  ;;  %v1318_v36 = vrot.slane %v1316_v28, 1  ;;  %v1321_v37 = vshll.u32 %v5310_v1, 16 }
  0x80   : > { %v539_v59 = vsel %vm5571_vm8, %v531_v49, %v538_v52  ;;  %v5302_v60 = vld [vmem:[#allocation2 + $0x48] sm:$0xff]   ;;  %v790_v12 = vld [vmem:[#allocation2 + $0x5c] sm:$0x1]  ;;  %v5314_v44 = vld [vmem:[#allocation2 + $0x74] ss:$0 sps:$4 sm:$0x11]  }
  0x81   : > { %4949 = vmatpush3.bf16.msra.mxu1 %v5305_v25  ;;  %789 = vst [vmem:[#allocation2 + $0x58] sm:$0xf] %v539_v59  ;;  %v1283_v0 = vor.u32 %v1282_v58, %v1278_v50  ;;  %v5303_v3 = vld [vmem:[#allocation2 + $0x50] ss:$0 sps:$4 sm:$0x11]   ;;  %v1290_v6 = vshrl.u32 %v5302_v60, 16  ;;  %v791_v15 = vsel %vm5545_vm4, %v540_v54, %v790_v12  ;;  %v1319_v48 = vor.u32 %v1318_v36, %v1314_v23 }
  0x82   : > { %4950 = vmatprep.subr.bf16.mxu1 %v5312_v40  ;;  %v1292_v22 = vshll.u32 %v5302_v60, 16  ;;  %v1287_v13 = vrot.slane %v1285_v2, 1  ;;  %v1297_v20 = vshll.u32 %v5303_v3, 16  ;;  %792 = vst [vmem:[#allocation2 + $0x5c] sm:$0x1] %v791_v15  ;;  %v5903_v31 = vld [vmem:[#allocation2 + $0x48] sm:$0xff]  }
  0x83   : > { %v5319_v42 = vld [vmem:[%s6455_s1 + $0x158] sm:$0xff]   ;;  %v1323_v63 = vrot.slane %v1321_v37, 1  ;;  %v1328_v49 = vshll.u32 %v5313_v38, 16  ;;  %v1333_v51 = vshll.u32 %v5314_v44, 16  ;;  %v5326_v55 = vld [vmem:[%s6455_s1 + $0x160] sm:$0xff]   ;;  %v5323_v28 = vld [vmem:[#allocation2 + $0x90] sm:$0xff]  }
  0x84   : > { %2667 = vmatmul.mubr.bf16.gmra.mrb[20].mxu1 %v5748_v56  ;;  %v1294_v16 = vrot.slane %v1292_v22, 1  ;;  %v5894_v18 = vsel %vm1216_vm2, %v1283_v0, %v1287_v13  ;;  %v1299_v56 = vrot.slane %v1297_v20, 1  ;;  %v5316_v52 = vld [vmem:[#allocation2 + $0x78] sm:$0xff]   ;;  %v5317_v58 = vld [vmem:[#allocation2 + $0x80] ss:$0 sps:$4 sm:$0x11]  }
  0x85   : > { %2674 = vmatprep.mubr.bf16.mxu1 %v5820_v62  ;;  %4951 = vmatpush3.bf16.msra.mxu1 %v5312_v40  ;;  %v5919_v53 = vsel %vm1216_vm2, %v1319_v48, %v1323_v63  ;;  %v1326_v40 = vshrl.u32 %v5313_v38, 16  ;;  %v1330_v54 = vrot.slane %v1328_v49, 1  ;;  %v1335_v57 = vrot.slane %v1333_v51, 1  ;;  %v5928_v0 = vld [vmem:[#allocation2 + $0x60] sm:$0xff]   ;;  %v5333_v13 = vld [vmem:[%s6455_s1 + $0x168] sm:$0xff]   ;;  %v5955_v38 = vld [vmem:[#allocation2 + $0x78] sm:$0xff]  }
  0x86   : > { %2070 = vmatprep.mubr.bf16.mxu0 %v5894_v18  ;;  %v1295_v21 = vor.u32 %v1294_v16, %v1290_v6  ;;  %4952 = vmatprep.subr.bf16.mxu1 %v5319_v42  ;;  %v1340_v59 = vshll.u32 %v5316_v52, 16  ;;  %v1338_v2 = vshrl.u32 %v5316_v52, 16  ;;  %v1345_v22 = vshll.u32 %v5317_v58, 16  ;;  %v5320_v12 = vld [vmem:[#allocation2 + $0x84] sm:$0xff]  }
  0x87   : > { %2071 = vmatmul.mubr.bf16.gmra.mrb[20].mxu0 %v5888_v4  ;;  %v1331_v60 = vor.u32 %v1330_v54, %v1326_v40  ;;  %v5321_v20 = vld [vmem:[#allocation2 + $0x8c] ss:$0 sps:$4 sm:$0x11]   ;;  %v1352_v8 = vshll.u32 %v5320_v12, 16  ;;  %v1364_v36 = vshll.u32 %v5323_v28, 16  ;;  %v5964_v52 = vld [vmem:[#allocation2 + $0x84] sm:$0xff]  }
  0x88   : > { %v5306_v24 = vld [vmem:[#allocation2 + $0x54] sm:$0xff]   ;;  %v5899_v25 = vsel %vm1216_vm2, %v1295_v21, %v1299_v56  ;;  %v1342_v6 = vrot.slane %v1340_v59, 1  ;;  %v1347_v16 = vrot.slane %v1345_v22, 1  ;;  %v5943_v21 = vld [vmem:[#allocation2 + $0x6c] sm:$0xff]   ;;  %v1357_v1 = vshll.u32 %v5321_v20, 16 }
  0x89   : > { %2078 = vmatprep.mubr.bf16.mxu0 %v5899_v25  ;;  %v1302_v11 = vshrl.u32 %v5306_v24, 16  ;;  %v1304_v30 = vshll.u32 %v5306_v24, 16  ;;  %v5307_v32 = vld [vmem:[#allocation2 + $0x5c] ss:$0 sps:$4 sm:$0x11]   ;;  %4953 = vmatpush3.bf16.msra.mxu1 %v5319_v42  ;;  %v5916_v50 = vld [vmem:[#allocation2 + $0x54] sm:$0xff]   ;;  %v5931_v3 = vsel %vm1216_vm2, %v1331_v60, %v1335_v57 }
  0x8a   : > { %v1309_v41 = vshll.u32 %v5307_v32, 16  ;;  %4954 = vmatprep.subr.bf16.mxu1 %v5326_v55  ;;  %v1343_v15 = vor.u32 %v1342_v6, %v1338_v2  ;;  %v5341_v56 = vld [vmem:[%s6455_s1 + $0x170] sm:$0xff]   ;;  %v5342_v24 = vld [vmem:[%s6455_s1 + $0x1c0] sm:$0xff]   ;;  %v1354_v32 = vrot.slane %v1352_v8, 1  ;;  %v1359_v23 = vrot.slane %v1357_v1, 1  ;;  %v5330_v54 = vld [vmem:[#allocation2 + $0xa8] sm:$0xff]  }
  0x8b   : > { %v1306_v34 = vrot.slane %v1304_v30, 1  ;;  %v1350_v30 = vshrl.u32 %v5320_v12, 16  ;;  %4762 = vmatprep.subr.bf16.mxu0 %v5342_v24  ;;  %v1366_v44 = vrot.slane %v1364_v36, 1  ;;  %v5328_v48 = vld [vmem:[#allocation2 + $0xa4] ss:$0 sps:$4 sm:$0x11]  }
  0x8c   : > { %2675 = vmatmul.mubr.bf16.gmra.mrb[24].mxu1 %v5814_v47  ;;  %v1311_v47 = vrot.slane %v1309_v41, 1  ;;  %v5327_v41 = vld [vmem:[#allocation2 + $0x9c] sm:$0xff]   ;;  %v1381_v40 = vshll.u32 %v5328_v48, 16  ;;  %v5331_v60 = vld [vmem:[#allocation2 + $0xb0] ss:$0 sps:$4 sm:$0x11]  }
  0x8d   : > { %2682 = vmatprep.mubr.bf16.mxu1 %v5876_v5  ;;  %v1307_v39 = vor.u32 %v1306_v34, %v1302_v11  ;;  %4955 = vmatpush3.bf16.msra.mxu1 %v5326_v55  ;;  %v5949_v11 = vsel %vm1216_vm2, %v1343_v15, %v1347_v16  ;;  %v5324_v34 = vld [vmem:[#allocation2 + $0x98] ss:$0 sps:$4 sm:$0x11]   ;;  %v1355_v37 = vor.u32 %v1354_v32, %v1350_v30  ;;  %v1376_v49 = vshll.u32 %v5327_v41, 16  ;;  %v5975_v12 = vld [vmem:[#allocation2 + $0x90] sm:$0xff]   ;;  %v5989_v48 = vld [vmem:[#allocation2 + $0x9c] sm:$0xff]  }
  0x8e   : > { %4956 = vmatprep.subr.bf16.mxu1 %v5333_v13  ;;  %v5358_v55 = vld [vmem:[%s6455_s1 + $0x178] sm:$0xff]   ;;  %v1374_v58 = vshrl.u32 %v5327_v41, 16  ;;  %v1383_v2 = vrot.slane %v1381_v40, 1  ;;  %v1388_v6 = vshll.u32 %v5330_v54, 16  ;;  %v1393_v15 = vshll.u32 %v5331_v60, 16  ;;  %v213_v8 = vld [vmem:[%s5534_s11 + $0xf0] sm:$0xff] }
  0x8f   : > { %2079 = vmatmul.mubr.bf16.gmra.mrb[24].mxu0 %v5903_v31  ;;  %v5911_v14 = vsel %vm1216_vm2, %v1307_v39, %v1311_v47  ;;  %v1369_v39 = vshll.u32 %v5324_v34, 16  ;;  %v5958_v42 = vsel %vm1216_vm2, %v1355_v37, %v1359_v23  ;;  %v1362_v47 = vshrl.u32 %v5323_v28, 16  ;;  %v5334_v20 = vld [vmem:[#allocation2 + $0xb4] sm:$0xff]   ;;  %v5335_v16 = vld [vmem:[#allocation2 + $0xbc] ss:$0 sps:$4 sm:$0x11]  }
  0x90   : > { %2086 = vmatprep.mubr.bf16.mxu0 %v5911_v14  ;;  %v1378_v59 = vrot.slane %v1376_v49, 1  ;;  %v1390_v1 = vrot.slane %v1388_v6, 1  ;;  %v287_v28 = vld [vmem:[#allocation2 + $0xc0] sm:$0x1]  ;;  %v337_v30 = vld [vmem:[#allocation2 + $0xc8] sm:$0x1]  ;;  %v4361_v32 = vpack.c.bf16 %v213_v8, %v213_v8 }
  0x91   : > { %4957 = vmatpush3.bf16.msra.mxu1 %v5333_v13  ;;  %v1371_v63 = vrot.slane %v1369_v39, 1  ;;  %v1367_v51 = vor.u32 %v1366_v44, %v1362_v47  ;;  %v1386_v13 = vshrl.u32 %v5330_v54, 16  ;;  %v288_v23 = vsel %vm5545_vm4, 0, %v287_v28  ;;  %v5996_v6 = vld [vmem:[%s6455_s1 + $0x200] sm:$0xff]  }
  0x92   : > { %4958 = vmatprep.subr.bf16.mxu1 %v5341_v56  ;;  %v1379_v22 = vor.u32 %v1378_v59, %v1374_v58  ;;  %v338_v36 = vsel %vm5554_vm6, 0, %v337_v30  ;;  %289 = vst [vmem:[#allocation2 + $0xc0] sm:$0x1] %v288_v23  ;;  %v678_v37 = vshrl.u32 %v4361_v32, 16  ;;  %v681_v39 = vshll.u32 %v4361_v32, 16 }
  0x93   : > { %v5970_v57 = vsel %vm1216_vm2, %v1367_v51, %v1371_v63  ;;  %339 = vst [vmem:[#allocation2 + $0xc8] sm:$0x1] %v338_v36  ;;  %v1400_v44 = vshll.u32 %v5334_v20, 16  ;;  %v1391_v63 = vor.u32 %v1390_v1, %v1386_v13  ;;  %v1395_v49 = vrot.slane %v1393_v15, 1  ;;  %v6012_v1 = vld [vmem:[#allocation2 + $0xa8] sm:$0xff]  }
  0x94   : > { %2683 = vmatmul.mubr.bf16.gmra.mrb[28].mxu1 %v5871_v43  ;;  %v5981_v24 = vsel %vm1216_vm2, %v1379_v22, %v1383_v2  ;;  %v680_v51 = vrot.slane %v678_v37, 7  ;;  %v1398_v40 = vshrl.u32 %v5334_v20, 16  ;;  %v1405_v54 = vshll.u32 %v5335_v16, 16  ;;  %v5338_v28 = vld [vmem:[#allocation2 + $0x8] ss:$0 sps:$4 sm:$0x11]  }
  0x95   : > { %2690 = vmatprep.mubr.bf16.mxu1 %v5894_v18  ;;  %4959 = vmatpush3.bf16.msra.mxu1 %v5341_v56  ;;  %v214_v56 = vld [vmem:[%s5534_s11 + $0xf8] sm:$0xff]  ;;  %v1402_v2 = vrot.slane %v1400_v44, 1  ;;  %v5999_v22 = vsel %vm1216_vm2, %v1391_v63, %v1395_v49  ;;  %v5337_v30 = vld [vmem:[#allocation2] sm:$0xfe]   ;;  %v1669_v32 = vrot.slane %v5338_v28, 1  ;;  %s4004_s11 = sshll.u32 %s6469_s13, 1 }
  0x96   : > { %4960 = vmatprep.subr.bf16.mxu1 %v5358_v55  ;;  %v4362_v34 = vpack.c.bf16 %v214_v56, %v214_v56  ;;  %v684_v58 = vrot.slane %v680_v51, 4  ;;  %v1407_v56 = vrot.slane %v1405_v54, 1  ;;  %v1668_v33 = vrot.slane %v5337_v30, 1  ;;  %v5339_v23 = vld [vmem:[#allocation2 + $0xc] sm:$0xfe]   ;;  %s181_s20 = scalar_lea.vmem %s6457_s3, %s4004_s11 }
  0x97   : > { %2087 = vmatmul.mubr.bf16.gmra.mrb[28].mxu0 %v5916_v50  ;;  %v1403_v61 = vor.u32 %v1402_v2, %v1398_v40  ;;  %v5340_v36 = vld [vmem:[#allocation2 + $0x14] ss:$0 sps:$4 sm:$0x11]   ;;  %v5346_v37 = vld [vmem:[#allocation2 + $0x18] sm:$0xfe]   ;;  %v1671_v44 = vrot.slane %v5339_v23, 1 }
  0x98   : > { %2094 = vmatprep.mubr.bf16.mxu0 %v5919_v53  ;;  %v686_v41 = vshrl.u32 %v4362_v34, 16  ;;  %v689_v47 = vshll.u32 %v4362_v34, 16  ;;  %v6020_v34 = vld [vmem:[#allocation2 + $0xb4] sm:$0xff]   ;;  %v1672_v63 = vrot.slane %v5340_v36, 1  ;;  %v1674_v49 = vrot.slane %v5346_v37, 1 }
  0x99   : > { %4961 = vmatpush3.bf16.msra.mxu1 %v5358_v55  ;;  %v683_v55 = vor.u32 %v681_v39, %v680_v51  ;;  %v849_v15 = vld [vmem:[#allocation2 + $0xc0] sm:$0xf]  ;;  %v6015_v9 = vsel %vm1216_vm2, %v1403_v61, %v1407_v56  ;;  %v5345_v61 = vld [vmem:[%s6455_s1 + $0x188] sm:$0xff]   ;;  %v5350_v30 = vld [vmem:[%s6455_s1 + $0x1d0] sm:$0xff]  }
  0x9a   : > { %v688_v35 = vrot.slane %v686_v41, 7  ;;  %v853_v20 = vld [vmem:[#allocation2 + $0xc8] sm:$0x1]  ;;  %4994 = vmatprep.subr.bf16.mxu1 %v5996_v6  ;;  %v5347_v39 = vld [vmem:[#allocation2 + $0x20] ss:$0 sps:$4 sm:$0x11]   ;;  %v1670_v41 = vsel %vm1667_vm10, %v1668_v33, %v1669_v32  ;;  %v6028_v54 = vsel %vm1667_vm10, %v1671_v44, %v1672_v63 }
  0x9b   : > { %v850_v16 = vsel %vm5581_vm9, %v683_v55, %v849_v15  ;;  %v1675_v51 = vrot.slane %v5347_v39, 1  ;;  %v5343_v55 = vld [vmem:[%s6455_s1 + $0x180] sm:$0xff]   ;;  %v5355_v15 = vld [vmem:[#allocation2 + $0x38] ss:$0 sps:$4 sm:$0x11]   ;;  %v5351_v39 = vld [vmem:[%s6455_s1 + $0x190] sm:$0xff]  }
  0x9c   : > { %2691 = vmatmul.mubr.bf16.gmra.mrb[32].mxu1 %v5888_v4  ;;  %v691_v59 = vor.u32 %v689_v47, %v688_v35  ;;  %v693_v60 = vrot.slane %v688_v35, 4  ;;  %851 = vst [vmem:[#allocation2 + $0xc0] sm:$0xf] %v850_v16  ;;  %v1681_v32 = vrot.slane %v5355_v15, 1  ;;  %v5352_v44 = vld [vmem:[%s6455_s1 + $0x1d8] sm:$0xff]  }
  0x9d   : > { %2698 = vmatprep.mubr.bf16.mxu1 %v5899_v25  ;;  %v6037_v2 = vsel %vm1667_vm10, %v1674_v49, %v1675_v51  ;;  %v5363_v49 = vld [vmem:[#allocation2 + $0x48] sm:$0xfe]   ;;  %v5364_v51 = vld [vmem:[#allocation2 + $0x50] ss:$0 sps:$4 sm:$0x11]  }
  0x9e   : > { %v692_v13 = vsel %vm5571_vm8, %v684_v58, %v691_v59  ;;  %v854_v8 = vsel %vm5545_vm4, %v693_v60, %v853_v20  ;;  %v5348_v58 = vld [vmem:[#allocation2 + $0x24] sm:$0xfe]   ;;  %v5349_v59 = vld [vmem:[#allocation2 + $0x2c] ss:$0 sps:$4 sm:$0x11]  }
  0x9f   : > { %2095 = vmatmul.mubr.bf16.gmra.mrb[32].mxu0 %v5928_v0  ;;  %852 = vst [vmem:[#allocation2 + $0xc4] sm:$0xf] %v692_v13  ;;  %855 = vst [vmem:[#allocation2 + $0xc8] sm:$0x1] %v854_v8  ;;  %v5344_v60 = vld [vmem:[%s6455_s1 + $0x1c8] sm:$0xff]   ;;  %v1677_v56 = vrot.slane %v5348_v58, 1 }
  0xa0   : > { %2102 = vmatprep.mubr.bf16.mxu0 %v5931_v3  ;;  %v5354_v13 = vld [vmem:[#allocation2 + $0x30] sm:$0xfe]   ;;  %v1678_v28 = vrot.slane %v5349_v59, 1  ;;  %v5359_v59 = vld [vmem:[%s6455_s1 + $0x1e0] sm:$0xff]  }
  0xa1   : > { %v1680_v33 = vrot.slane %v5354_v13, 1  ;;  %v1687_v13 = vrot.slane %v5364_v51, 1  ;;  %v5372_v51 = vld [vmem:[%s6455_s1 + $0x1f8] sm:$0xff]  }
  0xa2   : > { %v6050_v37 = vsel %vm1667_vm10, %v1677_v56, %v1678_v28 }
  0xa3   : > { %v6059_v63 = vsel %vm1667_vm10, %v1680_v33, %v1681_v32 }
  0xa4   : > { %2699 = vmatmul.mubr.bf16.gmra.mrb[36].mxu1 %v5903_v31 }
  0xa5   : > { %2706 = vmatprep.mubr.bf16.mxu1 %v5911_v14 }
  0xa6   : > { %v5365_v47 = vld [vmem:[#allocation2 + $0xc0] sm:$0xff]   ;;  %v5366_v35 = vld [vmem:[#allocation2 + $0xc8] ss:$0 sps:$4 sm:$0x11]  }
  0xa7   : > { %2103 = vmatmul.mubr.bf16.gmra.mrb[36].mxu0 %v5943_v21  ;;  %v1412_v40 = vshll.u32 %v5365_v47, 16  ;;  %v1410_v20 = vshrl.u32 %v5365_v47, 16  ;;  %v1417_v8 = vshll.u32 %v5366_v35, 16  ;;  %v5357_v47 = vld [vmem:[#allocation2 + $0x44] ss:$0 sps:$4 sm:$0x11]  }
  0xa8   : > { %2110 = vmatprep.mubr.bf16.mxu0 %v5949_v11  ;;  %v1684_v58 = vrot.slane %v5357_v47, 1  ;;  %v6086_v28 = vld [vmem:[#allocation2 + $0xc0] sm:$0xff]   ;;  %v5371_v47 = vld [vmem:[%s6455_s1 + $0x1b0] sm:$0xff]  }
  0xa9   : > { %v1414_v16 = vrot.slane %v1412_v40, 1  ;;  %v1419_v36 = vrot.slane %v1417_v8, 1  ;;  %v5353_v40 = vld [vmem:[%s6455_s1 + $0x198] sm:$0xff]  }
  0xaa   : > { %v5368_v8 = vld [vmem:[#allocation2 + $0x5c] ss:$0 sps:$4 sm:$0x11]  }
  0xab   : > { %v1415_v23 = vor.u32 %v1414_v16, %v1410_v20  ;;  %v5360_v20 = vld [vmem:[%s6455_s1 + $0x1a0] sm:$0xff]   ;;  %v5367_v16 = vld [vmem:[#allocation2 + $0x54] sm:$0xfe]   ;;  %v1690_v32 = vrot.slane %v5368_v8, 1 }
  0xac   : > { %2707 = vmatmul.mubr.bf16.gmra.mrb[40].mxu1 %v5916_v50  ;;  %v1689_v33 = vrot.slane %v5367_v16, 1  ;;  %v5383_v16 = vld [vmem:[%s6455_s1 + $0x238] sm:$0xff]  }
  0xad   : > { %2714 = vmatprep.mubr.bf16.mxu1 %v5919_v53  ;;  %v6063_v35 = vsel %vm1216_vm2, %v1415_v23, %v1419_v36  ;;  %v5370_v23 = vld [vmem:[%s6455_s1 + $0x1f0] sm:$0xff]  }
  0xaf   : > { %2111 = vmatmul.mubr.bf16.gmra.mrb[40].mxu0 %v5955_v38 }
  0xb0   : > { %2118 = vmatprep.mubr.bf16.mxu0 %v5958_v42 }
  0xb4   : > { %2715 = vmatmul.mubr.bf16.gmra.mrb[44].mxu1 %v5928_v0 }
  0xb5   : > { %2722 = vmatprep.mubr.bf16.mxu1 %v5931_v3 }
  0xb7   : > { %2119 = vmatmul.mubr.bf16.gmra.mrb[44].mxu0 %v5964_v52 }
  0xb8   : > { %2126 = vmatprep.mubr.bf16.mxu0 %v5970_v57 }
  0xbc   : > { %2723 = vmatmul.mubr.bf16.gmra.mrb[48].mxu1 %v5943_v21 }
  0xbd   : > { %2730 = vmatprep.mubr.bf16.mxu1 %v5949_v11 }
  0xbf   : > { %2127 = vmatmul.mubr.bf16.gmra.mrb[48].mxu0 %v5975_v12 }
  0xc0   : > { %2134 = vmatprep.mubr.bf16.mxu0 %v5981_v24 }
  0xc4   : > { %2731 = vmatmul.mubr.bf16.gmra.mrb[52].mxu1 %v5955_v38 }
  0xc5   : > { %2738 = vmatprep.mubr.bf16.mxu1 %v5958_v42 }
  0xc7   : > { %2135 = vmatmul.mubr.bf16.gmra.mrb[52].mxu0 %v5989_v48 }
  0xc8   : > { %2142 = vmatprep.mubr.bf16.mxu0 %v5999_v22 }
  0xcc   : > { %2739 = vmatmul.mubr.bf16.gmra.mrb[56].mxu1 %v5964_v52 }
  0xcd   : > { %2746 = vmatprep.mubr.bf16.mxu1 %v5970_v57 }
  0xcf   : > { %2143 = vmatmul.mubr.bf16.gmra.mrb[56].mxu0 %v6012_v1 }
  0xd0   : > { %2150 = vmatprep.mubr.bf16.mxu0 %v6015_v9 }
  0xd4   : > { %2747 = vmatmul.mubr.bf16.gmra.mrb[60].mxu1 %v5975_v12 }
  0xd5   : > { %2754 = vmatprep.mubr.bf16.mxu1 %v5981_v24 }
  0xd7   : > { %2151 = vmatmul.mubr.bf16.gmra.mrb[60].mxu0 %v6020_v34 }
  0xd8   : > { %4914 = vmatprep.mubr.bf16.mxu0 %v1670_v41  ;;  %v5356_v41 = vld [vmem:[#allocation2 + $0x3c] sm:$0xfe]  }
  0xdc   : > { %2755 = vmatmul.mubr.bf16.gmra.mrb[64].mxu1 %v5989_v48 }
  0xdd   : > { %2762 = vmatprep.mubr.bf16.mxu1 %v5999_v22 }
  0xdf   : > { %4915 = vmatmul.mubr.bf16.vlgmr.msra.gmra.mrb[64].mxu0 %v6028_v54 }
  0xe0   : > { %4763 = vmatpush3.bf16.msra.mxu0 %v5343_v55  ;;  %4918 = vmatprep.mubr.bf16.mxu0 %v6037_v2  ;;  %v1683_v55 = vrot.slane %v5356_v41, 1  ;;  %v6099_v41 = vsel %vm1667_vm10, %v1689_v33, %v1690_v32  ;;  %v5382_v32 = vld [vmem:[#allocation2 + $0xc8] ss:$0 sps:$4 sm:$0x11]  }
  0xe1   : > { %4764 = vmatprep.subr.bf16.mxu0 %v5344_v60  ;;  %v1686_v60 = vrot.slane %v5363_v49, 1 }
  0xe2   : > { %v6075_v15 = vsel %vm1667_vm10, %v1683_v55, %v1684_v58  ;;  %v5375_v55 = vld [vmem:[%s6455_s1 + $0x208] sm:$0xff]   ;;  %v5373_v58 = vld [vmem:[%s6455_s1 + $0x1b8] sm:$0xff]  }
  0xe3   : > { %v6084_v56 = vsel %vm1667_vm10, %v1686_v60, %v1687_v13  ;;  %v5389_v60 = vld [vmem:[#allocation2 + $0x18] sm:$0xff]   ;;  %v5390_v13 = vld [vmem:[#allocation2 + $0x24] sm:$0xff]  }
  0xe4   : > { %2763 = vmatmul.mubr.bf16.gmra.mrb[68].mxu1 %v6012_v1  ;;  %4765 = vmatpush3.bf16.msra.mxu0 %v5345_v61  ;;  %v5361_v61 = vld [vmem:[%s6455_s1 + $0x1e8] sm:$0xff]  }
  0xe5   : > { %2770 = vmatprep.mubr.bf16.mxu1 %v6015_v9  ;;  %4766 = vmatprep.subr.bf16.mxu0 %v5350_v30  ;;  %v5362_v30 = vld [vmem:[%s6455_s1 + $0x1a8] sm:$0xff]  }
  0xe7   : > { %4919 = vmatmul.mubr.bf16.gmra.mrb[68].mxu0 %v6050_v37 }
  0xe8   : > { %4767 = vmatpush3.bf16.msra.mxu0 %v5351_v39  ;;  %4922 = vmatprep.mubr.bf16.mxu0 %v6059_v63 }
  0xe9   : > { %4768 = vmatprep.subr.bf16.mxu0 %v5352_v44 }
  0xec   : > { %2771 = vmatmul.mubr.bf16.gmra.mrb[72].mxu1 %v6020_v34  ;;  %4769 = vmatpush3.bf16.msra.mxu0 %v5353_v40 }
  0xed   : > { %2778 = vmatprep.mubr.bf16.mxu1 %v6063_v35  ;;  %4770 = vmatprep.subr.bf16.mxu0 %v5359_v59  ;;  %v5376_v59 = vld [vmem:[%s6455_s1 + $0x210] sm:$0xff]  }
  0xef   : > { %4923 = vmatmul.mubr.bf16.gmra.mrb[72].mxu0 %v6075_v15 }
  0xf0   : > { %4771 = vmatpush3.bf16.msra.mxu0 %v5360_v20  ;;  %4926 = vmatprep.mubr.bf16.mxu0 %v6084_v56  ;;  %v5379_v20 = vld [vmem:[%s6455_s1 + $0x228] sm:$0xff]  }
  0xf1   : > { %4772 = vmatprep.subr.bf16.mxu0 %v5361_v61 }
  0xf4   : > { %2779 = vmatmul.mubr.bf16.gmra.mrb[76].mxu1 %v6086_v28  ;;  %4773 = vmatpush3.bf16.msra.mxu0 %v5362_v30 }
  0xf5   : > { %4962 = vmatprep.mubr.bf16.mxu1 %v6028_v54  ;;  %4774 = vmatprep.subr.bf16.mxu0 %v5370_v23  ;;  %v1717_v23 = vrot.slane %v5382_v32, 1 }
  0xf7   : > { %4927 = vmatmul.mubr.bf16.gmra.mrb[76].mxu0 %v6099_v41 }
  0xf8   : > { %4775 = vmatpush3.bf16.msra.mxu0 %v5371_v47  ;;  %3318 = vmatprep.mubr.bf16.mxu0 %v5760_v19  ;;  %v5377_v19 = vld [vmem:[%s6455_s1 + $0x218] sm:$0xff]  }
  0xf9   : > { %4776 = vmatprep.subr.bf16.mxu0 %v5372_v51 }
  0xfc   : > { %4963 = vmatmul.mubr.bf16.vlgmr.msra.gmra.mrb[80].mxu1 %v6037_v2  ;;  %4777 = vmatpush3.bf16.msra.mxu0 %v5373_v58 }
  0xfd   : > { %4995 = vmatpush3.bf16.msra.mxu1 %v5996_v6  ;;  %4966 = vmatprep.mubr.bf16.mxu1 %v6050_v37  ;;  %v5378_v6 = vld [vmem:[%s6455_s1 + $0x220] sm:$0xff]  }
  0xfe   : > { %4996 = vmatprep.subr.bf16.mxu1 %v5375_v55 }
  0xff   : > { %3319 = vmatmul.mubr.bf16.vlgmr.msra.gmra.mrb[80].mxu0 %v5389_v60 }
 0x100   : > { %3326 = vmatprep.mubr.bf16.mxu0 %v5820_v62  ;;  %v5380_v62 = vld [vmem:[%s6455_s1 + $0x230] sm:$0xff]  }
 0x101   : > { %4997 = vmatpush3.bf16.msra.mxu1 %v5375_v55 }
 0x102   : > { %v4506_v36 = vpop.f32.mrb[0].mxu0  ;;  %4998 = vmatprep.subr.bf16.mxu1 %v5376_v59 }
 0x103   : > { %v4507_v39 = vpop.f32.mrb[1].mxu0 }
 0x104   : > { %v6104_v44 = vadd.f32 %v4507_v39, %v4506_v36  ;;  %v4509_v49 = vpop.f32.mrb[2].mxu0  ;;  %4967 = vmatmul.mubr.bf16.gmra.mrb[84].mxu1 %v6059_v63 }
 0x105   : > { %v4510_v40 = vpop.f32.mrb[3].mxu0  ;;  %4970 = vmatprep.mubr.bf16.mxu1 %v6075_v15  ;;  %4999 = vmatpush3.bf16.msra.mxu1 %v5376_v59 }
 0x106   : > { %v6109_v54 = vadd.f32 %v4510_v40, %v4509_v49  ;;  %5000 = vmatprep.subr.bf16.mxu1 %v5377_v19 }
 0x107   : > { %3327 = vmatmul.mubr.bf16.gmra.mrb[84].mxu0 %v5390_v13 }
 0x108   : > { %3334 = vmatprep.mubr.bf16.mxu0 %v5876_v5 }
 0x109   : > { %5001 = vmatpush3.bf16.msra.mxu1 %v5377_v19 }
 0x10a   : > { %5002 = vmatprep.subr.bf16.mxu1 %v5378_v6 }
 0x10c   : > { %4971 = vmatmul.mubr.bf16.gmra.mrb[88].mxu1 %v6084_v56 }
 0x10d   : > { %4974 = vmatprep.mubr.bf16.mxu1 %v6099_v41  ;;  %5003 = vmatpush3.bf16.msra.mxu1 %v5378_v6 }
 0x10e   : > { %5004 = vmatprep.subr.bf16.mxu1 %v5379_v20 }
 0x10f   : > { %3335 = vmatmul.mubr.bf16.gmra.mrb[88].mxu0 %v5871_v43 }
 0x110   : > { %3342 = vmatprep.mubr.bf16.mxu0 %v5894_v18  ;;  %v5381_v18 = vld [vmem:[#allocation2 + $0xc0] sm:$0xfe]  }
 0x111   : > { %5005 = vmatpush3.bf16.msra.mxu1 %v5379_v20 }
 0x112   : > { %5006 = vmatprep.subr.bf16.mxu1 %v5380_v62 }
 0x114   : > { %4975 = vmatmul.mubr.bf16.gmra.mrb[92].mxu1 %v5628_v26 }
 0x115   : > { %4978 = vmatprep.mubr.bf16.mxu1 %v5648_v46  ;;  %5007 = vmatpush3.bf16.msra.mxu1 %v5380_v62  ;;  %v5384_v62 = vld [vmem:[#allocation2 + $0xcc] sm:$0xff]  }
 0x116   : > { %5008 = vmatprep.subr.bf16.mxu1 %v5383_v16 }
 0x117   : > { %3343 = vmatmul.mubr.bf16.gmra.mrb[92].mxu0 %v5888_v4 }
 0x118   : > { %3350 = vmatprep.mubr.bf16.mxu0 %v5899_v25  ;;  %v1716_v25 = vrot.slane %v5381_v18, 1 }
 0x119   : > { %5009 = vmatpush3.bf16.msra.mxu1 %v5383_v16 }
 0x11a   : > { %v6171_v49 = vsel %vm1667_vm10, %v1716_v25, %v1717_v23 }
 0x11c   : > { %4979 = vmatmul.mubr.bf16.gmra.mrb[0].mxu1 %v5692_v29 }
 0x11d   : > { %4982 = vmatprep.mubr.bf16.mxu1 %v5717_v7 }
 0x11e   : > { %v4512_v5 = vpop.f32.mrb[4].mxu0 }
 0x11f   : > { %v4513_v8 = vpop.f32.mrb[5].mxu0  ;;  %3351 = vmatmul.mubr.bf16.gmra.mrb[96].mxu0 %v5903_v31 }
 0x120   : > { %v6150_v61 = vadd.f32 %v4513_v8, %v4512_v5  ;;  %v4515_v30 = vpop.f32.mrb[6].mxu0  ;;  %3358 = vmatprep.mubr.bf16.mxu0 %v5911_v14  ;;  %v1424_v8 = vshll.u32 %v5384_v62, 16 }
 0x121   : > { %v4516_v33 = vpop.f32.mrb[7].mxu0 }
 0x122   : > { %v6152_v43 = vadd.f32 %v4516_v33, %v4515_v30 }
 0x124   : > { %4983 = vmatmul.mubr.bf16.gmra.mrb[4].mxu1 %v5764_v27 }
 0x125   : > { %4986 = vmatprep.mubr.bf16.mxu1 %v5783_v17 }
 0x127   : > { %3359 = vmatmul.mubr.bf16.gmra.mrb[100].mxu0 %v5916_v50 }
 0x128   : > { %3366 = vmatprep.mubr.bf16.mxu0 %v5919_v53 }
 0x12c   : > { %4987 = vmatmul.mubr.bf16.gmra.mrb[8].mxu1 %v5826_v10 }
 0x12d   : > { %4990 = vmatprep.mubr.bf16.mxu1 %v5845_v45 }
 0x12f   : > { %3367 = vmatmul.mubr.bf16.gmra.mrb[104].mxu0 %v5928_v0 }
 0x130   : > { %3374 = vmatprep.mubr.bf16.mxu0 %v5931_v3 }
 0x134   : > { %4991 = vmatmul.mubr.bf16.gmra.mrb[12].mxu1 %v6171_v49 }
 0x135   : > { %5010 = vmatprep.mubr.bf16.mxu1 %v6037_v2 }
 0x136   : > { %v4518_v4 = vpop.f32.mrb[8].mxu0 }
 0x137   : > { %v4519_v31 = vpop.f32.mrb[9].mxu0  ;;  %3375 = vmatmul.mubr.bf16.gmra.mrb[108].mxu0 %v5943_v21 }
 0x138   : > { %v6166_v36 = vadd.f32 %v4519_v31, %v4518_v4  ;;  %v4521_v14 = vpop.f32.mrb[10].mxu0  ;;  %3382 = vmatprep.mubr.bf16.mxu0 %v5949_v11  ;;  %v1426_v31 = vrot.slane %v1424_v8, 1 }
 0x139   : > { %v4522_v39 = vpop.f32.mrb[11].mxu0 }
 0x13a   : > { %v6168_v47 = vadd.f32 %v4522_v39, %v4521_v14 }
 0x13c   : > { %5011 = vmatmul.mubr.bf16.vlgmr.msra.gmra.mrb[80].mxu1 %v6050_v37 }
 0x13d   : > { %5014 = vmatprep.mubr.bf16.mxu1 %v6059_v63 }
 0x13f   : > { %3383 = vmatmul.mubr.bf16.gmra.mrb[112].mxu0 %v5955_v38 }
 0x140   : > { %v4524_v50 = vpop.f32.mrb[12].mxu0  ;;  %3390 = vmatprep.mubr.bf16.mxu0 %v5958_v42 }
 0x141   : > { %v4525_v53 = vpop.f32.mrb[13].mxu0 }
 0x142   : > { %v6183_v0 = vadd.f32 %v4525_v53, %v4524_v50  ;;  %v4527_v3 = vpop.f32.mrb[14].mxu0  ;;  %v5387_v50 = vld [vmem:[#allocation2 + $0xcc] sm:$0xfe]   ;;  %v5388_v53 = vld [vmem:[#allocation2 + $0xd4] ss:$0 sps:$4 sm:$0x11]  }
 0x143   : > { %v4528_v2 = vpop.f32.mrb[15].mxu0 }
 0x144   : > { %5015 = vmatmul.mubr.bf16.gmra.mrb[84].mxu1 %v6075_v15  ;;  %v6186_v51 = vadd.f32 %v4528_v2, %v4527_v3 }
 0x145   : > { %5018 = vmatprep.mubr.bf16.mxu1 %v6084_v56 }
 0x147   : > { %3391 = vmatmul.mubr.bf16.gmra.mrb[116].mxu0 %v5964_v52 }
 0x148   : > { %3398 = vmatprep.mubr.bf16.mxu0 %v5970_v57 }
 0x14c   : > { %5019 = vmatmul.mubr.bf16.gmra.mrb[88].mxu1 %v6099_v41 }
 0x14d   : > { %5022 = vmatprep.mubr.bf16.mxu1 %v5628_v26 }
 0x14f   : > { %v4642_v21 = vpop.f32.mrb[16].mxu1  ;;  %3399 = vmatmul.mubr.bf16.gmra.mrb[120].mxu0 %v5975_v12 }
 0x150   : > { %v4643_v11 = vpop.f32.mrb[17].mxu1  ;;  %3406 = vmatprep.mubr.bf16.mxu0 %v5981_v24 }
 0x151   : > { %v6193_v38 = vadd.f32 %v4643_v11, %v4642_v21  ;;  %v4645_v42 = vpop.f32.mrb[18].mxu1 }
 0x152   : > { %v4646_v37 = vpop.f32.mrb[19].mxu1  ;;  %v4530_v15 = vpop.f32.mrb[16].mxu0 }
 0x153   : > { %v6196_v63 = vadd.f32 %v4646_v37, %v4645_v42  ;;  %v4531_v52 = vpop.f32.mrb[17].mxu0  ;;  %v1719_v42 = vrot.slane %v5387_v50, 1  ;;  %v1720_v37 = vrot.slane %v5388_v53, 1 }
 0x154   : > { %5023 = vmatmul.mubr.bf16.gmra.mrb[92].mxu1 %v5648_v46  ;;  %v6201_v57 = vadd.f32 %v4531_v52, %v4530_v15  ;;  %v4533_v26 = vpop.f32.mrb[18].mxu0 }
 0x155   : > { %5026 = vmatprep.mubr.bf16.mxu1 %v5692_v29  ;;  %v4534_v56 = vpop.f32.mrb[19].mxu0 }
 0x156   : > { %v6203_v40 = vadd.f32 %v4534_v56, %v4533_v26 }
 0x157   : > { %v4648_v41 = vpop.f32.mrb[20].mxu1  ;;  %3407 = vmatmul.mubr.bf16.gmra.mrb[124].mxu0 %v5989_v48 }
 0x158   : > { %v4649_v55 = vpop.f32.mrb[21].mxu1  ;;  %3414 = vmatprep.mubr.bf16.mxu0 %v5999_v22 }
 0x159   : > { %v6205_v12 = vadd.f32 %v4649_v55, %v4648_v41  ;;  %v4651_v58 = vpop.f32.mrb[22].mxu1 }
 0x15a   : > { %v4652_v24 = vpop.f32.mrb[23].mxu1  ;;  %v4536_v46 = vpop.f32.mrb[20].mxu0 }
 0x15b   : > { %v6208_v59 = vadd.f32 %v4652_v24, %v4651_v58  ;;  %v4537_v29 = vpop.f32.mrb[21].mxu0  ;;  %v1721_v24 = vsel %vm1667_vm10, %v1719_v42, %v1720_v37 }
 0x15c   : > { %5027 = vmatmul.mubr.bf16.gmra.mrb[0].mxu1 %v5717_v7  ;;  %v6213_v60 = vadd.f32 %v4537_v29, %v4536_v46  ;;  %v4539_v19 = vpop.f32.mrb[22].mxu0 }
 0x15d   : > { %5030 = vmatprep.mubr.bf16.mxu1 %v5764_v27  ;;  %v4540_v13 = vpop.f32.mrb[23].mxu0  ;;  %v5385_v27 = vld [vmem:[#allocation2 + $0xd4] ss:$0 sps:$4 sm:$0x11]  }
 0x15e   : > { %v6215_v16 = vadd.f32 %v4540_v13, %v4539_v19  ;;  %v1429_v14 = vshll.u32 %v5385_v27, 16 }
 0x15f   : > { %v4654_v6 = vpop.f32.mrb[24].mxu1  ;;  %3415 = vmatmul.mubr.bf16.gmra.mrb[128].mxu0 %v6012_v1  ;;  %v1422_v1 = vshrl.u32 %v5384_v62, 16 }
 0x160   : > { %v4655_v20 = vpop.f32.mrb[25].mxu1  ;;  %3422 = vmatprep.mubr.bf16.mxu0 %v6015_v9  ;;  %v1431_v21 = vrot.slane %v1429_v14, 1 }
 0x161   : > { %v6217_v48 = vadd.f32 %v4655_v20, %v4654_v6  ;;  %v4657_v5 = vpop.f32.mrb[26].mxu1  ;;  %v1427_v2 = vor.u32 %v1426_v31, %v1422_v1  ;;  %v5386_v6 = vld [vmem:[#allocation2 + $0xcc] sm:$0xff]  }
 0x162   : > { %v4658_v22 = vpop.f32.mrb[27].mxu1  ;;  %v4542_v30 = vpop.f32.mrb[24].mxu0 }
 0x163   : > { %v6220_v7 = vadd.f32 %v4658_v22, %v4657_v5  ;;  %v4543_v33 = vpop.f32.mrb[25].mxu0  ;;  %v1432_v55 = vsel %vm1216_vm2, %v1427_v2, %v1431_v21 }
 0x164   : > { %5031 = vmatmul.mubr.bf16.gmra.mrb[4].mxu1 %v5783_v17  ;;  %v6225_v18 = vadd.f32 %v4543_v33, %v4542_v30  ;;  %v4545_v32 = vpop.f32.mrb[26].mxu0 }
 0x165   : > { %5034 = vmatprep.mubr.bf16.mxu1 %v5826_v10  ;;  %v4546_v25 = vpop.f32.mrb[27].mxu0 }
 0x166   : > { %v6227_v39 = vadd.f32 %v4546_v25, %v4545_v32 }
 0x167   : > { %v4660_v4 = vpop.f32.mrb[28].mxu1  ;;  %3423 = vmatmul.mubr.bf16.gmra.mrb[132].mxu0 %v6020_v34 }
 0x168   : > { %v4661_v23 = vpop.f32.mrb[29].mxu1  ;;  %3430 = vmatprep.mubr.bf16.mxu0 %v6063_v35 }
 0x169   : > { %v6229_v9 = vadd.f32 %v4661_v23, %v4660_v4  ;;  %v4663_v17 = vpop.f32.mrb[30].mxu1 }
 0x16a   : > { %v4664_v10 = vpop.f32.mrb[31].mxu1  ;;  %v4548_v11 = vpop.f32.mrb[28].mxu0 }
 0x16b   : > { %v6232_v3 = vadd.f32 %v4664_v10, %v4663_v17  ;;  %v4549_v15 = vpop.f32.mrb[29].mxu0 }
 0x16c   : > { %5035 = vmatmul.mubr.bf16.gmra.mrb[8].mxu1 %v5845_v45  ;;  %v6237_v52 = vadd.f32 %v4549_v15, %v4548_v11  ;;  %v4551_v26 = vpop.f32.mrb[30].mxu0 }
 0x16d   : > { %5038 = vmatprep.mubr.bf16.mxu1 %v6171_v49  ;;  %v4552_v34 = vpop.f32.mrb[31].mxu0 }
 0x16e   : > { %v6240_v58 = vadd.f32 %v4552_v34, %v4551_v26 }
 0x16f   : > { %v4666_v56 = vpop.f32.mrb[32].mxu1  ;;  %3431 = vmatmul.mubr.bf16.gmra.mrb[136].mxu0 %v6086_v28 }
 0x170   : > { %v4667_v41 = vpop.f32.mrb[33].mxu1  ;;  %3438 = vmatprep.mubr.bf16.mxu0 %v1432_v55 }
 0x171   : > { %v6242_v35 = vadd.f32 %v4667_v41, %v4666_v56  ;;  %v4669_v45 = vpop.f32.mrb[34].mxu1 }
 0x172   : > { %v4670_v49 = vpop.f32.mrb[35].mxu1  ;;  %v4554_v29 = vpop.f32.mrb[32].mxu0 }
 0x173   : > { %v6246_v46 = vadd.f32 %v4670_v49, %v4669_v45  ;;  %v4555_v19 = vpop.f32.mrb[33].mxu0 }
 0x174   : > { %5039 = vmatmul.mubr.bf16.gmra.mrb[12].mxu1 %v1721_v24  ;;  %v4556_v13 = vadd.f32 %v4555_v19, %v4554_v29  ;;  %v4557_v20 = vpop.f32.mrb[34].mxu0 }
 0x175   : > { %v4558_v5 = vpop.f32.mrb[35].mxu0 }
 0x176   : > { %v4559_v27 = vadd.f32 %v4558_v5, %v4557_v20 }
 0x177   : > { %v4672_v62 = vpop.f32.mrb[36].mxu1  ;;  %3439 = vmatmul.mubr.bf16.gmra.mrb[140].mxu0 %v5386_v6 }
 0x178   : > { %v4673_v22 = vpop.f32.mrb[37].mxu1 }
 0x179   : > { %v6248_v8 = vadd.f32 %v4673_v22, %v4672_v62  ;;  %v4675_v30 = vpop.f32.mrb[38].mxu1 }
 0x17a   : > { %v4676_v33 = vpop.f32.mrb[39].mxu1  ;;  %v4560_v32 = vpop.f32.mrb[36].mxu0 }
 0x17b   : > { %v6250_v28 = vadd.f32 %v4676_v33, %v4675_v30  ;;  %v4561_v4 = vpop.f32.mrb[37].mxu0 }
 0x17c   : > { %v4562_v25 = vadd.f32 %v4561_v4, %v4560_v32  ;;  %v4563_v23 = vpop.f32.mrb[38].mxu0 }
 0x17d   : > { %v4564_v31 = vpop.f32.mrb[39].mxu0 }
 0x17e   : > { %v4565_v17 = vadd.f32 %v4564_v31, %v4563_v23 }
 0x17f   : > { %v4678_v1 = vpop.f32.mrb[40].mxu1 }
 0x180   : > { %v4679_v14 = vpop.f32.mrb[41].mxu1 }
 0x181   : > { %v6252_v50 = vadd.f32 %v4679_v14, %v4678_v1  ;;  %v4681_v53 = vpop.f32.mrb[42].mxu1 }
 0x182   : > { %v4682_v10 = vpop.f32.mrb[43].mxu1  ;;  %v4566_v21 = vpop.f32.mrb[40].mxu0 }
 0x183   : > { %v6254_v2 = vadd.f32 %v4682_v10, %v4681_v53  ;;  %v4567_v11 = vpop.f32.mrb[41].mxu0 }
 0x184   : > { %v4568_v42 = vadd.f32 %v4567_v11, %v4566_v21  ;;  %v4569_v37 = vpop.f32.mrb[42].mxu0 }
 0x185   : > { %v4570_v26 = vpop.f32.mrb[43].mxu0 }
 0x186   : > { %v4571_v34 = vadd.f32 %v4570_v26, %v4569_v37 }
 0x187   : > { %v4684_v15 = vpop.f32.mrb[44].mxu1 }
 0x188   : > { %v4685_v56 = vpop.f32.mrb[45].mxu1 }
 0x189   : > { %v6256_v41 = vadd.f32 %v4685_v56, %v4684_v15  ;;  %v4687_v55 = vpop.f32.mrb[46].mxu1 }
 0x18a   : > { %v4688_v45 = vpop.f32.mrb[47].mxu1  ;;  %v4572_v49 = vpop.f32.mrb[44].mxu0 }
 0x18b   : > { %v6258_v24 = vadd.f32 %v4688_v45, %v4687_v55  ;;  %v4573_v29 = vpop.f32.mrb[45].mxu0 }
 0x18c   : > { %v4574_v19 = vadd.f32 %v4573_v29, %v4572_v49  ;;  %v4575_v6 = vpop.f32.mrb[46].mxu0 }
 0x18d   : > { %v4576_v62 = vpop.f32.mrb[47].mxu0 }
 0x18e   : > { %v4577_v22 = vadd.f32 %v4576_v62, %v4575_v6 }
 0x18f   : > { %v4690_v20 = vpop.f32.mrb[48].mxu1 }
 0x190   : > { %v4691_v5 = vpop.f32.mrb[49].mxu1 }
 0x191   : > { %v4692_v30 = vadd.f32 %v4691_v5, %v4690_v20  ;;  %v4693_v33 = vpop.f32.mrb[50].mxu1 }
 0x192   : > { %v4694_v32 = vpop.f32.mrb[51].mxu1  ;;  %v4578_v1 = vpop.f32.mrb[48].mxu0 }
 0x193   : > { %v6260_v4 = vadd.f32 %v4692_v30, %v4556_v13  ;;  %v4695_v23 = vadd.f32 %v4694_v32, %v4693_v33  ;;  %v4579_v14 = vpop.f32.mrb[49].mxu0 }
 0x194   : > { %v4580_v53 = vadd.f32 %v4579_v14, %v4578_v1  ;;  %v4581_v10 = vpop.f32.mrb[50].mxu0 }
 0x195   : > { %v6262_v31 = vadd.f32 %v4695_v23, %v4559_v27  ;;  %v4582_v11 = vpop.f32.mrb[51].mxu0 }
 0x196   : > { %v4583_v15 = vadd.f32 %v4582_v11, %v4581_v10 }
 0x197   : > { %v4696_v21 = vpop.f32.mrb[52].mxu1 }
 0x198   : > { %v4697_v37 = vpop.f32.mrb[53].mxu1 }
 0x199   : > { %v4698_v26 = vadd.f32 %v4697_v37, %v4696_v21  ;;  %v4699_v56 = vpop.f32.mrb[54].mxu1 }
 0x19a   : > { %v4700_v55 = vpop.f32.mrb[55].mxu1  ;;  %v4584_v29 = vpop.f32.mrb[52].mxu0 }
 0x19b   : > { %v6264_v45 = vadd.f32 %v4698_v26, %v4562_v25  ;;  %v4701_v49 = vadd.f32 %v4700_v55, %v4699_v56  ;;  %v4585_v6 = vpop.f32.mrb[53].mxu0 }
 0x19c   : > { %v4586_v20 = vadd.f32 %v4585_v6, %v4584_v29  ;;  %v4587_v27 = vpop.f32.mrb[54].mxu0 }
 0x19d   : > { %v6266_v13 = vadd.f32 %v4701_v49, %v4565_v17  ;;  %v4588_v5 = vpop.f32.mrb[55].mxu0 }
 0x19e   : > { %v4589_v33 = vadd.f32 %v4588_v5, %v4587_v27 }
 0x19f   : > { %v4702_v62 = vpop.f32.mrb[56].mxu1 }
 0x1a0   : > { %v4703_v30 = vpop.f32.mrb[57].mxu1 }
 0x1a1   : > { %v4704_v32 = vadd.f32 %v4703_v30, %v4702_v62  ;;  %v4705_v23 = vpop.f32.mrb[58].mxu1 }
 0x1a2   : > { %v4706_v1 = vpop.f32.mrb[59].mxu1  ;;  %v4590_v21 = vpop.f32.mrb[56].mxu0 }
 0x1a3   : > { %v6268_v14 = vadd.f32 %v4704_v32, %v4568_v42  ;;  %v4707_v10 = vadd.f32 %v4706_v1, %v4705_v23  ;;  %v4591_v11 = vpop.f32.mrb[57].mxu0 }
 0x1a4   : > { %v6272_v37 = vadd.f32 %v4591_v11, %v4590_v21  ;;  %v4593_v17 = vpop.f32.mrb[58].mxu0 }
 0x1a5   : > { %v6270_v25 = vadd.f32 %v4707_v10, %v4571_v34  ;;  %v4594_v56 = vpop.f32.mrb[59].mxu0 }
 0x1a6   : > { %v4595_v49 = vadd.f32 %v4594_v56, %v4593_v17 }
 0x1a7   : > { %6466 = vst [vmem:[#allocation5_spill] sm:$0xff] %v6270_v25  ;;  %v4708_v26 = vpop.f32.mrb[60].mxu1 }
 0x1a8   : > { %v4709_v55 = vpop.f32.mrb[61].mxu1 }
 0x1a9   : > { %v4710_v29 = vadd.f32 %v4709_v55, %v4708_v26  ;;  %v4711_v6 = vpop.f32.mrb[62].mxu1 }
 0x1aa   : > { %v4712_v27 = vpop.f32.mrb[63].mxu1  ;;  %v4596_v42 = vpop.f32.mrb[60].mxu0 }
 0x1ab   : > { %v6274_v62 = vadd.f32 %v4710_v29, %v4574_v19  ;;  %v4713_v5 = vadd.f32 %v4712_v27, %v4711_v6  ;;  %v4597_v32 = vpop.f32.mrb[61].mxu0 }
 0x1ac   : > { %v6278_v34 = vadd.f32 %v4597_v32, %v4596_v42  ;;  %v4599_v23 = vpop.f32.mrb[62].mxu0 }
 0x1ad   : > { %v6276_v30 = vadd.f32 %v4713_v5, %v4577_v22  ;;  %v4600_v10 = vpop.f32.mrb[63].mxu0 }
 0x1ae   : > { %v6280_v11 = vadd.f32 %v4600_v10, %v4599_v23 }
 0x1af   : > { %v4714_v1 = vpop.f32.mrb[64].mxu1 }
 0x1b0   : > { %v4715_v21 = vpop.f32.mrb[65].mxu1 }
 0x1b1   : > { %v4716_v25 = vadd.f32 %v4715_v21, %v4714_v1  ;;  %v4717_v17 = vpop.f32.mrb[66].mxu1 }
 0x1b2   : > { %v4718_v26 = vpop.f32.mrb[67].mxu1  ;;  %v4916_v55 = vpop.f32.mrb[64].mxu0 }
 0x1b3   : > { %v6282_v56 = vadd.f32 %v4716_v25, %v4580_v53  ;;  %v4719_v19 = vadd.f32 %v4718_v26, %v4717_v17  ;;  %v2202_v22 = vadd.f32 %v4916_v55, %v6150_v61  ;;  %v2193_v6 = vpop.f32.mrb[65].mxu0 }
 0x1b4   : > { %v2194_v27 = vadd.f32 %v6104_v44, %v2193_v6  ;;  %v4917_v5 = vpop.f32.mrb[66].mxu0 }
 0x1b5   : > { %v6284_v29 = vadd.f32 %v4719_v19, %v4583_v15  ;;  %v6289_v32 = vadd.f32 %v6205_v12, %v2202_v22  ;;  %v2205_v23 = vadd.f32 %v4917_v5, %v6152_v43  ;;  %v2196_v1 = vpop.f32.mrb[67].mxu0 }
 0x1b6   : > { %v6293_v53 = vadd.f32 %v6193_v38, %v2194_v27  ;;  %v2197_v15 = vadd.f32 %v6109_v54, %v2196_v1 }
 0x1b7   : > { %v4720_v42 = vpop.f32.mrb[68].mxu1  ;;  %v6297_v61 = vadd.f32 %v6208_v59, %v2205_v23 }
 0x1b8   : > { %v4721_v10 = vpop.f32.mrb[69].mxu1  ;;  %v6300_v17 = vadd.f32 %v6196_v63, %v2197_v15 }
 0x1b9   : > { %v4722_v25 = vadd.f32 %v4721_v10, %v4720_v42  ;;  %v4723_v21 = vpop.f32.mrb[70].mxu1 }
 0x1ba   : > { %v4724_v44 = vpop.f32.mrb[71].mxu1  ;;  %v4920_v43 = vpop.f32.mrb[68].mxu0 }
 0x1bb   : > { %v6302_v12 = vadd.f32 %v4722_v25, %v4586_v20  ;;  %v4725_v26 = vadd.f32 %v4724_v44, %v4723_v21  ;;  %v2218_v38 = vadd.f32 %v4920_v43, %v6183_v0  ;;  %v2209_v55 = vpop.f32.mrb[69].mxu0 }
 0x1bc   : > { %v2210_v54 = vadd.f32 %v6166_v36, %v2209_v55  ;;  %v4921_v22 = vpop.f32.mrb[70].mxu0 }
 0x1bd   : > { %v6304_v19 = vadd.f32 %v4725_v26, %v4589_v33  ;;  %v6309_v59 = vadd.f32 %v6229_v9, %v2218_v38  ;;  %v2221_v27 = vadd.f32 %v4921_v22, %v6186_v51  ;;  %v2212_v63 = vpop.f32.mrb[71].mxu0 }
 0x1be   : > { %v6313_v20 = vadd.f32 %v6217_v48, %v2210_v54  ;;  %v2213_v33 = vadd.f32 %v6168_v47, %v2212_v63 }
 0x1bf   : > { %v4726_v6 = vpop.f32.mrb[72].mxu1  ;;  %v6317_v0 = vadd.f32 %v6232_v3, %v2221_v27 }
 0x1c0   : > { %v4727_v5 = vpop.f32.mrb[73].mxu1  ;;  %v5087_v1 = vadd.f32 %v6220_v7, %v2213_v33 }
 0x1c1   : > { %v4728_v42 = vadd.f32 %v4727_v5, %v4726_v6  ;;  %v4729_v23 = vpop.f32.mrb[74].mxu1 }
 0x1c2   : > { %v4730_v36 = vpop.f32.mrb[75].mxu1  ;;  %v4924_v51 = vpop.f32.mrb[72].mxu0 }
 0x1c3   : > { %v6321_v9 = vadd.f32 %v4728_v42, %v6272_v37  ;;  %v4731_v10 = vadd.f32 %v4730_v36, %v4729_v23  ;;  %v2234_v48 = vadd.f32 %v4924_v51, %v6213_v60  ;;  %v2225_v25 = vpop.f32.mrb[73].mxu0 }
 0x1c4   : > { %v2226_v47 = vadd.f32 %v6201_v57, %v2225_v25  ;;  %v4925_v21 = vpop.f32.mrb[74].mxu0 }
 0x1c5   : > { %v6323_v15 = vadd.f32 %v4731_v10, %v4595_v49  ;;  %v6328_v3 = vadd.f32 %v6248_v8, %v2234_v48  ;;  %v2237_v26 = vadd.f32 %v4925_v21, %v6215_v16  ;;  %v2228_v7 = vpop.f32.mrb[75].mxu0 }
 0x1c6   : > { %v5095_v37 = vadd.f32 %v6242_v35, %v2226_v47  ;;  %v2229_v38 = vadd.f32 %v6203_v40, %v2228_v7 }
 0x1c7   : > { %v4732_v44 = vpop.f32.mrb[76].mxu1  ;;  %v6334_v60 = vadd.f32 %v6250_v28, %v2237_v26 }
 0x1c8   : > { %v4733_v43 = vpop.f32.mrb[77].mxu1  ;;  %v5103_v57 = vadd.f32 %v6246_v46, %v2229_v38 }
 0x1c9   : > { %v4734_v49 = vadd.f32 %v4733_v43, %v4732_v44  ;;  %v4735_v55 = vpop.f32.mrb[78].mxu1 }
 0x1ca   : > { %v4736_v54 = vpop.f32.mrb[79].mxu1  ;;  %v4928_v6 = vpop.f32.mrb[76].mxu0 }
 0x1cb   : > { %v6338_v22 = vadd.f32 %v4734_v49, %v6278_v34  ;;  %v4737_v8 = vadd.f32 %v4736_v54, %v4735_v55  ;;  %v2250_v35 = vadd.f32 %v4928_v6, %v6237_v52  ;;  %v2241_v27 = vpop.f32.mrb[77].mxu0 }
 0x1cc   : > { %v2242_v40 = vadd.f32 %v6225_v18, %v2241_v27  ;;  %v4929_v63 = vpop.f32.mrb[78].mxu0 }
 0x1cd   : > { %v6341_v16 = vadd.f32 %v4737_v8, %v6280_v11  ;;  %v6346_v28 = vadd.f32 %v6256_v41, %v2250_v35  ;;  %v2253_v5 = vadd.f32 %v4929_v63, %v6240_v58  ;;  %v2244_v46 = vpop.f32.mrb[79].mxu0 }
 0x1ce   : > { %v5111_v34 = vadd.f32 %v6252_v50, %v2242_v40  ;;  %v2245_v33 = vadd.f32 %v6227_v39, %v2244_v46 }
 0x1cf   : > { %v6352_v42 = vadd.f32 %v6258_v24, %v2253_v5 }
 0x1d0   : > { %v5119_v11 = vadd.f32 %v6254_v2, %v2245_v33 }
 0x1d2   : > { %v4778_v52 = vpop.f32.mrb[80].mxu0 }
 0x1d3   : > { %v4779_v23 = vpop.f32.mrb[81].mxu0 }
 0x1d4   : > { %v4780_v36 = vadd.f32 %v4779_v23, %v4778_v52  ;;  %v4781_v18 = vpop.f32.mrb[82].mxu0 }
 0x1d5   : > { %v4782_v10 = vpop.f32.mrb[83].mxu0 }
 0x1d6   : > { %v4783_v51 = vadd.f32 %v4782_v10, %v4781_v18  ;;  %v5064_v41 = vadd.f32 %v6293_v53, %v4780_v36 }
 0x1d8   : > { %v6357_v58 = vadd.f32 %v6300_v17, %v4783_v51 }
 0x1da   : > { %v4784_v48 = vpop.f32.mrb[84].mxu0 }
 0x1db   : > { %v4785_v50 = vpop.f32.mrb[85].mxu0 }
 0x1dc   : > { %v4786_v25 = vadd.f32 %v4785_v50, %v4784_v48  ;;  %v4787_v39 = vpop.f32.mrb[86].mxu0 }
 0x1dd   : > { %v4788_v47 = vpop.f32.mrb[87].mxu0 }
 0x1de   : > { %v4789_v24 = vadd.f32 %v4788_v47, %v4787_v39  ;;  %v5060_v21 = vadd.f32 %v6289_v32, %v4786_v25 }
 0x1e0   : > { %v5068_v2 = vadd.f32 %v6297_v61, %v4789_v24 }
 0x1e2   : > { %v4790_v44 = vpop.f32.mrb[88].mxu0 }
 0x1e3   : > { %v4791_v26 = vpop.f32.mrb[89].mxu0 }
 0x1e4   : > { %v4792_v7 = vadd.f32 %v4791_v26, %v4790_v44  ;;  %v4793_v43 = vpop.f32.mrb[90].mxu0 }
 0x1e5   : > { %v4794_v38 = vpop.f32.mrb[91].mxu0 }
 0x1e6   : > { %v4795_v49 = vadd.f32 %v4794_v38, %v4793_v43  ;;  %v6362_v53 = vadd.f32 %v6313_v20, %v4792_v7 }
 0x1e8   : > { %v6364_v17 = vadd.f32 %v5087_v1, %v4795_v49 }
 0x1ea   : > { %v4796_v55 = vpop.f32.mrb[92].mxu0 }
 0x1eb   : > { %v4797_v54 = vpop.f32.mrb[93].mxu0 }
 0x1ec   : > { %v4798_v8 = vadd.f32 %v4797_v54, %v4796_v55  ;;  %v4799_v6 = vpop.f32.mrb[94].mxu0 }
 0x1ed   : > { %v4800_v35 = vpop.f32.mrb[95].mxu0 }
 0x1ee   : > { %v4801_v27 = vadd.f32 %v4800_v35, %v4799_v6  ;;  %v5076_v32 = vadd.f32 %v6309_v59, %v4798_v8 }
 0x1f0   : > { %v6368_v61 = vadd.f32 %v6317_v0, %v4801_v27 }
 0x1f2   : > { %v4802_v40 = vpop.f32.mrb[96].mxu0 }
 0x1f3   : > { %v4803_v63 = vpop.f32.mrb[97].mxu0 }
 0x1f4   : > { %v4804_v5 = vadd.f32 %v4803_v63, %v4802_v40  ;;  %v4805_v46 = vpop.f32.mrb[98].mxu0 }
 0x1f5   : > { %v4806_v33 = vpop.f32.mrb[99].mxu0 }
 0x1f6   : > { %v4807_v20 = vadd.f32 %v4806_v33, %v4805_v46  ;;  %v6370_v52 = vadd.f32 %v5095_v37, %v4804_v5 }
 0x1f8   : > { %v6372_v1 = vadd.f32 %v5103_v57, %v4807_v20 }
 0x1fa   : > { %v4808_v23 = vpop.f32.mrb[100].mxu0 }
 0x1fb   : > { %v4809_v36 = vpop.f32.mrb[101].mxu0 }
 0x1fc   : > { %v4810_v18 = vadd.f32 %v4809_v36, %v4808_v23  ;;  %v4811_v10 = vpop.f32.mrb[102].mxu0 }
 0x1fd   : > { %v4812_v51 = vpop.f32.mrb[103].mxu0 }
 0x1fe   : > { %v4813_v48 = vadd.f32 %v4812_v51, %v4811_v10  ;;  %v6375_v59 = vadd.f32 %v6328_v3, %v4810_v18 }
 0x200   : > { %v6378_v0 = vadd.f32 %v6334_v60, %v4813_v48 }
 0x202   : > { %v4814_v50 = vpop.f32.mrb[104].mxu0 }
 0x203   : > { %v4815_v25 = vpop.f32.mrb[105].mxu0 }
 0x204   : > { %v4816_v39 = vadd.f32 %v4815_v25, %v4814_v50  ;;  %v4817_v37 = vpop.f32.mrb[106].mxu0 }
 0x205   : > { %v4818_v47 = vpop.f32.mrb[107].mxu0 }
 0x206   : > { %v4819_v57 = vadd.f32 %v4818_v47, %v4817_v37  ;;  %v6380_v24 = vadd.f32 %v5111_v34, %v4816_v39 }
 0x208   : > { %v6382_v44 = vadd.f32 %v5119_v11, %v4819_v57 }
 0x20a   : > { %v4820_v26 = vpop.f32.mrb[108].mxu0 }
 0x20b   : > { %v4821_v7 = vpop.f32.mrb[109].mxu0 }
 0x20c   : > { %v4822_v43 = vadd.f32 %v4821_v7, %v4820_v26  ;;  %v4823_v38 = vpop.f32.mrb[110].mxu0 }
 0x20d   : > { %v4824_v49 = vpop.f32.mrb[111].mxu0 }
 0x20e   : > { %v4825_v54 = vadd.f32 %v4824_v49, %v4823_v38  ;;  %v6386_v35 = vadd.f32 %v6346_v28, %v4822_v43 }
 0x20f   : > { %v5012_v3 = vpop.f32.mrb[80].mxu1 }
 0x210   : > { %v5061_v55 = vadd.f32 %v5060_v21, %v5012_v3  ;;  %v3481_v60 = vpop.f32.mrb[81].mxu1  ;;  %v6395_v21 = vadd.f32 %v6352_v42, %v4825_v54 }
 0x211   : > { %v5065_v8 = vadd.f32 %v5064_v41, %v3481_v60  ;;  %v5013_v6 = vpop.f32.mrb[82].mxu1 }
 0x212   : > { %v5069_v27 = vadd.f32 %v5068_v2, %v5013_v6  ;;  %v3484_v34 = vpop.f32.mrb[83].mxu1  ;;  %v4826_v41 = vpop.f32.mrb[112].mxu0  ;;  %v3839_v33 = vmul.f32 %v5061_v55, %v5061_v55 }
 0x213   : > { %v5073_v11 = vadd.f32 %v6357_v58, %v3484_v34  ;;  %v3837_v63 = vmul.f32 %v5065_v8, %v5065_v8  ;;  %v4827_v2 = vpop.f32.mrb[113].mxu0 }
 0x214   : > { %v4403_v40 = vpack.c.bf16 %v5069_v27, %v5061_v55  ;;  %v4828_v20 = vadd.f32 %v4827_v2, %v4826_v41  ;;  %v4829_v23 = vpop.f32.mrb[114].mxu0  ;;  %v3840_v51 = vmul.f32 %v5069_v27, %v5069_v27 }
 0x215   : > { %v4398_v5 = vpack.c.bf16 %v5073_v11, %v5065_v8  ;;  %v3800_v28 = vadd.f32 %v5073_v11, %v5065_v8  ;;  %v3838_v46 = vmul.f32 %v5073_v11, %v5073_v11  ;;  %v4830_v58 = vpop.f32.mrb[115].mxu0 }
 0x216   : > { %4475 = vst [vmem:[%s6391_s17 + $0x8] sm:$0xff] %v4403_v40   ;;  %v4831_v50 = vadd.f32 %v4830_v58, %v4829_v23  ;;  %v6402_v7 = vadd.f32 %v6260_v4, %v4828_v20 }
 0x217   : > { %4399 = vst [vmem:[%s6391_s17] sm:$0xff] %v4398_v5   ;;  %v3801_v36 = vadd.f32 %v5061_v55, %v3800_v28  ;;  %v3869_v18 = vadd.f32 %v3838_v46, %v3837_v63  ;;  %v5016_v10 = vpop.f32.mrb[84].mxu1 }
 0x218   : > { %v5077_v48 = vadd.f32 %v5076_v32, %v5016_v10  ;;  %v3497_v42 = vpop.f32.mrb[85].mxu1  ;;  %v6406_v55 = vadd.f32 %v6262_v31, %v4831_v50 }
 0x219   : > { %v3870_v25 = vadd.f32 %v3869_v18, %v3839_v33  ;;  %v5081_v39 = vadd.f32 %v6362_v53, %v3497_v42  ;;  %v3802_v37 = vadd.f32 %v5069_v27, %v3801_v36  ;;  %v5017_v47 = vpop.f32.mrb[86].mxu1 }
 0x21a   : > { %v5085_v57 = vadd.f32 %v6368_v61, %v5017_v47  ;;  %v3500_v26 = vpop.f32.mrb[87].mxu1  ;;  %v4832_v53 = vpop.f32.mrb[116].mxu0  ;;  %v3843_v27 = vmul.f32 %v5077_v48, %v5077_v48 }
 0x21b   : > { %v3803_v43 = vadd.f32 %v5081_v39, %v3802_v37  ;;  %v3841_v38 = vmul.f32 %v5081_v39, %v5081_v39  ;;  %v3871_v3 = vadd.f32 %v3870_v25, %v3840_v51  ;;  %v5089_v32 = vadd.f32 %v6364_v17, %v3500_v26  ;;  %v4833_v61 = vpop.f32.mrb[117].mxu0 }
 0x21c   : > { %v4413_v49 = vpack.c.bf16 %v5085_v57, %v5077_v48  ;;  %v4834_v4 = vadd.f32 %v4833_v61, %v4832_v53  ;;  %v4835_v34 = vpop.f32.mrb[118].mxu0  ;;  %v3844_v63 = vmul.f32 %v5085_v57, %v5085_v57 }
 0x21d   : > { %v3872_v60 = vadd.f32 %v3871_v3, %v3841_v38  ;;  %v4408_v54 = vpack.c.bf16 %v5089_v32, %v5081_v39  ;;  %v3804_v8 = vadd.f32 %v5089_v32, %v3803_v43  ;;  %v3842_v6 = vmul.f32 %v5089_v32, %v5089_v32  ;;  %v4836_v17 = vpop.f32.mrb[119].mxu0 }
 0x21e   : > { %4477 = vst [vmem:[%s6391_s17 + $0x18] sm:$0xff] %v4413_v49   ;;  %v4837_v28 = vadd.f32 %v4836_v17, %v4835_v34  ;;  %v5123_v18 = vadd.f32 %v6264_v45, %v4834_v4 }
 0x21f   : > { %4476 = vst [vmem:[%s6391_s17 + $0x10] sm:$0xff] %v4408_v54   ;;  %v3805_v11 = vadd.f32 %v5077_v48, %v3804_v8  ;;  %v3873_v40 = vadd.f32 %v3872_v60, %v3842_v6  ;;  %v5020_v41 = vpop.f32.mrb[88].mxu1 }
 0x220   : > { %v5093_v5 = vadd.f32 %v6375_v59, %v5020_v41  ;;  %v3513_v31 = vpop.f32.mrb[89].mxu1  ;;  %v5129_v42 = vadd.f32 %v6266_v13, %v4837_v28  ;;  %v6467_v41 = vld [vmem:[#allocation5_spill] sm:$0xff] }
 0x221   : > { %v3874_v46 = vadd.f32 %v3873_v40, %v3843_v27  ;;  %v5097_v2 = vadd.f32 %v6370_v52, %v3513_v31  ;;  %v3806_v33 = vadd.f32 %v5085_v57, %v3805_v11  ;;  %v5021_v20 = vpop.f32.mrb[90].mxu1 }
 0x222   : > { %v5101_v23 = vadd.f32 %v6378_v0, %v5021_v20  ;;  %v3516_v36 = vpop.f32.mrb[91].mxu1  ;;  %v4838_v50 = vpop.f32.mrb[120].mxu0  ;;  %v3847_v0 = vmul.f32 %v5093_v5, %v5093_v5 }
 0x223   : > { %v3807_v10 = vadd.f32 %v5097_v2, %v3806_v33  ;;  %v3845_v51 = vmul.f32 %v5097_v2, %v5097_v2  ;;  %v3875_v58 = vadd.f32 %v3874_v46, %v3844_v63  ;;  %v5105_v48 = vadd.f32 %v6372_v1, %v3516_v36  ;;  %v4839_v47 = vpop.f32.mrb[121].mxu0 }
 0x224   : > { %v4423_v59 = vpack.c.bf16 %v5101_v23, %v5093_v5  ;;  %v4840_v57 = vadd.f32 %v4839_v47, %v4838_v50  ;;  %v4841_v26 = vpop.f32.mrb[122].mxu0  ;;  %v3848_v3 = vmul.f32 %v5101_v23, %v5101_v23 }
 0x225   : > { %v3876_v25 = vadd.f32 %v3875_v58, %v3845_v51  ;;  %v4418_v52 = vpack.c.bf16 %v5105_v48, %v5097_v2  ;;  %v3808_v39 = vadd.f32 %v5105_v48, %v3807_v10  ;;  %v3846_v37 = vmul.f32 %v5105_v48, %v5105_v48  ;;  %v4842_v32 = vpop.f32.mrb[123].mxu0 }
 0x226   : > { %4479 = vst [vmem:[%s6391_s17 + $0x28] sm:$0xff] %v4423_v59   ;;  %v4843_v13 = vadd.f32 %v4842_v32, %v4841_v26  ;;  %v5138_v27 = vadd.f32 %v6268_v14, %v4840_v57 }
 0x227   : > { %4478 = vst [vmem:[%s6391_s17 + $0x20] sm:$0xff] %v4418_v52   ;;  %v3809_v45 = vadd.f32 %v5093_v5, %v3808_v39  ;;  %v3877_v43 = vadd.f32 %v3876_v25, %v3846_v37  ;;  %v5024_v38 = vpop.f32.mrb[92].mxu1 }
 0x228   : > { %v5109_v1 = vadd.f32 %v6386_v35, %v5024_v38  ;;  %v3529_v49 = vpop.f32.mrb[93].mxu1  ;;  %v5144_v63 = vadd.f32 %v6467_v41, %v4843_v13 }
 0x229   : > { %v3878_v53 = vadd.f32 %v3877_v43, %v3847_v0  ;;  %v5113_v60 = vadd.f32 %v6380_v24, %v3529_v49  ;;  %v3810_v54 = vadd.f32 %v5101_v23, %v3809_v45  ;;  %v5025_v8 = vpop.f32.mrb[94].mxu1 }
 0x22a   : > { %v5117_v6 = vadd.f32 %v6395_v21, %v5025_v8  ;;  %v3532_v61 = vpop.f32.mrb[95].mxu1  ;;  %v4844_v17 = vpop.f32.mrb[124].mxu0  ;;  %v3851_v21 = vmul.f32 %v5109_v1, %v5109_v1 }
 0x22b   : > { %v3811_v4 = vadd.f32 %v5113_v60, %v3810_v54  ;;  %v3849_v34 = vmul.f32 %v5113_v60, %v5113_v60  ;;  %v3879_v11 = vadd.f32 %v3878_v53, %v3848_v3  ;;  %v5121_v40 = vadd.f32 %v6382_v44, %v3532_v61  ;;  %v4845_v46 = vpop.f32.mrb[125].mxu0 }
 0x22c   : > { %v4433_v35 = vpack.c.bf16 %v5117_v6, %v5109_v1  ;;  %v4846_v2 = vadd.f32 %v4845_v46, %v4844_v17  ;;  %v4847_v33 = vpop.f32.mrb[126].mxu0  ;;  %v3852_v36 = vmul.f32 %v5117_v6, %v5117_v6 }
 0x22d   : > { %v3880_v5 = vadd.f32 %v3879_v11, %v3849_v34  ;;  %v4428_v24 = vpack.c.bf16 %v5121_v40, %v5113_v60  ;;  %v3812_v31 = vadd.f32 %v5121_v40, %v3811_v4  ;;  %v3850_v28 = vmul.f32 %v5121_v40, %v5121_v40  ;;  %v4848_v10 = vpop.f32.mrb[127].mxu0 }
 0x22e   : > { %4481 = vst [vmem:[%s6391_s17 + $0x38] sm:$0xff] %v4433_v35   ;;  %v4849_v58 = vadd.f32 %v4848_v10, %v4847_v33  ;;  %v5135_v37 = vadd.f32 %v6274_v62, %v4846_v2 }
 0x22f   : > { %4480 = vst [vmem:[%s6391_s17 + $0x30] sm:$0xff] %v4428_v24   ;;  %v3813_v14 = vadd.f32 %v5109_v1, %v3812_v31  ;;  %v3881_v20 = vadd.f32 %v3880_v5, %v3850_v28  ;;  %v5028_v23 = vpop.f32.mrb[0].mxu1 }
 0x230   : > { %v5124_v44 = vadd.f32 %v5123_v18, %v5028_v23  ;;  %v3545_v51 = vpop.f32.mrb[1].mxu1  ;;  %v5141_v18 = vadd.f32 %v6276_v30, %v4849_v58 }
 0x231   : > { %v3882_v48 = vadd.f32 %v3881_v20, %v3851_v21  ;;  %v5127_v59 = vadd.f32 %v6402_v7, %v3545_v51  ;;  %v3814_v50 = vadd.f32 %v5117_v6, %v3813_v14  ;;  %v5029_v25 = vpop.f32.mrb[2].mxu1 }
 0x232   : > { %v5130_v52 = vadd.f32 %v5129_v42, %v5029_v25  ;;  %v3548_v39 = vpop.f32.mrb[3].mxu1  ;;  %v4850_v43 = vpop.f32.mrb[128].mxu0  ;;  %v3855_v42 = vmul.f32 %v5124_v44, %v5124_v44 }
 0x233   : > { %v3815_v47 = vadd.f32 %v5127_v59, %v3814_v50  ;;  %v3853_v0 = vmul.f32 %v5127_v59, %v5127_v59  ;;  %v3883_v57 = vadd.f32 %v3882_v48, %v3852_v36  ;;  %v5133_v26 = vadd.f32 %v6406_v55, %v3548_v39  ;;  %v4851_v1 = vpop.f32.mrb[129].mxu0 }
 0x234   : > { %v4443_v45 = vpack.c.bf16 %v5130_v52, %v5124_v44  ;;  %v4852_v49 = vadd.f32 %v4851_v1, %v4850_v43  ;;  %v4853_v13 = vpop.f32.mrb[130].mxu0  ;;  %v3856_v54 = vmul.f32 %v5130_v52, %v5130_v52 }
 0x235   : > { %v3884_v38 = vadd.f32 %v3883_v57, %v3853_v0  ;;  %v4438_v3 = vpack.c.bf16 %v5133_v26, %v5127_v59  ;;  %v3816_v7 = vadd.f32 %v5133_v26, %v3815_v47  ;;  %v3854_v32 = vmul.f32 %v5133_v26, %v5133_v26  ;;  %v4854_v8 = vpop.f32.mrb[131].mxu0 }
 0x236   : > { %4483 = vst [vmem:[%s6391_s17 + $0x48] sm:$0xff] %v4443_v45   ;;  %v4855_v61 = vadd.f32 %v4854_v8, %v4853_v13  ;;  %v5150_v41 = vadd.f32 %v6282_v56, %v4852_v49 }
 0x237   : > { %4482 = vst [vmem:[%s6391_s17 + $0x40] sm:$0xff] %v4438_v3   ;;  %v3817_v62 = vadd.f32 %v5124_v44, %v3816_v7  ;;  %v3885_v53 = vadd.f32 %v3884_v38, %v3854_v32  ;;  %v5032_v60 = vpop.f32.mrb[4].mxu1 }
 0x238   : > { %v5136_v55 = vadd.f32 %v5135_v37, %v5032_v60  ;;  %v3561_v6 = vpop.f32.mrb[5].mxu1  ;;  %v5156_v46 = vadd.f32 %v6284_v29, %v4855_v61 }
 0x239   : > { %v3886_v30 = vadd.f32 %v3885_v53, %v3855_v42  ;;  %v5139_v4 = vadd.f32 %v5138_v27, %v3561_v6  ;;  %v3818_v34 = vadd.f32 %v5130_v52, %v3817_v62  ;;  %v5033_v11 = vpop.f32.mrb[6].mxu1 }
 0x23a   : > { %v5142_v40 = vadd.f32 %v5141_v18, %v5033_v11  ;;  %v3564_v35 = vpop.f32.mrb[7].mxu1  ;;  %v4856_v21 = vpop.f32.mrb[132].mxu0  ;;  %v3859_v23 = vmul.f32 %v5136_v55, %v5136_v55 }
 0x23b   : > { %v3819_v17 = vadd.f32 %v5139_v4, %v3818_v34  ;;  %v3857_v5 = vmul.f32 %v5139_v4, %v5139_v4  ;;  %v3887_v24 = vadd.f32 %v3886_v30, %v3856_v54  ;;  %v5145_v31 = vadd.f32 %v5144_v63, %v3564_v35  ;;  %v4857_v20 = vpop.f32.mrb[133].mxu0 }
 0x23c   : > { %v4453_v28 = vpack.c.bf16 %v5142_v40, %v5136_v55  ;;  %v4858_v36 = vadd.f32 %v4857_v20, %v4856_v21  ;;  %v4859_v10 = vpop.f32.mrb[134].mxu0  ;;  %v3860_v58 = vmul.f32 %v5142_v40, %v5142_v40 }
 0x23d   : > { %v3888_v2 = vadd.f32 %v3887_v24, %v3857_v5  ;;  %v4448_v33 = vpack.c.bf16 %v5145_v31, %v5139_v4  ;;  %v3820_v14 = vadd.f32 %v5145_v31, %v3819_v17  ;;  %v3858_v27 = vmul.f32 %v5145_v31, %v5145_v31  ;;  %v4860_v48 = vpop.f32.mrb[135].mxu0 }
 0x23e   : > { %4485 = vst [vmem:[%s6391_s17 + $0x58] sm:$0xff] %v4453_v28   ;;  %v4861_v59 = vadd.f32 %v4860_v48, %v4859_v10  ;;  %v5147_v29 = vadd.f32 %v6302_v12, %v4858_v36 }
 0x23f   : > { %4484 = vst [vmem:[%s6391_s17 + $0x50] sm:$0xff] %v4448_v33   ;;  %v3821_v56 = vadd.f32 %v5136_v55, %v3820_v14  ;;  %v3889_v44 = vadd.f32 %v3888_v2, %v3858_v27  ;;  %v5036_v51 = vpop.f32.mrb[8].mxu1 }
 0x240   : > { %v3577_v63 = vpop.f32.mrb[9].mxu1  ;;  %v5148_v47 = vadd.f32 %v5147_v29, %v5036_v51  ;;  %v5153_v26 = vadd.f32 %v6304_v19, %v4861_v59 }
 0x241   : > { %v3890_v50 = vadd.f32 %v3889_v44, %v3859_v23  ;;  %v5151_v25 = vadd.f32 %v5150_v41, %v3577_v63  ;;  %v5037_v52 = vpop.f32.mrb[10].mxu1  ;;  %v3822_v39 = vadd.f32 %v5142_v40, %v3821_v56 }
 0x242   : > { %v3580_v37 = vpop.f32.mrb[11].mxu1  ;;  %v4862_v43 = vpop.f32.mrb[136].mxu0  ;;  %v5154_v3 = vadd.f32 %v5153_v26, %v5037_v52  ;;  %v3863_v53 = vmul.f32 %v5148_v47, %v5148_v47 }
 0x243   : > { %v3861_v0 = vmul.f32 %v5151_v25, %v5151_v25  ;;  %v3891_v57 = vadd.f32 %v3890_v50, %v3860_v58  ;;  %v3823_v45 = vadd.f32 %v5151_v25, %v3822_v39  ;;  %v5157_v18 = vadd.f32 %v5156_v46, %v3580_v37  ;;  %v4863_v7 = vpop.f32.mrb[137].mxu0 }
 0x244   : > { %v4864_v42 = vadd.f32 %v4863_v7, %v4862_v43  ;;  %v4865_v49 = vpop.f32.mrb[138].mxu0  ;;  %v4463_v13 = vpack.c.bf16 %v5154_v3, %v5148_v47  ;;  %v3864_v30 = vmul.f32 %v5154_v3, %v5154_v3 }
 0x245   : > { %v3892_v38 = vadd.f32 %v3891_v57, %v3861_v0  ;;  %v4458_v32 = vpack.c.bf16 %v5157_v18, %v5151_v25  ;;  %v3824_v1 = vadd.f32 %v5157_v18, %v3823_v45  ;;  %v3862_v12 = vmul.f32 %v5157_v18, %v5157_v18  ;;  %v4866_v60 = vpop.f32.mrb[139].mxu0 }
 0x246   : > { %4487 = vst [vmem:[%s6391_s17 + $0x68] sm:$0xff] %v4463_v13   ;;  %v4867_v55 = vadd.f32 %v4866_v60, %v4865_v49  ;;  %v5162_v6 = vadd.f32 %v6321_v9, %v4864_v42 }
 0x247   : > { %v5040_v62 = vpop.f32.mrb[12].mxu1  ;;  %4486 = vst [vmem:[%s6391_s17 + $0x60] sm:$0xff] %v4458_v32   ;;  %v3825_v54 = vadd.f32 %v5148_v47, %v3824_v1  ;;  %v3893_v19 = vadd.f32 %v3892_v38, %v3862_v12 }
 0x248   : > { %v3593_v8 = vpop.f32.mrb[13].mxu1  ;;  %v5168_v35 = vadd.f32 %v6323_v15, %v4867_v55 }
 0x249   : > { %v5041_v61 = vpop.f32.mrb[14].mxu1  ;;  %v3894_v4 = vadd.f32 %v3893_v19, %v3863_v53  ;;  %v3826_v34 = vadd.f32 %v5154_v3, %v3825_v54  ;;  %v5163_v40 = vadd.f32 %v5162_v6, %v3593_v8 }
 0x24a   : > { %v3596_v11 = vpop.f32.mrb[15].mxu1  ;;  %v4868_v17 = vpop.f32.mrb[140].mxu0 }
 0x24b   : > { %v3895_v41 = vadd.f32 %v3894_v4, %v3864_v30  ;;  %v3827_v5 = vadd.f32 %v5163_v40, %v3826_v34  ;;  %v3865_v24 = vmul.f32 %v5163_v40, %v5163_v40  ;;  %v5169_v31 = vadd.f32 %v5168_v35, %v3596_v11  ;;  %v4869_v28 = vpop.f32.mrb[141].mxu0 }
 0x24c   : > { %v4870_v46 = vadd.f32 %v4869_v28, %v4868_v17  ;;  %v4871_v2 = vpop.f32.mrb[142].mxu0 }
 0x24d   : > { %v3896_v21 = vadd.f32 %v3895_v41, %v3865_v24  ;;  %v4468_v33 = vpack.c.bf16 %v5169_v31, %v5163_v40  ;;  %v3828_v9 = vadd.f32 %v5169_v31, %v3827_v5  ;;  %v4872_v14 = vpop.f32.mrb[143].mxu0  ;;  %v3866_v27 = vmul.f32 %v5169_v31, %v5169_v31 }
 0x24e   : > { %v5159_v20 = vadd.f32 %v6338_v22, %v4870_v46  ;;  %v4873_v23 = vadd.f32 %v4872_v14, %v4871_v2 }
 0x24f   : > { %4488 = vst [vmem:[%s6391_s17 + $0x70] sm:$0xff] %v4468_v33   ;;  %v3897_v15 = vadd.f32 %v3896_v21, %v3866_v27 }
 0x250   : > { %v5160_v36 = vadd.f32 %v5159_v20, %v5040_v62  ;;  %v5165_v10 = vadd.f32 %v6341_v16, %v4873_v23 }
 0x252   : > { %v3867_v56 = vmul.f32 %v5160_v36, %v5160_v36  ;;  %v5166_v44 = vadd.f32 %v5165_v10, %v5041_v61  ;;  %v3829_v51 = vadd.f32 %v5160_v36, %v3828_v9 }
 0x254   : > { %v4473_v58 = vpack.c.bf16 %v5166_v44, %v5160_v36  ;;  %v3868_v48 = vmul.f32 %v5166_v44, %v5166_v44  ;;  %v3830_v63 = vadd.f32 %v5166_v44, %v3829_v51  ;;  %v3898_v59 = vadd.f32 %v3897_v15, %v3867_v56 }
 0x256   : > { %4489 = vst [vmem:[%s6391_s17 + $0x78] sm:$0xff] %v4473_v58   ;;  %v3831_v50 = vrot.slane %v3830_v63, 4  ;;  %v3899_v29 = vadd.f32 %v3898_v59, %v3868_v48 }
 0x258   : > { %v3832_v25 = vadd.f32 %v3831_v50, %v3830_v63  ;;  %v3900_v52 = vrot.slane %v3899_v29, 4 }
 0x25a   : > { %v3833_v22 = vrot.slane %v3832_v25, 2  ;;  %v3901_v39 = vadd.f32 %v3900_v52, %v3899_v29 }
 0x25c   : > { %v3834_v37 = vadd.f32 %v3833_v22, %v3832_v25  ;;  %v3902_v47 = vrot.slane %v3901_v39, 2 }
 0x25e   : > { %v3835_v0 = vrot.slane %v3834_v37, 1  ;;  %v3903_v57 = vadd.f32 %v3902_v47, %v3901_v39 }
 0x260   : > { %v3904_v16 = vrot.slane %v3903_v57, 1  ;;  %v3836_v26 = vadd.f32 %v3835_v0, %v3834_v37 }
 0x262   : > { %v3905_v45 = vadd.f32 %v3904_v16, %v3903_v57 }
 0x264   : > { %v3907_v18 = vsel %vm239_vm0, %v3836_v26, %v3905_v45 }
 0x265   : > { %3908 = vst [vmem:[%s181_s20] sm:$0x3] %v3907_v18 }
 0x266 PF: > { %s14_s12 = sadd.s32 1, %s5397_s12  }
 0x267   : > { %p11_p4 = scmp.ge.s32.totalorder %s14_s12, 4  }
 0x269   :  { %13 = sbr.rel (!%p11_p4) target bundleno = 1 (0x1), region = 76 }

// kernel: no_relu_basic_block.4
= control target key start
LH: loop header
LB: loop body
LE: loop exit
PB: predicated region body
PF: predicated region fallthrough
CT: control target
= control target key end

     0   :  { %s5710_s18 = smov 0   ;;  %s6881_s0 = inlined_call_operand.vmem [shape: bf16[2,16,16,128], index: 0, kind: input, shape index: {}]   ;;  %s6882_s1 = inlined_call_operand.vmem [shape: f32[1,128], index: 1, kind: input, shape index: {}]   ;;  %s6883_s2 = inlined_call_operand.vmem [shape: f32[1,128], index: 2, kind: input, shape index: {}]   ;;  %s6884_s3 = inlined_call_operand.vmem [shape: bf16[3,384,128], index: 3, kind: input, shape index: {}]   ;;  %s6885_s4 = inlined_call_operand.vmem [shape: bf16[2,16,16,128], index: 4, kind: output, shape index: {0}]   ;;  %s6886_s5 = inlined_call_operand.vmem [shape: f32[2,2,128], index: 5, kind: output, shape index: {1}]  }
   0x1 LB: > { %s4191_s19 = sadd.s32 4294967295, %s5677_s18   ;;  %p4195_p0 = scmp.ge.s32.totalorder %s5677_s18, 1  ;;  %s5677_s18 = sphi %s5710_s18, %s16_s18  }
   0x2   : > { %p190_p1 = scmp.lt.s32.totalorder %s5677_s18, 3 }
   0x4   : > { %p191_p2 = pnand %p4195_p0, %p190_p1 }
   0x6   : > { %194 = sbr.rel (%p191_p2) target bundleno = 632 (0x278), region = 36 }
   0xd   : > { %v5504_v0 = vld [vmem:[%s6884_s3 + $0x40] sm:$0xff]   ;;  %v5679_v2 = vmov 0   ;;  %v5507_v4 = vld [vmem:[%s6884_s3 + $0x48] sm:$0xff]   ;;  %v5510_v7 = vld [vmem:[%s6884_s3 + $0x50] sm:$0xff]   ;;  %p222_p3 = scmp.lt.s32.totalorder %s4191_s19, 1  ;;  %vm435_vm0 = vcmask 1040384  }
   0xe   : > { %v5505_v1 = vld [vmem:[%s6884_s3] sm:$0xff]   ;;  %427 = vst [vmem:[#allocation2] sm:$0xf] %v5679_v2  ;;  %428 = vst [vmem:[#allocation2 + $0x4] sm:$0xf] %v5679_v2  ;;  %4767 = vmatprep.subr.bf16.mxu0 %v5504_v0  ;;  %v5508_v5 = vld [vmem:[%s6884_s3 + $0x8] sm:$0xff]  }
   0xf   : > { %429 = vst [vmem:[#allocation2 + $0x8] sm:$0x1] %v5679_v2  ;;  %431 = vst [vmem:[#allocation2 + $0xcc] sm:$0xf] %v5679_v2  ;;  %v5727_v3 = vld [vmem:[%s6884_s3 + $0x80] sm:$0xff]   ;;  %4768 = vmatpush3.bf16.msra.mxu0 %v5505_v1  ;;  %v5740_v6 = vld [vmem:[%s6884_s3 + $0x88] sm:$0xff]  }
  0x10   : > { %432 = vst [vmem:[#allocation2 + $0xd0] sm:$0xf] %v5679_v2  ;;  %433 = vst [vmem:[#allocation2 + $0xd4] sm:$0x1] %v5679_v2  ;;  %5319 = vmatprep.subr.bf16.mxu1 %v5727_v3  ;;  %4769 = vmatprep.subr.bf16.mxu0 %v5507_v4  ;;  %v5511_v8 = vld [vmem:[%s6884_s3 + $0x10] sm:$0xff]   ;;  %v5513_v10 = vld [vmem:[%s6884_s3 + $0x58] sm:$0xff]  }
  0x11   : > { %5327 = vmatpush3.bf16.msra.mxu1 %v5727_v3  ;;  %v5752_v9 = vld [vmem:[%s6884_s3 + $0x90] sm:$0xff]   ;;  %v5514_v11 = vld [vmem:[%s6884_s3 + $0x18] sm:$0xff]   ;;  %v5516_v13 = vld [vmem:[%s6884_s3 + $0x60] sm:$0xff]   ;;  %s6900_s19 = smov (!%p222_p3, %s4191_s19), 1  ;;  %vm436_vm1 = vsmask.f32 256 }
  0x12   : > { %5320 = vmatprep.subr.bf16.mxu1 %v5740_v6  ;;  %v5765_v12 = vld [vmem:[%s6884_s3 + $0x98] sm:$0xff]   ;;  %v5777_v14 = vld [vmem:[%s6884_s3 + $0xa0] sm:$0xff]   ;;  %v5519_v16 = vld [vmem:[%s6884_s3 + $0x68] sm:$0xff]   ;;  %s4527_s12 = sshll.u32 %s6900_s19, 7  ;;  %vm486_vm3 = vsmask.f32 7938 }
  0x13   : > { %4770 = vmatpush3.bf16.msra.mxu0 %v5508_v5  ;;  %v5517_v15 = vld [vmem:[%s6884_s3 + $0x20] sm:$0xff]   ;;  %v5794_v17 = vld [vmem:[%s6884_s3 + $0xa8] sm:$0xff]   ;;  %v5522_v19 = vld [vmem:[%s6884_s3 + $0x70] sm:$0xff]   ;;  %s5821_s21 = scalar_lea.vmem %s6881_s0, %s4527_s12  ;;  %vm1412_vm4 = vsmask.f32 7424  ;;  %vm938_vm7 = vcmask 1043456   ;;  %s6809_s26 = scalar_lea.vmem %s6885_s4, %s4527_s12 }
  0x14   : > { %4771 = vmatprep.subr.bf16.mxu0 %v5510_v7  ;;  %v5520_v18 = vld [vmem:[%s6884_s3 + $0x28] sm:$0xff]   ;;  %v5523_v20 = vld [vmem:[%s6884_s3 + $0x30] sm:$0xff]   ;;  %v5525_v22 = vld [vmem:[%s6884_s3 + $0x78] sm:$0xff]   ;;  %vm616_vm6 = vsmask.f32 4368  ;;  %vm1863_vm10 = vcmask 1046528  }
  0x15   : > { %5328 = vmatpush3.bf16.msra.mxu1 %v5740_v6  ;;  %v5811_v21 = vld [vmem:[%s6884_s3 + $0xb0] sm:$0xff]   ;;  %v5526_v23 = vld [vmem:[%s6884_s3 + $0x38] sm:$0xff]   ;;  %v5528_v24 = vld [vmem:[#allocation2] sm:$0xff]   ;;  %s4200_s12 = sshll.u32 %s6900_s19, 1 }
  0x16   : > { %5321 = vmatprep.subr.bf16.mxu1 %v5752_v9  ;;  %v5529_v25 = vld [vmem:[#allocation2 + $0x8] ss:$0 sps:$4 sm:$0x11]   ;;  %v5831_v26 = vld [vmem:[%s6884_s3 + $0xb8] sm:$0xff]   ;;  %v1414_v27 = vshrl.u32 %v5528_v24, 16  ;;  %v1416_v28 = vshll.u32 %v5528_v24, 16  ;;  %vm5847_vm2 = vmand %vm435_vm0, %vm436_vm1  ;;  %s235_s29 = scalar_lea.vmem %s6886_s5, %s4200_s12 }
  0x17   : > { %4772 = vmatpush3.bf16.msra.mxu0 %v5511_v8  ;;  %v1421_v29 = vshll.u32 %v5529_v25, 16  ;;  %v4743_v30 = vld [vmem:[%s5821_s21 + $0x38] sm:$0xff]   ;;  %v5837_v31 = vld [vmem:[%s6882_s1] ss:$0 sm:$0xff]  ;;  %v509_v40 = vld [vmem:[#allocation2 + $0x68] sm:$0x1] }
  0x18   : > { %4773 = vmatprep.subr.bf16.mxu0 %v5513_v10  ;;  %v4623_v32 = vunpack.c.l.bf16 %v4743_v30  ;;  %v4624_v33 = vunpack.c.h.bf16 %v4743_v30  ;;  %v5842_v34 = vld [vmem:[%s6883_s2] ss:$0 sm:$0xff]  ;;  %v1418_v36 = vrot.slane %v1416_v28, 1  ;;  %vm5858_vm5 = vmand %vm435_vm0, %vm486_vm3  ;;  %v462_v53 = vld [vmem:[#allocation2 + $0x6c] sm:$0x1] }
  0x19   : > { %5329 = vmatpush3.bf16.msra.mxu1 %v5752_v9  ;;  %v459_v35 = vld [vmem:[#allocation2 + $0x60] sm:$0x1]  ;;  %v1423_v37 = vrot.slane %v1421_v29, 1  ;;  %v510_v47 = vsel %vm5858_vm5, 0, %v509_v40  ;;  %v512_v54 = vld [vmem:[#allocation2 + $0x74] sm:$0x1]  ;;  %vm5893_vm8 = vmor %vm436_vm1, %vm616_vm6 }
  0x1a   : > { %5322 = vmatprep.subr.bf16.mxu1 %v5765_v12  ;;  %v5530_v38 = vld [vmem:[#allocation2] sm:$0xff]   ;;  %v322_v41 = vmul.f32 %v4623_v32, %v5837_v31  ;;  %v323_v42 = vmul.f32 %v4624_v33, %v5837_v31  ;;  %v460_v43 = vsel %vm5847_vm2, 0, %v459_v35  ;;  %v1419_v46 = vor.u32 %v1418_v36, %v1414_v27  ;;  %511 = vst [vmem:[#allocation2 + $0x68] sm:$0x1] %v510_v47  ;;  %v438_v63 = vld [vmem:[#allocation2 + $0xc] sm:$0x1]  ;;  %vm5900_vm9 = vmand %vm938_vm7, %vm486_vm3 }
  0x1b   : > { %4774 = vmatpush3.bf16.msra.mxu0 %v5514_v11  ;;  %v5533_v45 = vld [vmem:[%s6884_s3 + $0x100] sm:$0xff]   ;;  %461 = vst [vmem:[#allocation2 + $0x60] sm:$0x1] %v460_v43  ;;  %v463_v56 = vsel %vm5847_vm2, 0, %v462_v53  ;;  %v513_v57 = vsel %vm5858_vm5, 0, %v512_v54  ;;  %v439_v10 = vsel %vm5847_vm2, 0, %v438_v63 }
  0x1c   : > { %4775 = vmatprep.subr.bf16.mxu0 %v5516_v13  ;;  %v4744_v48 = vld [vmem:[%s5821_s21 + $0x40] sm:$0xff]   ;;  %v361_v49 = vadd.f32 %v5842_v34, %v322_v41  ;;  %v362_v50 = vadd.f32 %v5842_v34, %v323_v42  ;;  %v1424_v55 = vsel %vm1412_vm4, %v1419_v46, %v1423_v37  ;;  %464 = vst [vmem:[#allocation2 + $0x6c] sm:$0x1] %v463_v56  ;;  %514 = vst [vmem:[#allocation2 + $0x74] sm:$0x1] %v513_v57  ;;  %v4745_v13 = vld [vmem:[%s5821_s21 + $0x48] sm:$0xff]  }
  0x1d   : > { %5330 = vmatpush3.bf16.msra.mxu1 %v5765_v12  ;;  %v4627_v51 = vunpack.c.l.bf16 %v4744_v48  ;;  %v4628_v52 = vunpack.c.h.bf16 %v4744_v48  ;;  %2226 = vmatprep.mubr.bf16.mxu0 %v1424_v55  ;;  %v4594_v62 = vld [vmem:[%s5821_s21] sm:$0xff]   ;;  %v488_v5 = vld [vmem:[#allocation2 + $0x14] sm:$0x1]  ;;  %440 = vst [vmem:[#allocation2 + $0xc] sm:$0x1] %v439_v10  ;;  %v4631_v28 = vunpack.c.l.bf16 %v4745_v13  ;;  %v4632_v29 = vunpack.c.h.bf16 %v4745_v13 }
  0x1e   : > { %5323 = vmatprep.subr.bf16.mxu1 %v5777_v14  ;;  %v393_v58 = vmax.f32 %v361_v49, 0.0  ;;  %v394_v59 = vmax.f32 %v362_v50, 0.0  ;;  %v4595_v7 = vunpack.c.l.bf16 %v4594_v62  ;;  %v4596_v8 = vunpack.c.h.bf16 %v4594_v62  ;;  %v465_v43 = vld [vmem:[#allocation2 + $0x78] sm:$0x1]  ;;  %v515_v49 = vld [vmem:[#allocation2 + $0x80] sm:$0x1] }
  0x1f   : > { %4776 = vmatpush3.bf16.msra.mxu0 %v5517_v15  ;;  %v324_v60 = vmul.f32 %v4627_v51, %v5837_v31  ;;  %v325_v61 = vmul.f32 %v4628_v52, %v5837_v31  ;;  %v489_v11 = vsel %vm5858_vm5, 0, %v488_v5  ;;  %v516_v62 = vsel %vm5858_vm5, 0, %v515_v49 }
  0x20   : > { %4777 = vmatprep.subr.bf16.mxu0 %v5519_v16  ;;  %v4543_v0 = vpack.c.bf16 %v393_v58, %v393_v58  ;;  %v4544_v1 = vpack.c.bf16 %v394_v59, %v394_v59  ;;  %490 = vst [vmem:[#allocation2 + $0x14] sm:$0x1] %v489_v11  ;;  %v326_v58 = vmul.f32 %v4631_v28, %v5837_v31  ;;  %517 = vst [vmem:[#allocation2 + $0x80] sm:$0x1] %v516_v62  ;;  %v468_v11 = vld [vmem:[#allocation2 + $0x84] sm:$0x1] }
  0x21   : > { %5331 = vmatpush3.bf16.msra.mxu1 %v5777_v14  ;;  %v363_v2 = vadd.f32 %v5842_v34, %v324_v60  ;;  %v364_v4 = vadd.f32 %v5842_v34, %v325_v61  ;;  %v993_v33 = vld [vmem:[#allocation2 + $0x68] sm:$0x1]  ;;  %v327_v61 = vmul.f32 %v4632_v29, %v5837_v31  ;;  %v469_v29 = vsel %vm5847_vm2, 0, %v468_v11  ;;  %v491_v11 = vld [vmem:[#allocation2 + $0x20] sm:$0x1] }
  0x22   : > { %5324 = vmatprep.subr.bf16.mxu1 %v5794_v17  ;;  %v738_v15 = vshrl.u32 %v4543_v0, 16  ;;  %v741_v16 = vshll.u32 %v4543_v0, 16  ;;  %v989_v32 = vld [vmem:[#allocation2 + $0x60] sm:$0xf]  ;;  %v365_v10 = vadd.f32 %v5842_v34, %v326_v58  ;;  %470 = vst [vmem:[#allocation2 + $0x84] sm:$0x1] %v469_v29 }
  0x23   : > { %4778 = vmatpush3.bf16.msra.mxu0 %v5520_v18  ;;  %v746_v18 = vshrl.u32 %v4544_v1, 16  ;;  %v996_v56 = vld [vmem:[#allocation2 + $0x6c] sm:$0xf]  ;;  %v1000_v59 = vld [vmem:[#allocation2 + $0x74] sm:$0x1] }
  0x24   : > { %4779 = vmatprep.subr.bf16.mxu0 %v5522_v19  ;;  %v395_v19 = vmax.f32 %v363_v2, 0.0  ;;  %v740_v25 = vrot.slane %v738_v15, 7 }
  0x25   : > { %5332 = vmatpush3.bf16.msra.mxu1 %v5794_v17  ;;  %v748_v27 = vrot.slane %v746_v18, 7  ;;  %v366_v18 = vadd.f32 %v5842_v34, %v327_v61 }
  0x26   : > { %5325 = vmatprep.subr.bf16.mxu1 %v5811_v21  ;;  %v4545_v35 = vpack.c.bf16 %v395_v19, %v395_v19  ;;  %v743_v40 = vor.u32 %v741_v16, %v740_v25  ;;  %v744_v41 = vrot.slane %v740_v25, 4 }
  0x27   : > { %4780 = vmatpush3.bf16.msra.mxu0 %v5523_v20  ;;  %v396_v20 = vmax.f32 %v364_v4, 0.0  ;;  %v4746_v4 = vld [vmem:[%s5821_s21 + $0x50] sm:$0xff]   ;;  %v398_v25 = vmax.f32 %v366_v18, 0.0 }
  0x28   : > { %4781 = vmatprep.subr.bf16.mxu0 %v5525_v22  ;;  %v308_v22 = vmul.f32 %v4595_v7, %v5837_v31  ;;  %v758_v46 = vshll.u32 %v4545_v35, 16  ;;  %v990_v51 = vsel %vm5900_vm9, %v743_v40, %v989_v32  ;;  %v4636_v28 = vunpack.c.h.bf16 %v4746_v4 }
  0x29   : > { %5333 = vmatpush3.bf16.msra.mxu1 %v5811_v21  ;;  %v4546_v36 = vpack.c.bf16 %v396_v20, %v396_v20  ;;  %991 = vst [vmem:[#allocation2 + $0x60] sm:$0xf] %v990_v51 }
  0x2a   : > { %5326 = vmatprep.subr.bf16.mxu1 %v5831_v26  ;;  %v347_v37 = vadd.f32 %v5842_v34, %v308_v22  ;;  %v397_v22 = vmax.f32 %v365_v10, 0.0 }
  0x2b   : > { %4782 = vmatpush3.bf16.msra.mxu0 %v5526_v23  ;;  %v309_v23 = vmul.f32 %v4596_v8, %v5837_v31  ;;  %v763_v47 = vshrl.u32 %v4546_v36, 16  ;;  %v766_v48 = vshll.u32 %v4546_v36, 16 }
  0x2c   : > { %5175 = vmatprep.subr.bf16.mxu0 %v5727_v3  ;;  %v379_v53 = vmax.f32 %v347_v37, 0.0 }
  0x2d   : > { %5334 = vmatpush3.bf16.msra.mxu1 %v5831_v26  ;;  %v765_v55 = vrot.slane %v763_v47, 7 }
  0x2e   : > { %4903 = vmatprep.subr.bf16.mxu1 %v5533_v45  ;;  %2227 = vmatmul.mubr.bf16.vlgmr.msra.gmra.mrb[0].mxu0 %v5530_v38  ;;  %v348_v38 = vadd.f32 %v5842_v34, %v309_v23  ;;  %v755_v45 = vshrl.u32 %v4545_v35, 16  ;;  %v4529_v60 = vpack.c.bf16 %v379_v53, %v379_v53  ;;  %v940_v23 = vld [vmem:[#allocation2 + $0xc] sm:$0xf] }
  0x2f   : > { %5176 = vmatpush3.bf16.msra.mxu0 %v5727_v3  ;;  %v749_v3 = vshll.u32 %v4544_v1, 16  ;;  %v768_v1 = vor.u32 %v766_v48, %v765_v55  ;;  %v770_v2 = vrot.slane %v765_v55, 4  ;;  %v518_v48 = vld [vmem:[#allocation2 + $0x8c] sm:$0x1] }
  0x30   : > { %5177 = vmatprep.subr.bf16.mxu0 %v5740_v6  ;;  %v757_v54 = vrot.slane %v755_v45, 7  ;;  %v380_v57 = vmax.f32 %v348_v38, 0.0  ;;  %v619_v7 = vshrl.u32 %v4529_v60, 16  ;;  %v622_v8 = vshll.u32 %v4529_v60, 16 }
  0x31   : > { %v751_v42 = vor.u32 %v749_v3, %v748_v27  ;;  %v1001_v16 = vsel %vm5847_vm2, %v770_v2, %v1000_v59  ;;  %v4737_v3 = vld [vmem:[%s5821_s21 + $0x8] sm:$0xff]   ;;  %v519_v10 = vsel %vm5858_vm5, 0, %v518_v48 }
  0x32   : > { %v760_v63 = vor.u32 %v758_v46, %v757_v54  ;;  %v761_v0 = vrot.slane %v757_v54, 4  ;;  %v4530_v5 = vpack.c.bf16 %v380_v57, %v380_v57  ;;  %1002 = vst [vmem:[#allocation2 + $0x74] sm:$0x1] %v1001_v16  ;;  %v621_v19 = vrot.slane %v619_v7, 7  ;;  %v5537_v16 = vld [vmem:[%s6884_s3 + $0x108] sm:$0xff]  }
  0x33   : > { %5178 = vmatpush3.bf16.msra.mxu0 %v5740_v6  ;;  %v753_v6 = vrot.slane %v748_v27, 4  ;;  %v752_v50 = vsel %vm5893_vm8, %v744_v41, %v751_v42  ;;  %v4635_v27 = vunpack.c.l.bf16 %v4746_v4  ;;  %v4599_v35 = vunpack.c.l.bf16 %v4737_v3  ;;  %520 = vst [vmem:[#allocation2 + $0x8c] sm:$0x1] %v519_v10 }
  0x34   : > { %5179 = vmatprep.subr.bf16.mxu0 %v5752_v9  ;;  %992 = vst [vmem:[#allocation2 + $0x64] sm:$0xf] %v752_v50  ;;  %v769_v13 = vsel %vm5893_vm8, %v761_v0, %v768_v1  ;;  %v997_v15 = vsel %vm5900_vm9, %v760_v63, %v996_v56  ;;  %v627_v20 = vshrl.u32 %v4530_v5, 16  ;;  %v624_v32 = vor.u32 %v622_v8, %v621_v19 }
  0x35   : > { %v994_v52 = vsel %vm5847_vm2, %v753_v6, %v993_v33  ;;  %998 = vst [vmem:[#allocation2 + $0x6c] sm:$0xf] %v997_v15  ;;  %999 = vst [vmem:[#allocation2 + $0x70] sm:$0xf] %v769_v13  ;;  %v4547_v33 = vpack.c.bf16 %v397_v22, %v397_v22  ;;  %v4600_v36 = vunpack.c.h.bf16 %v4737_v3  ;;  %v625_v40 = vrot.slane %v621_v19, 4 }
  0x36   : > { %995 = vst [vmem:[#allocation2 + $0x68] sm:$0x1] %v994_v52  ;;  %v4548_v41 = vpack.c.bf16 %v398_v25, %v398_v25  ;;  %v328_v42 = vmul.f32 %v4635_v27, %v5837_v31  ;;  %v329_v6 = vmul.f32 %v4636_v28, %v5837_v31  ;;  %v941_v45 = vsel %vm5900_vm9, %v624_v32, %v940_v23  ;;  %v1007_v3 = vld [vmem:[#allocation2 + $0x80] sm:$0x1] }
  0x37   : > { %5180 = vmatpush3.bf16.msra.mxu0 %v5752_v9  ;;  %v466_v9 = vsel %vm5847_vm2, 0, %v465_v43  ;;  %v629_v43 = vrot.slane %v627_v20, 7  ;;  %v772_v46 = vshrl.u32 %v4547_v33, 16  ;;  %v775_v47 = vshll.u32 %v4547_v33, 16  ;;  %942 = vst [vmem:[#allocation2 + $0xc] sm:$0xf] %v941_v45 }
  0x38   : > { %5181 = vmatprep.subr.bf16.mxu0 %v5765_v12  ;;  %467 = vst [vmem:[#allocation2 + $0x78] sm:$0x1] %v466_v9  ;;  %v780_v51 = vshrl.u32 %v4548_v41, 16  ;;  %v783_v52 = vshll.u32 %v4548_v41, 16  ;;  %v367_v57 = vadd.f32 %v5842_v34, %v328_v42  ;;  %v368_v59 = vadd.f32 %v5842_v34, %v329_v6  ;;  %v441_v9 = vld [vmem:[#allocation2 + $0x18] sm:$0x1] }
  0x39   : > { %v634_v54 = vrot.slane %v629_v43, 4  ;;  %v774_v55 = vrot.slane %v772_v46, 7  ;;  %v310_v60 = vmul.f32 %v4599_v35, %v5837_v31  ;;  %v311_v61 = vmul.f32 %v4600_v36, %v5837_v31  ;;  %v5535_v63 = vld [vmem:[#allocation2 + $0x74] ss:$0 sps:$4 sm:$0x11]   ;;  %v4747_v20 = vld [vmem:[%s5821_s21 + $0x58] sm:$0xff]  }
  0x3a   : > { %v399_v7 = vmax.f32 %v367_v57, 0.0  ;;  %v400_v8 = vmax.f32 %v368_v59, 0.0  ;;  %v1892_v15 = vrot.slane %v5535_v63, 1  ;;  %v5969_v27 = vld [vmem:[%s5821_s21 + $0x60] sm:$0xff]   ;;  %v442_v33 = vsel %vm5847_vm2, 0, %v441_v9  ;;  %v5544_v45 = vld [vmem:[%s6884_s3 + $0x110] sm:$0xff]  }
  0x3b   : > { %5182 = vmatpush3.bf16.msra.mxu0 %v5765_v12  ;;  %v630_v12 = vshll.u32 %v4530_v5, 16  ;;  %v5531_v37 = vld [vmem:[#allocation2 + $0x60] sm:$0xfe]   ;;  %v777_v2 = vor.u32 %v775_v47, %v774_v55  ;;  %v778_v4 = vrot.slane %v774_v55, 4  ;;  %v782_v5 = vrot.slane %v780_v51, 7  ;;  %v5547_v63 = vld [vmem:[%s6884_s3 + $0xd0] sm:$0xff]  }
  0x3c   : > { %5183 = vmatprep.subr.bf16.mxu0 %v5777_v14  ;;  %v1888_v49 = vrot.slane %v5531_v37, 1  ;;  %v5534_v62 = vld [vmem:[#allocation2 + $0x6c] sm:$0xfe]   ;;  %v349_v19 = vadd.f32 %v5842_v34, %v310_v60  ;;  %v4549_v23 = vpack.c.bf16 %v399_v7, %v399_v7  ;;  %v4550_v25 = vpack.c.bf16 %v400_v8, %v400_v8  ;;  %443 = vst [vmem:[#allocation2 + $0x18] sm:$0x1] %v442_v33 }
  0x3d   : > { %v5532_v38 = vld [vmem:[#allocation2 + $0x68] ss:$0 sps:$4 sm:$0x11]   ;;  %v632_v53 = vor.u32 %v630_v12, %v629_v43  ;;  %v1891_v13 = vrot.slane %v5534_v62, 1  ;;  %v785_v12 = vor.u32 %v783_v52, %v782_v5  ;;  %v787_v22 = vrot.slane %v782_v5, 4  ;;  %v5989_v43 = vld [vmem:[%s5821_s21 + $0x10] sm:$0xff]  }
  0x3e   : > { %v1889_v50 = vrot.slane %v5532_v38, 1  ;;  %v350_v29 = vadd.f32 %v5842_v34, %v311_v61  ;;  %v381_v32 = vmax.f32 %v349_v19, 0.0  ;;  %v789_v36 = vshrl.u32 %v4549_v23, 16  ;;  %v5540_v38 = vld [vmem:[%s6884_s3 + $0xc8] sm:$0xff]   ;;  %v1010_v47 = vld [vmem:[#allocation2 + $0x84] sm:$0xf] }
  0x3f   : > { %5184 = vmatpush3.bf16.msra.mxu0 %v5777_v14  ;;  %v944_v14 = vld [vmem:[#allocation2 + $0x14] sm:$0x1]  ;;  %v1003_v56 = vld [vmem:[#allocation2 + $0x78] sm:$0xf]  ;;  %v633_v0 = vsel %vm5893_vm8, %v625_v40, %v632_v53  ;;  %v5973_v28 = vsel %vm1863_vm10, %v1891_v13, %v1892_v15  ;;  %v1008_v35 = vsel %vm5847_vm2, %v787_v22, %v1007_v3  ;;  %v792_v37 = vshll.u32 %v4549_v23, 16 }
  0x40   : > { %5185 = vmatprep.subr.bf16.mxu0 %v5794_v17  ;;  %v5944_v58 = vsel %vm1863_vm10, %v1888_v49, %v1889_v50  ;;  %v945_v1 = vsel %vm5847_vm2, %v634_v54, %v944_v14  ;;  %943 = vst [vmem:[#allocation2 + $0x10] sm:$0xf] %v633_v0  ;;  %v1004_v18 = vsel %vm5900_vm9, %v777_v2, %v1003_v56  ;;  %1009 = vst [vmem:[#allocation2 + $0x80] sm:$0x1] %v1008_v35  ;;  %v1014_v2 = vld [vmem:[#allocation2 + $0x8c] sm:$0x1] }
  0x41   : > { %5207 = vmatprep.mubr.bf16.mxu1 %v5944_v58  ;;  %946 = vst [vmem:[#allocation2 + $0x14] sm:$0x1] %v945_v1  ;;  %1005 = vst [vmem:[#allocation2 + $0x78] sm:$0xf] %v1004_v18  ;;  %v797_v40 = vshrl.u32 %v4550_v25, 16  ;;  %v800_v41 = vshll.u32 %v4550_v25, 16  ;;  %v4531_v48 = vpack.c.bf16 %v381_v32, %v381_v32  ;;  %v4639_v49 = vunpack.c.l.bf16 %v4747_v20 }
  0x42   : > { %5208 = vmatmul.mubr.bf16.vlgmr.msra.gmra.mrb[0].mxu1 %v5973_v28  ;;  %v382_v42 = vmax.f32 %v350_v29, 0.0  ;;  %v492_v6 = vsel %vm5858_vm5, 0, %v491_v11  ;;  %v791_v46 = vrot.slane %v789_v36, 7  ;;  %v4640_v50 = vunpack.c.h.bf16 %v4747_v20  ;;  %v471_v18 = vld [vmem:[#allocation2 + $0x90] sm:$0x1] }
  0x43   : > { %5186 = vmatpush3.bf16.msra.mxu0 %v5794_v17  ;;  %v5536_v17 = vld [vmem:[%s6884_s3 + $0xc0] sm:$0xff]   ;;  %493 = vst [vmem:[#allocation2 + $0x20] sm:$0x1] %v492_v6  ;;  %v799_v51 = vrot.slane %v797_v40, 7  ;;  %v4643_v53 = vunpack.c.l.bf16 %v5969_v27  ;;  %v4644_v54 = vunpack.c.h.bf16 %v5969_v27  ;;  %v330_v56 = vmul.f32 %v4639_v49, %v5837_v31  ;;  %v947_v15 = vld [vmem:[#allocation2 + $0x18] sm:$0xf] }
  0x44   : > { %5187 = vmatprep.subr.bf16.mxu0 %v5811_v21  ;;  %4904 = vmatpush3.bf16.msra.mxu1 %v5536_v17  ;;  %v4532_v52 = vpack.c.bf16 %v382_v42, %v382_v42  ;;  %v331_v57 = vmul.f32 %v4640_v50, %v5837_v31  ;;  %v4603_v59 = vunpack.c.l.bf16 %v5989_v43  ;;  %v795_v9 = vrot.slane %v791_v46, 4  ;;  %v521_v22 = vld [vmem:[#allocation2 + $0x98] sm:$0x1]  ;;  %v474_v35 = vld [vmem:[#allocation2 + $0x9c] sm:$0x1]  ;;  %v5555_v42 = vld [vmem:[%s6884_s3 + $0x120] sm:$0xff]  }
  0x45   : > { %4905 = vmatprep.subr.bf16.mxu1 %v5537_v16  ;;  %v802_v62 = vor.u32 %v800_v41, %v799_v51  ;;  %v804_v0 = vrot.slane %v799_v51, 4  ;;  %v636_v5 = vshrl.u32 %v4531_v48, 16  ;;  %v639_v11 = vshll.u32 %v4531_v48, 16  ;;  %v5551_v16 = vld [vmem:[%s6884_s3 + $0xd8] sm:$0xff]   ;;  %v5558_v51 = vld [vmem:[%s6884_s3 + $0xe0] sm:$0xff]  }
  0x46   : > { %v644_v13 = vshrl.u32 %v4532_v52, 16  ;;  %v370_v33 = vadd.f32 %v5842_v34, %v331_v57  ;;  %v6043_v57 = vld [vmem:[%s5821_s21 + $0x68] sm:$0xff]  }
  0x47   : > { %5188 = vmatpush3.bf16.msra.mxu0 %v5811_v21  ;;  %v786_v21 = vsel %vm5893_vm8, %v778_v4, %v785_v12  ;;  %v5538_v14 = vld [vmem:[#allocation2 + $0xc] sm:$0xff]   ;;  %v5548_v4 = vld [vmem:[%s6884_s3 + $0x118] sm:$0xff]   ;;  %v803_v10 = vsel %vm5893_vm8, %v795_v9, %v802_v62  ;;  %v1015_v19 = vsel %vm5847_vm2, %v804_v0, %v1014_v2  ;;  %v638_v20 = vrot.slane %v636_v5, 7  ;;  %v5543_v29 = vld [vmem:[#allocation2 + $0x80] ss:$0 sps:$4 sm:$0x11]  }
  0x48   : > { %5189 = vmatprep.subr.bf16.mxu0 %v5831_v26  ;;  %1006 = vst [vmem:[#allocation2 + $0x7c] sm:$0xf] %v786_v21  ;;  %v5539_v55 = vld [vmem:[#allocation2 + $0x14] ss:$0 sps:$4 sm:$0x11]   ;;  %v1426_v60 = vshrl.u32 %v5538_v14, 16  ;;  %4906 = vmatpush3.bf16.msra.mxu1 %v5540_v38  ;;  %v369_v12 = vadd.f32 %v5842_v34, %v330_v56  ;;  %v332_v21 = vmul.f32 %v4643_v53, %v5837_v31 }
  0x49   : > { %v1428_v61 = vshll.u32 %v5538_v14, 16  ;;  %v1433_v17 = vshll.u32 %v5539_v55, 16  ;;  %4907 = vmatprep.subr.bf16.mxu1 %v5544_v45  ;;  %v6008_v8 = vld [vmem:[#allocation2 + $0xc] sm:$0xff]   ;;  %1013 = vst [vmem:[#allocation2 + $0x88] sm:$0xf] %v803_v10  ;;  %v646_v32 = vrot.slane %v644_v13, 7  ;;  %v641_v36 = vor.u32 %v639_v11, %v638_v20 }
  0x4a   : > { %1016 = vst [vmem:[#allocation2 + $0x8c] sm:$0x1] %v1015_v19  ;;  %v647_v38 = vshll.u32 %v4532_v52, 16  ;;  %v951_v40 = vld [vmem:[#allocation2 + $0x20] sm:$0x1]  ;;  %v401_v41 = vmax.f32 %v369_v12, 0.0  ;;  %v333_v9 = vmul.f32 %v4644_v54, %v5837_v31  ;;  %v371_v2 = vadd.f32 %v5842_v34, %v332_v21 }
  0x4b   : > { %5190 = vmatpush3.bf16.msra.mxu0 %v5831_v26  ;;  %v794_v26 = vor.u32 %v792_v37, %v791_v46  ;;  %v1430_v7 = vrot.slane %v1428_v61, 1  ;;  %v1435_v3 = vrot.slane %v1433_v17, 1  ;;  %v642_v37 = vrot.slane %v638_v20, 4  ;;  %v524_v56 = vld [vmem:[#allocation2 + $0xa4] sm:$0x1] }
  0x4c   : > { %4908 = vmatpush3.bf16.msra.mxu1 %v5547_v63  ;;  %v1895_v46 = vrot.slane %v5543_v29, 1  ;;  %v649_v48 = vor.u32 %v647_v38, %v646_v32  ;;  %v948_v49 = vsel %vm5900_vm9, %v641_v36, %v947_v15  ;;  %v402_v50 = vmax.f32 %v370_v33, 0.0  ;;  %v5559_v63 = vld [vmem:[%s6884_s3 + $0x128] sm:$0xff]   ;;  %v6073_v29 = vld [vmem:[%s5821_s21 + $0x70] sm:$0xff]  }
  0x4d   : > { %v1011_v1 = vsel %vm5900_vm9, %v794_v26, %v1010_v47  ;;  %v1431_v23 = vor.u32 %v1430_v7, %v1426_v60  ;;  %4909 = vmatprep.subr.bf16.mxu1 %v5548_v4  ;;  %v651_v47 = vrot.slane %v646_v32, 4  ;;  %v472_v14 = vsel %vm5847_vm2, 0, %v471_v18  ;;  %949 = vst [vmem:[#allocation2 + $0x18] sm:$0xf] %v948_v49  ;;  %v5569_v36 = vld [vmem:[%s6884_s3 + $0xf0] sm:$0xff]  }
  0x4e   : > { %1012 = vst [vmem:[#allocation2 + $0x84] sm:$0xf] %v1011_v1  ;;  %473 = vst [vmem:[#allocation2 + $0x90] sm:$0x1] %v472_v14  ;;  %v522_v55 = vsel %vm5858_vm5, 0, %v521_v22  ;;  %v4551_v26 = vpack.c.bf16 %v401_v41, %v401_v41  ;;  %v650_v60 = vsel %vm5893_vm8, %v642_v37, %v649_v48  ;;  %v4552_v61 = vpack.c.bf16 %v402_v50, %v402_v50  ;;  %v6082_v37 = vld [vmem:[%s5821_s21 + $0x18] sm:$0xff]  }
  0x4f   : > { %v5542_v25 = vld [vmem:[#allocation2 + $0x78] sm:$0xfe]   ;;  %v6024_v6 = vsel %vm1412_vm4, %v1431_v23, %v1435_v3  ;;  %v952_v53 = vsel %vm5847_vm2, %v651_v47, %v951_v40  ;;  %523 = vst [vmem:[#allocation2 + $0x98] sm:$0x1] %v522_v55  ;;  %v475_v62 = vsel %vm5847_vm2, 0, %v474_v35  ;;  %v4604_v4 = vunpack.c.h.bf16 %v5989_v43  ;;  %v5562_v43 = vld [vmem:[%s6884_s3 + $0xe8] sm:$0xff]  }
  0x50   : > { %v1894_v45 = vrot.slane %v5542_v25, 1  ;;  %2234 = vmatprep.mubr.bf16.mxu0 %v6024_v6  ;;  %4910 = vmatpush3.bf16.msra.mxu1 %v5551_v16  ;;  %953 = vst [vmem:[#allocation2 + $0x20] sm:$0x1] %v952_v53  ;;  %950 = vst [vmem:[#allocation2 + $0x1c] sm:$0xf] %v650_v60  ;;  %v806_v0 = vshrl.u32 %v4551_v26, 16  ;;  %v372_v27 = vadd.f32 %v5842_v34, %v333_v9  ;;  %v4647_v10 = vunpack.c.l.bf16 %v6043_v57 }
  0x51   : > { %2235 = vmatmul.mubr.bf16.gmra.mrb[4].mxu0 %v6008_v8  ;;  %4911 = vmatprep.subr.bf16.mxu1 %v5555_v42  ;;  %v809_v1 = vshll.u32 %v4551_v26, 16  ;;  %476 = vst [vmem:[#allocation2 + $0x9c] sm:$0x1] %v475_v62  ;;  %v5546_v5 = vld [vmem:[#allocation2 + $0x8c] ss:$0 sps:$4 sm:$0x11]   ;;  %v312_v54 = vmul.f32 %v4603_v59, %v5837_v31  ;;  %v313_v25 = vmul.f32 %v4604_v4, %v5837_v31 }
  0x52   : > { %v6036_v52 = vsel %vm1863_vm10, %v1894_v45, %v1895_v46  ;;  %v814_v7 = vshrl.u32 %v4552_v61, 16  ;;  %v808_v13 = vrot.slane %v806_v0, 7  ;;  %v817_v15 = vshll.u32 %v4552_v61, 16  ;;  %v5566_v59 = vld [vmem:[%s6884_s3 + $0x130] sm:$0xff]   ;;  %v444_v45 = vld [vmem:[#allocation2 + $0x24] sm:$0x1] }
  0x53   : > { %5211 = vmatprep.mubr.bf16.mxu1 %v6036_v52  ;;  %v403_v16 = vmax.f32 %v371_v2, 0.0  ;;  %v1898_v18 = vrot.slane %v5546_v5, 1  ;;  %v404_v19 = vmax.f32 %v372_v27, 0.0  ;;  %v525_v20 = vsel %vm5858_vm5, 0, %v524_v56  ;;  %v494_v50 = vld [vmem:[#allocation2 + $0x2c] sm:$0x1] }
  0x54   : > { %4912 = vmatpush3.bf16.msra.mxu1 %v5558_v51  ;;  %v816_v3 = vrot.slane %v814_v7, 7  ;;  %v811_v12 = vor.u32 %v809_v1, %v808_v13  ;;  %v812_v22 = vrot.slane %v808_v13, 4  ;;  %526 = vst [vmem:[#allocation2 + $0xa4] sm:$0x1] %v525_v20  ;;  %v351_v41 = vadd.f32 %v5842_v34, %v312_v54  ;;  %v5570_v60 = vld [vmem:[%s6884_s3 + $0x138] sm:$0xff]  }
  0x55   : > { %v5545_v17 = vld [vmem:[#allocation2 + $0x84] sm:$0xfe]   ;;  %4913 = vmatprep.subr.bf16.mxu1 %v5559_v63  ;;  %v4553_v23 = vpack.c.bf16 %v403_v16, %v403_v16  ;;  %v4554_v35 = vpack.c.bf16 %v404_v19, %v404_v19  ;;  %v352_v42 = vadd.f32 %v5842_v34, %v313_v25  ;;  %v4648_v46 = vunpack.c.h.bf16 %v6043_v57  ;;  %v1017_v55 = vld [vmem:[#allocation2 + $0x90] sm:$0xf]  ;;  %v5573_v0 = vld [vmem:[%s6884_s3 + $0xf8] sm:$0xff]  }
  0x56   : > { %v1897_v11 = vrot.slane %v5545_v17, 1  ;;  %v819_v33 = vor.u32 %v817_v15, %v816_v3  ;;  %v821_v21 = vrot.slane %v816_v3, 4  ;;  %v334_v14 = vmul.f32 %v4647_v10, %v5837_v31  ;;  %v1021_v26 = vld [vmem:[#allocation2 + $0x98] sm:$0x1]  ;;  %v6114_v19 = vld [vmem:[%s6884_s3 + $0x140] sm:$0xff]  }
  0x57   : > { %v5550_v38 = vld [vmem:[#allocation2 + $0x20] ss:$0 sps:$4 sm:$0x11]   ;;  %v823_v40 = vshrl.u32 %v4553_v23, 16  ;;  %v5549_v47 = vld [vmem:[#allocation2 + $0x18] sm:$0xff]   ;;  %v826_v49 = vshll.u32 %v4553_v23, 16  ;;  %v4651_v51 = vunpack.c.l.bf16 %v6073_v29  ;;  %v335_v56 = vmul.f32 %v4648_v46, %v5837_v31 }
  0x58   : > { %v6076_v32 = vsel %vm1863_vm10, %v1897_v11, %v1898_v18  ;;  %v820_v48 = vsel %vm5893_vm8, %v812_v22, %v819_v33  ;;  %4914 = vmatpush3.bf16.msra.mxu1 %v5562_v43  ;;  %v1445_v53 = vshll.u32 %v5550_v38, 16  ;;  %v4652_v57 = vunpack.c.h.bf16 %v6073_v29  ;;  %v1024_v27 = vld [vmem:[#allocation2 + $0x9c] sm:$0xf]  ;;  %v5617_v30 = vld [vmem:[#allocation2 + $0x14] ss:$0 sps:$4 sm:$0x11]  }
  0x59   : > { %5212 = vmatmul.mubr.bf16.gmra.mrb[4].mxu1 %v6076_v32  ;;  %1020 = vst [vmem:[#allocation2 + $0x94] sm:$0xf] %v820_v48  ;;  %4915 = vmatprep.subr.bf16.mxu1 %v5566_v59  ;;  %v4607_v61 = vunpack.c.l.bf16 %v6082_v37  ;;  %v1438_v9 = vshrl.u32 %v5549_v47, 16  ;;  %v1440_v62 = vshll.u32 %v5549_v47, 16  ;;  %v1018_v63 = vsel %vm5900_vm9, %v811_v12, %v1017_v55  ;;  %v6107_v13 = vld [vmem:[#allocation2 + $0x18] sm:$0xff]  }
  0x5a   : > { %v1022_v17 = vsel %vm5847_vm2, %v821_v21, %v1021_v26  ;;  %v1447_v1 = vrot.slane %v1445_v53, 1  ;;  %1019 = vst [vmem:[#allocation2 + $0x90] sm:$0xf] %v1018_v63  ;;  %v825_v2 = vrot.slane %v823_v40, 7  ;;  %v831_v4 = vshrl.u32 %v4554_v35, 16 }
  0x5b   : > { %1023 = vst [vmem:[#allocation2 + $0x98] sm:$0x1] %v1022_v17  ;;  %v834_v5 = vshll.u32 %v4554_v35, 16  ;;  %v1442_v7 = vrot.slane %v1440_v62, 1  ;;  %v383_v54 = vmax.f32 %v351_v41, 0.0  ;;  %v384_v10 = vmax.f32 %v352_v42, 0.0 }
  0x5c   : > { %v445_v11 = vsel %vm5847_vm2, 0, %v444_v45  ;;  %4916 = vmatpush3.bf16.msra.mxu1 %v5569_v36  ;;  %v828_v15 = vor.u32 %v826_v49, %v825_v2  ;;  %v829_v16 = vrot.slane %v825_v2, 4  ;;  %v833_v18 = vrot.slane %v831_v4, 7  ;;  %v1028_v43 = vld [vmem:[#allocation2 + $0xa4] sm:$0x1] }
  0x5d   : > { %446 = vst [vmem:[#allocation2 + $0x24] sm:$0x1] %v445_v11  ;;  %v495_v3 = vsel %vm5858_vm5, 0, %v494_v50  ;;  %4917 = vmatprep.subr.bf16.mxu1 %v5570_v60  ;;  %v1443_v20 = vor.u32 %v1442_v7, %v1438_v9  ;;  %v4533_v59 = vpack.c.bf16 %v383_v54, %v383_v54  ;;  %v4534_v12 = vpack.c.bf16 %v384_v10, %v384_v10  ;;  %v477_v47 = vld [vmem:[#allocation2 + $0xa8] sm:$0x1]  ;;  %v4740_v54 = vld [vmem:[%s5821_s21 + $0x20] sm:$0xff]  }
  0x5e   : > { %496 = vst [vmem:[#allocation2 + $0x2c] sm:$0x1] %v495_v3  ;;  %v373_v22 = vadd.f32 %v5842_v34, %v334_v14  ;;  %v836_v23 = vor.u32 %v834_v5, %v833_v18  ;;  %v838_v25 = vrot.slane %v833_v18, 4  ;;  %v1025_v33 = vsel %vm5900_vm9, %v828_v15, %v1024_v27  ;;  %v527_v48 = vld [vmem:[#allocation2 + $0xb0] sm:$0x1] }
  0x5f   : > { %v374_v21 = vadd.f32 %v5842_v34, %v335_v56  ;;  %v6121_v35 = vsel %vm1412_vm4, %v1443_v20, %v1447_v1  ;;  %1026 = vst [vmem:[#allocation2 + $0x9c] sm:$0xf] %v1025_v33  ;;  %v653_v36 = vshrl.u32 %v4533_v59, 16  ;;  %v656_v38 = vshll.u32 %v4533_v59, 16  ;;  %v480_v27 = vld [vmem:[#allocation2 + $0xb4] sm:$0x1] }
  0x60   : > { %v661_v40 = vshrl.u32 %v4534_v12, 16  ;;  %4918 = vmatpush3.bf16.msra.mxu1 %v5573_v0  ;;  %2242 = vmatprep.mubr.bf16.mxu0 %v6121_v35  ;;  %v837_v41 = vsel %vm5893_vm8, %v829_v16, %v836_v23  ;;  %v1029_v42 = vsel %vm5847_vm2, %v838_v25, %v1028_v43  ;;  %v664_v45 = vshll.u32 %v4534_v12, 16  ;;  %v6152_v15 = vld [vmem:[%s6883_s2] ss:$0 sm:$0xff]  ;;  %v530_v59 = vld [vmem:[#allocation2 + $0xbc] sm:$0x1] }
  0x61   : > { %v405_v46 = vmax.f32 %v373_v22, 0.0  ;;  %5223 = vmatprep.subr.bf16.mxu1 %v6114_v19  ;;  %2243 = vmatmul.mubr.bf16.gmra.mrb[8].mxu0 %v6107_v13  ;;  %v5553_v49 = vld [vmem:[#allocation2 + $0x90] sm:$0xfe]   ;;  %1027 = vst [vmem:[#allocation2 + $0xa0] sm:$0xf] %v837_v41  ;;  %v336_v50 = vmul.f32 %v4651_v51, %v5837_v31  ;;  %v337_v14 = vmul.f32 %v4652_v57, %v5837_v31  ;;  %v4608_v53 = vunpack.c.h.bf16 %v6082_v37 }
  0x62   : > { %1030 = vst [vmem:[#allocation2 + $0xa4] sm:$0x1] %v1029_v42  ;;  %v314_v55 = vmul.f32 %v4607_v61, %v5837_v31  ;;  %v5554_v26 = vld [vmem:[#allocation2 + $0x98] ss:$0 sps:$4 sm:$0x11]   ;;  %v655_v56 = vrot.slane %v653_v36, 7  ;;  %v4611_v33 = vunpack.c.l.bf16 %v4740_v54 }
  0x63   : > { %v663_v60 = vrot.slane %v661_v40, 7  ;;  %v406_v9 = vmax.f32 %v374_v21, 0.0  ;;  %v4555_v62 = vpack.c.bf16 %v405_v46, %v405_v46  ;;  %v1900_v63 = vrot.slane %v5553_v49, 1  ;;  %v6161_v22 = vld [vmem:[%s6882_s1] ss:$0 sm:$0xff]  ;;  %v4741_v49 = vld [vmem:[%s5821_s21 + $0x28] sm:$0xff]  }
  0x64   : > { %v954_v17 = vld [vmem:[#allocation2 + $0x24] sm:$0xf]  ;;  %v478_v0 = vsel %vm5847_vm2, 0, %v477_v47  ;;  %v528_v29 = vsel %vm5858_vm5, 0, %v527_v48  ;;  %v375_v51 = vadd.f32 %v5842_v34, %v336_v50  ;;  %v1901_v57 = vrot.slane %v5554_v26, 1 }
  0x65   : > { %v658_v37 = vor.u32 %v656_v38, %v655_v56  ;;  %v659_v1 = vrot.slane %v655_v56, 4  ;;  %v666_v31 = vor.u32 %v664_v45, %v663_v60  ;;  %v958_v61 = vld [vmem:[#allocation2 + $0x2c] sm:$0x1]  ;;  %479 = vst [vmem:[#allocation2 + $0xa8] sm:$0x1] %v478_v0  ;;  %v668_v2 = vrot.slane %v663_v60, 4 }
  0x66   : > { %529 = vst [vmem:[#allocation2 + $0xb0] sm:$0x1] %v528_v29  ;;  %v4556_v4 = vpack.c.bf16 %v406_v9, %v406_v9  ;;  %v840_v5 = vshrl.u32 %v4555_v62, 16  ;;  %v843_v7 = vshll.u32 %v4555_v62, 16  ;;  %v6143_v10 = vsel %vm1863_vm10, %v1900_v63, %v1901_v57 }
  0x67   : > { %v667_v11 = vsel %vm5893_vm8, %v659_v1, %v666_v31  ;;  %v955_v34 = vsel %vm5900_vm9, %v658_v37, %v954_v17  ;;  %v376_v16 = vadd.f32 %v6152_v15, %v337_v14  ;;  %5215 = vmatprep.mubr.bf16.mxu1 %v6143_v10  ;;  %v959_v18 = vsel %vm5847_vm2, %v668_v2, %v958_v61  ;;  %v6174_v17 = vld [vmem:[%s5821_s21 + $0x30] sm:$0xff]  }
  0x68   : > { %956 = vst [vmem:[#allocation2 + $0x24] sm:$0xf] %v955_v34  ;;  %957 = vst [vmem:[#allocation2 + $0x28] sm:$0xf] %v667_v11  ;;  %v842_v3 = vrot.slane %v840_v5, 7  ;;  %v848_v20 = vshrl.u32 %v4556_v4, 16  ;;  %v315_v23 = vmul.f32 %v6161_v22, %v4608_v53  ;;  %v353_v25 = vadd.f32 %v6152_v15, %v314_v55 }
  0x69   : > { %v851_v43 = vshll.u32 %v4556_v4, 16  ;;  %v5556_v12 = vld [vmem:[#allocation2 + $0x9c] sm:$0xfe]   ;;  %960 = vst [vmem:[#allocation2 + $0x2c] sm:$0x1] %v959_v18  ;;  %v4612_v21 = vunpack.c.h.bf16 %v4740_v54  ;;  %v407_v42 = vmax.f32 %v375_v51, 0.0  ;;  %v316_v61 = vmul.f32 %v6161_v22, %v4611_v33 }
  0x6a   : > { %v5557_v36 = vld [vmem:[#allocation2 + $0xa4] ss:$0 sps:$4 sm:$0x11]   ;;  %v845_v38 = vor.u32 %v843_v7, %v842_v3  ;;  %v846_v40 = vrot.slane %v842_v3, 4  ;;  %v850_v41 = vrot.slane %v848_v20, 7  ;;  %v1903_v45 = vrot.slane %v5556_v12, 1 }
  0x6b   : > { %v408_v46 = vmax.f32 %v376_v16, 0.0  ;;  %v481_v47 = vsel %vm5847_vm2, 0, %v480_v27  ;;  %v531_v48 = vsel %vm5858_vm5, 0, %v530_v59  ;;  %v1904_v50 = vrot.slane %v5557_v36, 1  ;;  %v447_v5 = vld [vmem:[#allocation2 + $0x30] sm:$0x1] }
  0x6c   : > { %v853_v14 = vor.u32 %v851_v43, %v850_v41  ;;  %v855_v53 = vrot.slane %v850_v41, 4  ;;  %v1031_v55 = vld [vmem:[#allocation2 + $0xa8] sm:$0xf]  ;;  %482 = vst [vmem:[#allocation2 + $0xb4] sm:$0x1] %v481_v47  ;;  %v4557_v56 = vpack.c.bf16 %v407_v42, %v407_v42  ;;  %v354_v62 = vadd.f32 %v6152_v15, %v315_v23 }
  0x6d   : > { %v1035_v26 = vld [vmem:[#allocation2 + $0xb0] sm:$0x1]  ;;  %532 = vst [vmem:[#allocation2 + $0xbc] sm:$0x1] %v531_v48  ;;  %v1032_v60 = vsel %vm5900_vm9, %v845_v38, %v1031_v55  ;;  %v4558_v9 = vpack.c.bf16 %v408_v46, %v408_v46  ;;  %v385_v63 = vmax.f32 %v353_v25, 0.0  ;;  %v6177_v0 = vsel %vm1863_vm10, %v1903_v45, %v1904_v50 }
  0x6e   : > { %v854_v29 = vsel %vm5893_vm8, %v846_v40, %v853_v14  ;;  %1033 = vst [vmem:[#allocation2 + $0xa8] sm:$0xf] %v1032_v60  ;;  %v1036_v51 = vsel %vm5847_vm2, %v855_v53, %v1035_v26  ;;  %v857_v57 = vshrl.u32 %v4557_v56, 16  ;;  %5216 = vmatmul.mubr.bf16.gmra.mrb[8].mxu1 %v6177_v0  ;;  %v860_v1 = vshll.u32 %v4557_v56, 16  ;;  %v497_v7 = vld [vmem:[#allocation2 + $0x38] sm:$0x1] }
  0x6f   : > { %v5560_v37 = vld [vmem:[#allocation2 + $0x24] sm:$0xff]   ;;  %1034 = vst [vmem:[#allocation2 + $0xac] sm:$0xf] %v854_v29  ;;  %1037 = vst [vmem:[#allocation2 + $0xb0] sm:$0x1] %v1036_v51  ;;  %v6184_v31 = vpack.c.bf16 %v385_v63, %v385_v63  ;;  %v317_v2 = vmul.f32 %v6161_v22, %v4612_v21  ;;  %v4615_v27 = vunpack.c.l.bf16 %v4741_v49  ;;  %v4616_v54 = vunpack.c.h.bf16 %v4741_v49 }
  0x70   : > { %v5561_v4 = vld [vmem:[#allocation2 + $0x2c] ss:$0 sps:$4 sm:$0x11]   ;;  %v4619_v11 = vunpack.c.l.bf16 %v6174_v17  ;;  %v4620_v34 = vunpack.c.h.bf16 %v6174_v17  ;;  %v1450_v16 = vshrl.u32 %v5560_v37, 16  ;;  %v1452_v18 = vshll.u32 %v5560_v37, 16  ;;  %v6196_v41 = vld [vmem:[#allocation2 + $0x24] sm:$0xff]  }
  0x71   : > { %v355_v3 = vadd.f32 %v6152_v15, %v316_v61  ;;  %v6192_v20 = vadd.f32 %v6152_v15, %v317_v2  ;;  %v1457_v43 = vshll.u32 %v5561_v4, 16  ;;  %v859_v59 = vrot.slane %v857_v57, 7  ;;  %v450_v53 = vld [vmem:[#allocation2 + $0x3c] sm:$0x1]  ;;  %v500_v55 = vld [vmem:[#allocation2 + $0x44] sm:$0x1] }
  0x72   : > { %v865_v12 = vshrl.u32 %v4558_v9, 16  ;;  %v868_v23 = vshll.u32 %v4558_v9, 16  ;;  %v1454_v25 = vrot.slane %v1452_v18, 1  ;;  %v386_v21 = vmax.f32 %v354_v62, 0.0 }
  0x73   : > { %v1038_v33 = vld [vmem:[#allocation2 + $0xb4] sm:$0xf]  ;;  %v318_v36 = vmul.f32 %v6161_v22, %v4615_v27  ;;  %v319_v38 = vmul.f32 %v6161_v22, %v4616_v54  ;;  %v1459_v40 = vrot.slane %v1457_v43, 1  ;;  %v862_v42 = vor.u32 %v860_v1, %v859_v59 }
  0x74   : > { %v863_v45 = vrot.slane %v859_v59, 4  ;;  %v867_v46 = vrot.slane %v865_v12, 7  ;;  %v1042_v47 = vld [vmem:[#allocation2 + $0xbc] sm:$0x1]  ;;  %v1455_v48 = vor.u32 %v1454_v25, %v1450_v16  ;;  %v448_v49 = vsel %vm5847_vm2, 0, %v447_v5 }
  0x75   : > { %v498_v50 = vsel %vm5858_vm5, 0, %v497_v7  ;;  %v4536_v14 = vpack.c.bf16 %v386_v21, %v386_v21  ;;  %v1039_v60 = vsel %vm5900_vm9, %v862_v42, %v1038_v33  ;;  %449 = vst [vmem:[#allocation2 + $0x30] sm:$0x1] %v448_v49  ;;  %v357_v9 = vadd.f32 %v6152_v15, %v318_v36  ;;  %v453_v59 = vld [vmem:[#allocation2 + $0x48] sm:$0x1] }
  0x76   : > { %v5564_v26 = vld [vmem:[#allocation2 + $0xa8] sm:$0xfe]   ;;  %v870_v56 = vor.u32 %v868_v23, %v867_v46  ;;  %499 = vst [vmem:[#allocation2 + $0x38] sm:$0x1] %v498_v50  ;;  %v6206_v62 = vadd.f32 %v6152_v15, %v319_v38  ;;  %v6209_v63 = vsel %vm1412_vm4, %v1455_v48, %v1459_v40  ;;  %v872_v51 = vrot.slane %v867_v46, 4 }
  0x77   : > { %v5565_v29 = vld [vmem:[#allocation2 + $0xb0] ss:$0 sps:$4 sm:$0x11]   ;;  %1040 = vst [vmem:[#allocation2 + $0xb4] sm:$0xf] %v1039_v60  ;;  %v670_v57 = vshrl.u32 %v6184_v31, 16  ;;  %2250 = vmatprep.mubr.bf16.mxu0 %v6209_v63  ;;  %v321_v48 = vmul.f32 %v6161_v22, %v4620_v34 }
  0x78   : > { %v673_v37 = vshll.u32 %v6184_v31, 16  ;;  %v1906_v1 = vrot.slane %v5564_v26, 1  ;;  %v871_v61 = vsel %vm5893_vm8, %v863_v45, %v870_v56  ;;  %v678_v2 = vshrl.u32 %v4536_v14, 16  ;;  %2251 = vmatmul.mubr.bf16.gmra.mrb[12].mxu0 %v6196_v41 }
  0x79   : > { %v681_v4 = vshll.u32 %v4536_v14, 16  ;;  %v1907_v5 = vrot.slane %v5565_v29, 1  ;;  %1041 = vst [vmem:[#allocation2 + $0xb8] sm:$0xf] %v871_v61  ;;  %v1043_v7 = vsel %vm5847_vm2, %v872_v51, %v1042_v47  ;;  %v672_v27 = vrot.slane %v670_v57, 7 }
  0x7a   : > { %v387_v54 = vmax.f32 %v355_v3, 0.0  ;;  %1044 = vst [vmem:[#allocation2 + $0xbc] sm:$0x1] %v1043_v7  ;;  %v680_v16 = vrot.slane %v678_v2, 7  ;;  %v388_v31 = vmax.f32 %v6192_v20, 0.0  ;;  %v451_v18 = vsel %vm5847_vm2, 0, %v450_v53 }
  0x7b   : > { %v501_v43 = vsel %vm5858_vm5, 0, %v500_v55  ;;  %v6225_v12 = vsel %vm1863_vm10, %v1906_v1, %v1907_v5  ;;  %v675_v23 = vor.u32 %v673_v37, %v672_v27  ;;  %v676_v25 = vrot.slane %v672_v27, 4  ;;  %452 = vst [vmem:[#allocation2 + $0x3c] sm:$0x1] %v451_v18  ;;  %v503_v3 = vld [vmem:[#allocation2 + $0x50] sm:$0x1] }
  0x7c   : > { %502 = vst [vmem:[#allocation2 + $0x44] sm:$0x1] %v501_v43  ;;  %v4537_v33 = vpack.c.bf16 %v387_v54, %v387_v54  ;;  %5219 = vmatprep.mubr.bf16.mxu1 %v6225_v12  ;;  %v683_v21 = vor.u32 %v681_v4, %v680_v16  ;;  %v685_v20 = vrot.slane %v680_v16, 4  ;;  %v4538_v36 = vpack.c.bf16 %v388_v31, %v388_v31  ;;  %v961_v40 = vld [vmem:[#allocation2 + $0x30] sm:$0xf] }
  0x7d   : > { %v389_v38 = vmax.f32 %v357_v9, 0.0  ;;  %v965_v42 = vld [vmem:[#allocation2 + $0x38] sm:$0x1]  ;;  %v320_v47 = vmul.f32 %v6161_v22, %v4619_v11  ;;  %v962_v50 = vsel %vm5900_vm9, %v675_v23, %v961_v40  ;;  %v390_v11 = vmax.f32 %v6206_v62, 0.0  ;;  %v456_v23 = vld [vmem:[#allocation2 + $0x54] sm:$0x1] }
  0x7e   : > { %v687_v45 = vshrl.u32 %v4537_v33, 16  ;;  %v690_v46 = vshll.u32 %v4537_v33, 16  ;;  %v684_v49 = vsel %vm5893_vm8, %v676_v25, %v683_v21  ;;  %v966_v14 = vsel %vm5847_vm2, %v685_v20, %v965_v42  ;;  %963 = vst [vmem:[#allocation2 + $0x30] sm:$0xf] %v962_v50  ;;  %v506_v25 = vld [vmem:[#allocation2 + $0x5c] sm:$0x1] }
  0x7f   : > { %v695_v53 = vshrl.u32 %v4538_v36, 16  ;;  %964 = vst [vmem:[#allocation2 + $0x34] sm:$0xf] %v684_v49  ;;  %967 = vst [vmem:[#allocation2 + $0x38] sm:$0x1] %v966_v14  ;;  %v698_v26 = vshll.u32 %v4538_v36, 16  ;;  %v4539_v9 = vpack.c.bf16 %v389_v38, %v389_v38  ;;  %v359_v29 = vadd.f32 %v6152_v15, %v320_v47 }
  0x80   : > { %v689_v55 = vrot.slane %v687_v45, 7  ;;  %v454_v17 = vsel %vm5847_vm2, 0, %v453_v59  ;;  %v5567_v34 = vld [vmem:[#allocation2 + $0xb4] sm:$0xfe]   ;;  %v504_v60 = vsel %vm5858_vm5, 0, %v503_v3  ;;  %v4540_v1 = vpack.c.bf16 %v390_v11, %v390_v11 }
  0x81   : > { %v697_v56 = vrot.slane %v695_v53, 7  ;;  %455 = vst [vmem:[#allocation2 + $0x48] sm:$0x1] %v454_v17  ;;  %v5568_v51 = vld [vmem:[#allocation2 + $0xbc] ss:$0 sps:$4 sm:$0x11]   ;;  %v360_v61 = vadd.f32 %v6152_v15, %v321_v48 }
  0x82   : > { %v692_v57 = vor.u32 %v690_v46, %v689_v55  ;;  %v693_v37 = vrot.slane %v689_v55, 4  ;;  %505 = vst [vmem:[#allocation2 + $0x50] sm:$0x1] %v504_v60  ;;  %v1909_v62 = vrot.slane %v5567_v34, 1  ;;  %v968_v5 = vld [vmem:[#allocation2 + $0x3c] sm:$0xf] }
  0x83   : > { %v700_v2 = vor.u32 %v698_v26, %v697_v56  ;;  %v702_v4 = vrot.slane %v697_v56, 4  ;;  %v972_v7 = vld [vmem:[#allocation2 + $0x44] sm:$0x1]  ;;  %v1910_v27 = vrot.slane %v5568_v51, 1  ;;  %v704_v16 = vshrl.u32 %v4539_v9, 16  ;;  %v5582_v17 = vld [vmem:[%s6884_s3 + $0x148] sm:$0xff]  }
  0x84   : > { %v969_v54 = vsel %vm5900_vm9, %v692_v57, %v968_v5  ;;  %v707_v31 = vshll.u32 %v4539_v9, 16  ;;  %v712_v59 = vshrl.u32 %v4540_v1, 16  ;;  %v715_v15 = vshll.u32 %v4540_v1, 16 }
  0x85   : > { %v701_v18 = vsel %vm5893_vm8, %v693_v37, %v700_v2  ;;  %970 = vst [vmem:[#allocation2 + $0x3c] sm:$0xf] %v969_v54  ;;  %v973_v43 = vsel %vm5847_vm2, %v702_v4, %v972_v7  ;;  %v6254_v33 = vsel %vm1863_vm10, %v1909_v62, %v1910_v27  ;;  %v706_v3 = vrot.slane %v704_v16, 7 }
  0x86   : > { %971 = vst [vmem:[#allocation2 + $0x40] sm:$0xf] %v701_v18  ;;  %974 = vst [vmem:[#allocation2 + $0x44] sm:$0x1] %v973_v43  ;;  %v391_v21 = vmax.f32 %v359_v29, 0.0  ;;  %v392_v20 = vmax.f32 %v360_v61, 0.0  ;;  %5220 = vmatmul.mubr.bf16.gmra.mrb[12].mxu1 %v6254_v33 }
  0x87   : > { %v5571_v36 = vld [vmem:[#allocation2 + $0x30] sm:$0xff]   ;;  %v5572_v38 = vld [vmem:[#allocation2 + $0x38] ss:$0 sps:$4 sm:$0x11]   ;;  %2854 = vmatprep.mubr.bf16.mxu1 %v6024_v6  ;;  %v709_v40 = vor.u32 %v707_v31, %v706_v3  ;;  %v710_v45 = vrot.slane %v706_v3, 4  ;;  %v714_v46 = vrot.slane %v712_v59, 7 }
  0x88   : > { %v4541_v42 = vpack.c.bf16 %v391_v21, %v391_v21  ;;  %v457_v47 = vsel %vm5847_vm2, 0, %v456_v23  ;;  %v1462_v48 = vshrl.u32 %v5571_v36, 16  ;;  %v1464_v49 = vshll.u32 %v5571_v36, 16  ;;  %v975_v14 = vld [vmem:[#allocation2 + $0x48] sm:$0xf]  ;;  %v6271_v61 = vld [vmem:[#allocation2 + $0x30] sm:$0xff]  }
  0x89   : > { %v1469_v50 = vshll.u32 %v5572_v38, 16  ;;  %458 = vst [vmem:[#allocation2 + $0x54] sm:$0x1] %v457_v47  ;;  %v507_v53 = vsel %vm5858_vm5, 0, %v506_v25  ;;  %v717_v55 = vor.u32 %v715_v15, %v714_v46  ;;  %v719_v26 = vrot.slane %v714_v46, 4  ;;  %v5596_v36 = vld [vmem:[%s6884_s3 + $0x158] sm:$0xff]  }
  0x8a   : > { %v976_v6 = vsel %vm5900_vm9, %v709_v40, %v975_v14  ;;  %v979_v11 = vld [vmem:[#allocation2 + $0x50] sm:$0x1]  ;;  %508 = vst [vmem:[#allocation2 + $0x5c] sm:$0x1] %v507_v53  ;;  %v721_v34 = vshrl.u32 %v4541_v42, 16  ;;  %v1466_v56 = vrot.slane %v1464_v49, 1  ;;  %v4542_v9 = vpack.c.bf16 %v392_v20, %v392_v20 }
  0x8b   : > { %v1471_v60 = vrot.slane %v1469_v50, 1  ;;  %977 = vst [vmem:[#allocation2 + $0x48] sm:$0xf] %v976_v6  ;;  %v718_v51 = vsel %vm5893_vm8, %v710_v45, %v717_v55  ;;  %v980_v57 = vsel %vm5847_vm2, %v719_v26, %v979_v11  ;;  %v724_v5 = vshll.u32 %v4541_v42, 16  ;;  %v5586_v14 = vld [vmem:[#allocation2 + $0x60] sm:$0xff]  }
  0x8c   : > { %v723_v37 = vrot.slane %v721_v34, 7  ;;  %v1467_v1 = vor.u32 %v1466_v56, %v1462_v48  ;;  %978 = vst [vmem:[#allocation2 + $0x4c] sm:$0xf] %v718_v51  ;;  %981 = vst [vmem:[#allocation2 + $0x50] sm:$0x1] %v980_v57  ;;  %v729_v54 = vshrl.u32 %v4542_v9, 16 }
  0x8d   : > { %v5576_v29 = vld [vmem:[#allocation2 + $0x3c] sm:$0xff]   ;;  %v5577_v62 = vld [vmem:[#allocation2 + $0x44] ss:$0 sps:$4 sm:$0x11]   ;;  %v732_v16 = vshll.u32 %v4542_v9, 16  ;;  %v1512_v11 = vshll.u32 %v5586_v14, 16 }
  0x8e   : > { %2855 = vmatmul.mubr.bf16.vlgmr.msra.gmra.mrb[16].mxu1 %v6008_v8  ;;  %v1474_v2 = vshrl.u32 %v5576_v29, 16  ;;  %v1476_v4 = vshll.u32 %v5576_v29, 16  ;;  %v6275_v7 = vsel %vm1412_vm4, %v1467_v1, %v1471_v60  ;;  %v1481_v27 = vshll.u32 %v5577_v62, 16  ;;  %v5589_v8 = vld [vmem:[%s6884_s3 + $0x150] sm:$0xff]   ;;  %v6293_v42 = vld [vmem:[#allocation2 + $0x3c] sm:$0xff]  }
  0x8f   : > { %5224 = vmatpush3.bf16.msra.mxu1 %v6114_v19  ;;  %2862 = vmatprep.mubr.bf16.mxu1 %v6121_v35  ;;  %v726_v18 = vor.u32 %v724_v5, %v723_v37  ;;  %v727_v15 = vrot.slane %v723_v37, 4  ;;  %v731_v19 = vrot.slane %v729_v54, 7  ;;  %v5603_v55 = vld [vmem:[%s6884_s3 + $0x160] sm:$0xff]   ;;  %v5587_v6 = vld [vmem:[#allocation2 + $0x68] ss:$0 sps:$4 sm:$0x11]  }
  0x90   : > { %2258 = vmatprep.mubr.bf16.mxu0 %v6275_v7  ;;  %v1478_v31 = vrot.slane %v1476_v4, 1  ;;  %5225 = vmatprep.subr.bf16.mxu1 %v5582_v17  ;;  %v982_v43 = vld [vmem:[#allocation2 + $0x54] sm:$0xf]  ;;  %v1483_v59 = vrot.slane %v1481_v27, 1  ;;  %v5590_v60 = vld [vmem:[#allocation2 + $0x6c] sm:$0xff]   ;;  %v1510_v29 = vshrl.u32 %v5586_v14, 16 }
  0x91   : > { %2259 = vmatmul.mubr.bf16.gmra.mrb[16].mxu0 %v6271_v61  ;;  %v983_v25 = vsel %vm5900_vm9, %v726_v18, %v982_v43  ;;  %v986_v3 = vld [vmem:[#allocation2 + $0x5c] sm:$0x1]  ;;  %v734_v21 = vor.u32 %v732_v16, %v731_v19  ;;  %v736_v20 = vrot.slane %v731_v19, 4  ;;  %v1514_v37 = vrot.slane %v1512_v11, 1  ;;  %v5610_v43 = vld [vmem:[%s6884_s3 + $0x168] sm:$0xff]   ;;  %v5600_v11 = vld [vmem:[#allocation2 + $0x90] sm:$0xff]  }
  0x92   : > { %v1479_v23 = vor.u32 %v1478_v31, %v1474_v2  ;;  %984 = vst [vmem:[#allocation2 + $0x54] sm:$0xf] %v983_v25  ;;  %v1517_v1 = vshll.u32 %v5587_v6, 16  ;;  %v5591_v4 = vld [vmem:[#allocation2 + $0x74] ss:$0 sps:$4 sm:$0x11]  }
  0x93   : > { %5226 = vmatpush3.bf16.msra.mxu1 %v5582_v17  ;;  %v5579_v40 = vld [vmem:[#allocation2 + $0x48] sm:$0xff]   ;;  %v5580_v45 = vld [vmem:[#allocation2 + $0x50] ss:$0 sps:$4 sm:$0x11]   ;;  %v735_v46 = vsel %vm5893_vm8, %v727_v15, %v734_v21  ;;  %v987_v47 = vsel %vm5847_vm2, %v736_v20, %v986_v3  ;;  %v1515_v54 = vor.u32 %v1514_v37, %v1510_v29  ;;  %v1524_v31 = vshll.u32 %v5590_v60, 16 }
  0x94   : > { %v6290_v38 = vsel %vm1412_vm4, %v1479_v23, %v1483_v59  ;;  %5227 = vmatprep.subr.bf16.mxu1 %v5589_v8  ;;  %v1486_v48 = vshrl.u32 %v5579_v40, 16  ;;  %v1488_v49 = vshll.u32 %v5579_v40, 16  ;;  %985 = vst [vmem:[#allocation2 + $0x58] sm:$0xf] %v735_v46  ;;  %988 = vst [vmem:[#allocation2 + $0x5c] sm:$0x1] %v987_v47 }
  0x95   : > { %2266 = vmatprep.mubr.bf16.mxu0 %v6290_v38  ;;  %v1493_v50 = vshll.u32 %v5580_v45, 16  ;;  %v6308_v34 = vld [vmem:[#allocation2 + $0x48] sm:$0xff]   ;;  %v1519_v16 = vrot.slane %v1517_v1, 1  ;;  %v5593_v59 = vld [vmem:[#allocation2 + $0x78] sm:$0xff]   ;;  %v1526_v19 = vrot.slane %v1524_v31, 1  ;;  %v1529_v23 = vshll.u32 %v5591_v4, 16 }
  0x96   : > { %2863 = vmatmul.mubr.bf16.gmra.mrb[20].mxu1 %v6107_v13  ;;  %v1490_v53 = vrot.slane %v1488_v49, 1  ;;  %v5594_v25 = vld [vmem:[#allocation2 + $0x80] ss:$0 sps:$4 sm:$0x11]   ;;  %v1536_v20 = vshll.u32 %v5593_v59, 16  ;;  %v5597_v45 = vld [vmem:[#allocation2 + $0x84] sm:$0xff]  }
  0x97   : > { %2870 = vmatprep.mubr.bf16.mxu1 %v6209_v63  ;;  %5228 = vmatpush3.bf16.msra.mxu1 %v5589_v8  ;;  %v1495_v26 = vrot.slane %v1493_v50, 1  ;;  %v1522_v8 = vshrl.u32 %v5590_v60, 16  ;;  %v6325_v15 = vsel %vm1412_vm4, %v1515_v54, %v1519_v16  ;;  %v1531_v21 = vrot.slane %v1529_v23, 1  ;;  %v6333_v40 = vld [vmem:[#allocation2 + $0x60] sm:$0xff]   ;;  %v5620_v47 = vld [vmem:[%s6884_s3 + $0x170] sm:$0xff]   ;;  %v6354_v1 = vld [vmem:[#allocation2 + $0x78] sm:$0xff]  }
  0x98   : > { %5229 = vmatprep.subr.bf16.mxu1 %v5596_v36  ;;  %v1491_v13 = vor.u32 %v1490_v53, %v1486_v48  ;;  %v1541_v46 = vshll.u32 %v5594_v25, 16  ;;  %v1534_v49 = vshrl.u32 %v5593_v59, 16  ;;  %v1538_v50 = vrot.slane %v1536_v20, 1  ;;  %v5598_v14 = vld [vmem:[#allocation2 + $0x8c] ss:$0 sps:$4 sm:$0x11]  }
  0x99   : > { %2267 = vmatmul.mubr.bf16.gmra.mrb[20].mxu0 %v6293_v42  ;;  %v1527_v3 = vor.u32 %v1526_v19, %v1522_v8  ;;  %v6345_v6 = vld [vmem:[#allocation2 + $0x6c] sm:$0xff]   ;;  %v1546_v60 = vshrl.u32 %v5597_v45, 16  ;;  %v5601_v29 = vld [vmem:[#allocation2 + $0x98] ss:$0 sps:$4 sm:$0x11]   ;;  %v6366_v59 = vld [vmem:[#allocation2 + $0x84] sm:$0xff]  }
  0x9a   : > { %v6306_v17 = vsel %vm1412_vm4, %v1491_v13, %v1495_v26  ;;  %v1543_v53 = vrot.slane %v1541_v46, 1  ;;  %v1539_v26 = vor.u32 %v1538_v50, %v1534_v49  ;;  %v1553_v13 = vshll.u32 %v5598_v14, 16  ;;  %v5605_v54 = vld [vmem:[#allocation2 + $0xa4] ss:$0 sps:$4 sm:$0x11]   ;;  %v5637_v16 = vld [vmem:[%s6884_s3 + $0x178] sm:$0xff]  }
  0x9b   : > { %5230 = vmatpush3.bf16.msra.mxu1 %v5596_v36  ;;  %2274 = vmatprep.mubr.bf16.mxu0 %v6306_v17  ;;  %v5583_v56 = vld [vmem:[#allocation2 + $0x54] sm:$0xff]   ;;  %v5584_v9 = vld [vmem:[#allocation2 + $0x5c] ss:$0 sps:$4 sm:$0x11]   ;;  %v5618_v36 = vld [vmem:[%s6884_s3 + $0x1c0] sm:$0xff]   ;;  %v6340_v48 = vsel %vm1412_vm4, %v1527_v3, %v1531_v21  ;;  %v1577_v25 = vshll.u32 %v5605_v54, 16 }
  0x9c   : > { %5231 = vmatprep.subr.bf16.mxu1 %v5603_v55  ;;  %v1498_v51 = vshrl.u32 %v5583_v56, 16  ;;  %v1500_v57 = vshll.u32 %v5583_v56, 16  ;;  %v1505_v62 = vshll.u32 %v5584_v9, 16  ;;  %v6317_v18 = vld [vmem:[#allocation2 + $0x54] sm:$0xff]   ;;  %5039 = vmatprep.subr.bf16.mxu0 %v5618_v36  ;;  %v6349_v56 = vsel %vm1412_vm4, %v1539_v26, %v1543_v53  ;;  %v5607_v3 = vld [vmem:[#allocation2 + $0xa8] sm:$0xff]  }
  0x9d   : > { %v5608_v20 = vld [vmem:[#allocation2 + $0xb0] ss:$0 sps:$4 sm:$0x11]   ;;  %v1584_v36 = vshll.u32 %v5607_v3, 16  ;;  %v5611_v49 = vld [vmem:[#allocation2 + $0xb4] sm:$0xff]  }
  0x9e   : > { %2871 = vmatmul.mubr.bf16.gmra.mrb[24].mxu1 %v6196_v41  ;;  %v1502_v2 = vrot.slane %v1500_v57, 1  ;;  %v1507_v5 = vrot.slane %v1505_v62, 1  ;;  %v1560_v57 = vshll.u32 %v5600_v11, 16  ;;  %v1565_v62 = vshll.u32 %v5601_v29, 16  ;;  %v483_v53 = vld [vmem:[#allocation2 + $0xc0] sm:$0x1] }
  0x9f   : > { %2878 = vmatprep.mubr.bf16.mxu1 %v6275_v7  ;;  %5232 = vmatpush3.bf16.msra.mxu1 %v5603_v55  ;;  %v1548_v55 = vshll.u32 %v5597_v45, 16  ;;  %v4751_v45 = vld [vmem:[%s5821_s21 + $0x78] sm:$0xff]   ;;  %v484_v26 = vsel %vm5847_vm2, 0, %v483_v53 }
  0xa0   : > { %v1503_v27 = vor.u32 %v1502_v2, %v1498_v51  ;;  %5233 = vmatprep.subr.bf16.mxu1 %v5610_v43  ;;  %v1555_v51 = vrot.slane %v1553_v13, 1  ;;  %v5604_v2 = vld [vmem:[#allocation2 + $0x9c] sm:$0xff]   ;;  %v1567_v31 = vrot.slane %v1565_v62, 1  ;;  %v4655_v50 = vunpack.c.l.bf16 %v4751_v45  ;;  %485 = vst [vmem:[#allocation2 + $0xc0] sm:$0x1] %v484_v26 }
  0xa1   : > { %2275 = vmatmul.mubr.bf16.gmra.mrb[24].mxu0 %v6308_v34  ;;  %v1550_v9 = vrot.slane %v1548_v55, 1  ;;  %v1570_v19 = vshrl.u32 %v5604_v2, 16  ;;  %v4656_v14 = vunpack.c.h.bf16 %v4751_v45  ;;  %v533_v55 = vld [vmem:[#allocation2 + $0xc8] sm:$0x1]  ;;  %v1589_v62 = vshll.u32 %v5608_v20, 16 }
  0xa2   : > { %v6315_v41 = vsel %vm1412_vm4, %v1503_v27, %v1507_v5  ;;  %v1558_v5 = vshrl.u32 %v5600_v11, 16  ;;  %v1562_v27 = vrot.slane %v1560_v57, 1  ;;  %v534_v13 = vsel %vm5858_vm5, 0, %v533_v55  ;;  %v6380_v11 = vld [vmem:[#allocation2 + $0x90] sm:$0xff]  }
  0xa3   : > { %2282 = vmatprep.mubr.bf16.mxu0 %v6315_v41  ;;  %5234 = vmatpush3.bf16.msra.mxu1 %v5610_v43  ;;  %v1551_v37 = vor.u32 %v1550_v9, %v1546_v60  ;;  %v1572_v43 = vshll.u32 %v5604_v2, 16  ;;  %v1582_v60 = vshrl.u32 %v5607_v3, 16  ;;  %v338_v9 = vmul.f32 %v6161_v22, %v4655_v50  ;;  %535 = vst [vmem:[#allocation2 + $0xc8] sm:$0x1] %v534_v13 }
  0xa4   : > { %5235 = vmatprep.subr.bf16.mxu1 %v5620_v47  ;;  %v1563_v8 = vor.u32 %v1562_v27, %v1558_v5  ;;  %v339_v29 = vmul.f32 %v6161_v22, %v4656_v14  ;;  %v5612_v57 = vld [vmem:[#allocation2 + $0xbc] ss:$0 sps:$4 sm:$0x11]   ;;  %v5668_v22 = vld [vmem:[%s6883_s2] ss:$0 sm:$0xff]  ;;  %v1596_v27 = vshll.u32 %v5611_v49, 16 }
  0xa5   : > { %v6358_v4 = vsel %vm1412_vm4, %v1551_v37, %v1555_v51  ;;  %v1574_v23 = vrot.slane %v1572_v43, 1  ;;  %v1586_v51 = vrot.slane %v1584_v36, 1  ;;  %v6388_v37 = vld [vmem:[%s6884_s3 + $0x200] sm:$0xff]   ;;  %v377_v2 = vadd.f32 %v5668_v22, %v338_v9 }
  0xa6   : > { %2879 = vmatmul.mubr.bf16.gmra.mrb[28].mxu1 %v6271_v61  ;;  %v6370_v21 = vsel %vm1412_vm4, %v1563_v8, %v1567_v31  ;;  %v378_v5 = vadd.f32 %v5668_v22, %v339_v29  ;;  %v1591_v43 = vrot.slane %v1589_v62, 1  ;;  %v1598_v3 = vrot.slane %v1596_v27, 1  ;;  %v5615_v27 = vld [vmem:[#allocation2 + $0x8] ss:$0 sps:$4 sm:$0x11]  }
  0xa7   : > { %2886 = vmatprep.mubr.bf16.mxu1 %v6290_v38  ;;  %5236 = vmatpush3.bf16.msra.mxu1 %v5620_v47  ;;  %v1575_v46 = vor.u32 %v1574_v23, %v1570_v19  ;;  %v1579_v47 = vrot.slane %v1577_v25, 1  ;;  %v409_v54 = vmax.f32 %v377_v2, 0.0  ;;  %v1587_v31 = vor.u32 %v1586_v51, %v1582_v60  ;;  %v6400_v23 = vld [vmem:[#allocation2 + $0x9c] sm:$0xff]   ;;  %v6415_v2 = vld [vmem:[#allocation2 + $0xa8] sm:$0xff]  }
  0xa8   : > { %5237 = vmatprep.subr.bf16.mxu1 %v5637_v16  ;;  %v1594_v25 = vshrl.u32 %v5611_v49, 16  ;;  %v1601_v20 = vshll.u32 %v5612_v57, 16  ;;  %v1045_v50 = vld [vmem:[#allocation2 + $0xc0] sm:$0xf]  ;;  %v1865_v24 = vrot.slane %v5615_v27, 1 }
  0xa9   : > { %2283 = vmatmul.mubr.bf16.gmra.mrb[28].mxu0 %v6317_v18  ;;  %v6391_v44 = vsel %vm1412_vm4, %v1575_v46, %v1579_v47  ;;  %v4559_v8 = vpack.c.bf16 %v409_v54, %v409_v54  ;;  %v6404_v14 = vsel %vm1412_vm4, %v1587_v31, %v1591_v43  ;;  %v5616_v31 = vld [vmem:[#allocation2 + $0xc] sm:$0xfe]   ;;  %v5623_v43 = vld [vmem:[#allocation2 + $0x18] sm:$0xfe]  }
  0xaa   : > { %2290 = vmatprep.mubr.bf16.mxu0 %v6325_v15  ;;  %v1049_v26 = vld [vmem:[#allocation2 + $0xc8] sm:$0x1]  ;;  %v1599_v29 = vor.u32 %v1598_v3, %v1594_v25  ;;  %v1603_v51 = vrot.slane %v1601_v20, 1  ;;  %v1867_v25 = vrot.slane %v5616_v31, 1  ;;  %v1868_v3 = vrot.slane %v5617_v30, 1  ;;  %v5628_v31 = vld [vmem:[%s6884_s3 + $0x190] sm:$0xff]  }
  0xab   : > { %5238 = vmatpush3.bf16.msra.mxu1 %v5637_v16  ;;  %v410_v16 = vmax.f32 %v378_v5, 0.0  ;;  %v874_v36 = vshrl.u32 %v4559_v8, 16  ;;  %v877_v45 = vshll.u32 %v4559_v8, 16  ;;  %v5614_v5 = vld [vmem:[#allocation2] sm:$0xfe]   ;;  %v1870_v20 = vrot.slane %v5623_v43, 1 }
  0xac   : > { %5271 = vmatprep.subr.bf16.mxu1 %v6388_v37  ;;  %v6419_v54 = vsel %vm1412_vm4, %v1599_v29, %v1603_v51  ;;  %v1864_v39 = vrot.slane %v5614_v5, 1  ;;  %v5622_v29 = vld [vmem:[%s6884_s3 + $0x188] sm:$0xff]   ;;  %v5633_v43 = vld [vmem:[#allocation2 + $0x3c] sm:$0xfe]  }
  0xad   : > { %v4560_v19 = vpack.c.bf16 %v410_v16, %v410_v16  ;;  %v876_v53 = vrot.slane %v874_v36, 7  ;;  %v6424_v16 = vld [vmem:[#allocation2 + $0xb4] sm:$0xff]  }
  0xae   : > { %2887 = vmatmul.mubr.bf16.gmra.mrb[32].mxu1 %v6293_v42  ;;  %v1866_v8 = vsel %vm1863_vm10, %v1864_v39, %v1865_v24 }
  0xaf   : > { %2894 = vmatprep.mubr.bf16.mxu1 %v6306_v17  ;;  %v882_v46 = vshrl.u32 %v4560_v19, 16  ;;  %v885_v47 = vshll.u32 %v4560_v19, 16  ;;  %v879_v49 = vor.u32 %v877_v45, %v876_v53  ;;  %v880_v13 = vrot.slane %v876_v53, 4  ;;  %v5624_v19 = vld [vmem:[#allocation2 + $0x20] ss:$0 sps:$4 sm:$0x11]  }
  0xb0   : > { %v1871_v36 = vrot.slane %v5624_v19, 1  ;;  %v5626_v53 = vld [vmem:[#allocation2 + $0x2c] ss:$0 sps:$4 sm:$0x11]   ;;  %v5629_v19 = vld [vmem:[%s6884_s3 + $0x1d8] sm:$0xff]  }
  0xb1   : > { %2291 = vmatmul.mubr.bf16.gmra.mrb[32].mxu0 %v6333_v40  ;;  %v884_v55 = vrot.slane %v882_v46, 7  ;;  %v1046_v62 = vsel %vm5900_vm9, %v879_v49, %v1045_v50  ;;  %v6431_v46 = vsel %vm1863_vm10, %v1867_v25, %v1868_v3  ;;  %v5625_v50 = vld [vmem:[#allocation2 + $0x24] sm:$0xfe]   ;;  %v5631_v49 = vld [vmem:[#allocation2 + $0x30] sm:$0xfe]  }
  0xb2   : > { %2298 = vmatprep.mubr.bf16.mxu0 %v6340_v48  ;;  %1047 = vst [vmem:[#allocation2 + $0xc0] sm:$0xf] %v1046_v62  ;;  %v1873_v51 = vrot.slane %v5625_v50, 1  ;;  %v5627_v62 = vld [vmem:[%s6884_s3 + $0x1d0] sm:$0xff]   ;;  %v5640_v3 = vld [vmem:[#allocation2 + $0x48] sm:$0xfe]  }
  0xb3   : > { %v887_v60 = vor.u32 %v885_v47, %v884_v55  ;;  %v889_v9 = vrot.slane %v884_v55, 4  ;;  %v5619_v47 = vld [vmem:[%s6884_s3 + $0x180] sm:$0xff]   ;;  %v5621_v55 = vld [vmem:[%s6884_s3 + $0x1c8] sm:$0xff]   ;;  %v5630_v50 = vld [vmem:[%s6884_s3 + $0x198] sm:$0xff]  }
  0xb5   : > { %v888_v57 = vsel %vm5893_vm8, %v880_v13, %v887_v60  ;;  %v1050_v22 = vsel %vm5847_vm2, %v889_v9, %v1049_v26  ;;  %v6441_v26 = vsel %vm1863_vm10, %v1870_v20, %v1871_v36  ;;  %v5632_v13 = vld [vmem:[#allocation2 + $0x38] ss:$0 sps:$4 sm:$0x11]   ;;  %v5641_v20 = vld [vmem:[#allocation2 + $0x50] ss:$0 sps:$4 sm:$0x11]  }
  0xb6   : > { %2895 = vmatmul.mubr.bf16.gmra.mrb[36].mxu1 %v6308_v34  ;;  %1048 = vst [vmem:[#allocation2 + $0xc4] sm:$0xf] %v888_v57  ;;  %1051 = vst [vmem:[#allocation2 + $0xc8] sm:$0x1] %v1050_v22  ;;  %v1874_v57 = vrot.slane %v5626_v53, 1  ;;  %v1876_v22 = vrot.slane %v5631_v49, 1 }
  0xb7   : > { %2902 = vmatprep.mubr.bf16.mxu1 %v6315_v41  ;;  %v1877_v5 = vrot.slane %v5632_v13, 1  ;;  %v1879_v53 = vrot.slane %v5633_v43, 1  ;;  %v5635_v13 = vld [vmem:[%s6884_s3 + $0x1e0] sm:$0xff]  }
  0xb8   : > { %v6453_v30 = vsel %vm1863_vm10, %v1873_v51, %v1874_v57 }
  0xb9   : > { %2299 = vmatmul.mubr.bf16.gmra.mrb[36].mxu0 %v6345_v6  ;;  %v6463_v25 = vsel %vm1863_vm10, %v1876_v22, %v1877_v5 }
  0xba   : > { %2306 = vmatprep.mubr.bf16.mxu0 %v6349_v56 }
  0xbd   : > { %v5646_v45 = vld [vmem:[#allocation2 + $0xc0] sm:$0xff]   ;;  %v5647_v60 = vld [vmem:[#allocation2 + $0xc8] ss:$0 sps:$4 sm:$0x11]  }
  0xbe   : > { %2903 = vmatmul.mubr.bf16.gmra.mrb[40].mxu1 %v6317_v18  ;;  %v1608_v9 = vshll.u32 %v5646_v45, 16  ;;  %v1606_v27 = vshrl.u32 %v5646_v45, 16  ;;  %v1613_v24 = vshll.u32 %v5647_v60, 16  ;;  %v1882_v60 = vrot.slane %v5640_v3, 1 }
  0xbf   : > { %2910 = vmatprep.mubr.bf16.mxu1 %v6325_v15 }
  0xc0   : > { %v1610_v39 = vrot.slane %v1608_v9, 1  ;;  %v1615_v45 = vrot.slane %v1613_v24, 1  ;;  %v1883_v9 = vrot.slane %v5641_v20, 1  ;;  %v5643_v24 = vld [vmem:[#allocation2 + $0x5c] ss:$0 sps:$4 sm:$0x11]  }
  0xc1   : > { %2307 = vmatmul.mubr.bf16.gmra.mrb[40].mxu0 %v6354_v1  ;;  %v1886_v3 = vrot.slane %v5643_v24, 1  ;;  %v6500_v20 = vld [vmem:[#allocation2 + $0xc0] sm:$0xff]  }
  0xc2   : > { %2314 = vmatprep.mubr.bf16.mxu0 %v6358_v4  ;;  %v1611_v36 = vor.u32 %v1610_v39, %v1606_v27  ;;  %v5636_v27 = vld [vmem:[%s6884_s3 + $0x1a0] sm:$0xff]   ;;  %v5642_v39 = vld [vmem:[#allocation2 + $0x54] sm:$0xfe]   ;;  %v6492_v43 = vsel %vm1863_vm10, %v1882_v60, %v1883_v9 }
  0xc3   : > { %v5657_v60 = vld [vmem:[%s6884_s3 + $0x230] sm:$0xff]  }
  0xc4   : > { %v6477_v57 = vsel %vm1412_vm4, %v1611_v36, %v1615_v45  ;;  %v5644_v36 = vld [vmem:[%s6884_s3 + $0x1f0] sm:$0xff]  }
  0xc6   : > { %2911 = vmatmul.mubr.bf16.gmra.mrb[44].mxu1 %v6333_v40 }
  0xc7   : > { %2918 = vmatprep.mubr.bf16.mxu1 %v6340_v48 }
  0xc9   : > { %2315 = vmatmul.mubr.bf16.gmra.mrb[44].mxu0 %v6366_v59 }
  0xca   : > { %2322 = vmatprep.mubr.bf16.mxu0 %v6370_v21 }
  0xce   : > { %2919 = vmatmul.mubr.bf16.gmra.mrb[48].mxu1 %v6345_v6 }
  0xcf   : > { %2926 = vmatprep.mubr.bf16.mxu1 %v6349_v56 }
  0xd1   : > { %2323 = vmatmul.mubr.bf16.gmra.mrb[48].mxu0 %v6380_v11 }
  0xd2   : > { %2330 = vmatprep.mubr.bf16.mxu0 %v6391_v44 }
  0xd6   : > { %2927 = vmatmul.mubr.bf16.gmra.mrb[52].mxu1 %v6354_v1 }
  0xd7   : > { %2934 = vmatprep.mubr.bf16.mxu1 %v6358_v4 }
  0xd9   : > { %2331 = vmatmul.mubr.bf16.gmra.mrb[52].mxu0 %v6400_v23 }
  0xda   : > { %2338 = vmatprep.mubr.bf16.mxu0 %v6404_v14 }
  0xde   : > { %2935 = vmatmul.mubr.bf16.gmra.mrb[56].mxu1 %v6366_v59 }
  0xdf   : > { %2942 = vmatprep.mubr.bf16.mxu1 %v6370_v21 }
  0xe1   : > { %2339 = vmatmul.mubr.bf16.gmra.mrb[56].mxu0 %v6415_v2 }
  0xe2   : > { %2346 = vmatprep.mubr.bf16.mxu0 %v6419_v54 }
  0xe6   : > { %2943 = vmatmul.mubr.bf16.gmra.mrb[60].mxu1 %v6380_v11 }
  0xe7   : > { %2950 = vmatprep.mubr.bf16.mxu1 %v6391_v44 }
  0xe9   : > { %2347 = vmatmul.mubr.bf16.gmra.mrb[60].mxu0 %v6424_v16 }
  0xea   : > { %5191 = vmatprep.mubr.bf16.mxu0 %v1866_v8  ;;  %v5634_v8 = vld [vmem:[#allocation2 + $0x44] ss:$0 sps:$4 sm:$0x11]  }
  0xee   : > { %2951 = vmatmul.mubr.bf16.gmra.mrb[64].mxu1 %v6400_v23 }
  0xef   : > { %2958 = vmatprep.mubr.bf16.mxu1 %v6404_v14 }
  0xf1   : > { %5192 = vmatmul.mubr.bf16.vlgmr.msra.gmra.mrb[64].mxu0 %v6431_v46 }
  0xf2   : > { %5040 = vmatpush3.bf16.msra.mxu0 %v5619_v47  ;;  %5195 = vmatprep.mubr.bf16.mxu0 %v6441_v26 }
  0xf3   : > { %5041 = vmatprep.subr.bf16.mxu0 %v5621_v55  ;;  %v1880_v55 = vrot.slane %v5634_v8, 1  ;;  %v5639_v8 = vld [vmem:[%s6884_s3 + $0x1a8] sm:$0xff]  }
  0xf5   : > { %v6482_v5 = vsel %vm1863_vm10, %v1879_v53, %v1880_v55  ;;  %v5650_v53 = vld [vmem:[%s6884_s3 + $0x1b8] sm:$0xff]   ;;  %v5652_v55 = vld [vmem:[%s6884_s3 + $0x208] sm:$0xff]  }
  0xf6   : > { %5042 = vmatpush3.bf16.msra.mxu0 %v5622_v29  ;;  %2959 = vmatmul.mubr.bf16.gmra.mrb[68].mxu1 %v6415_v2 }
  0xf7   : > { %5043 = vmatprep.subr.bf16.mxu0 %v5627_v62  ;;  %2966 = vmatprep.mubr.bf16.mxu1 %v6419_v54 }
  0xf9   : > { %5196 = vmatmul.mubr.bf16.gmra.mrb[68].mxu0 %v6453_v30 }
  0xfa   : > { %5044 = vmatpush3.bf16.msra.mxu0 %v5628_v31  ;;  %5199 = vmatprep.mubr.bf16.mxu0 %v6463_v25  ;;  %v5638_v31 = vld [vmem:[%s6884_s3 + $0x1e8] sm:$0xff]  }
  0xfb   : > { %5045 = vmatprep.subr.bf16.mxu0 %v5629_v19  ;;  %v1885_v19 = vrot.slane %v5642_v39, 1 }
  0xfd   : > { %v6506_v45 = vsel %vm1863_vm10, %v1885_v19, %v1886_v3  ;;  %v5659_v19 = vld [vmem:[#allocation2 + $0xc0] sm:$0xfe]  }
  0xfe   : > { %5046 = vmatpush3.bf16.msra.mxu0 %v5630_v50  ;;  %2967 = vmatmul.mubr.bf16.gmra.mrb[72].mxu1 %v6424_v16  ;;  %v5649_v50 = vld [vmem:[%s6884_s3 + $0x1f8] sm:$0xff]  }
  0xff   : > { %5047 = vmatprep.subr.bf16.mxu0 %v5635_v13  ;;  %2974 = vmatprep.mubr.bf16.mxu1 %v6477_v57  ;;  %v5670_v13 = vld [vmem:[#allocation2 + $0x24] sm:$0xff]  }
 0x101   : > { %v4783_v47 = vpop.f32.mrb[0].mxu0  ;;  %5200 = vmatmul.mubr.bf16.gmra.mrb[72].mxu0 %v6482_v5 }
 0x102   : > { %v4784_v49 = vpop.f32.mrb[1].mxu0  ;;  %5048 = vmatpush3.bf16.msra.mxu0 %v5636_v27  ;;  %5203 = vmatprep.mubr.bf16.mxu0 %v6492_v43 }
 0x103   : > { %v6474_v29 = vadd.f32 %v4784_v49, %v4783_v47  ;;  %v4786_v51 = vpop.f32.mrb[2].mxu0  ;;  %5049 = vmatprep.subr.bf16.mxu0 %v5638_v31  ;;  %v5645_v47 = vld [vmem:[%s6884_s3 + $0x1b0] sm:$0xff]   ;;  %v5669_v49 = vld [vmem:[#allocation2 + $0x18] sm:$0xff]  }
 0x104   : > { %v4787_v62 = vpop.f32.mrb[3].mxu0 }
 0x105   : > { %v6479_v22 = vadd.f32 %v4787_v62, %v4786_v51  ;;  %v5658_v51 = vld [vmem:[%s6884_s3 + $0x238] sm:$0xff]  }
 0x106   : > { %5050 = vmatpush3.bf16.msra.mxu0 %v5639_v8  ;;  %2975 = vmatmul.mubr.bf16.gmra.mrb[76].mxu1 %v6500_v20 }
 0x107   : > { %5051 = vmatprep.subr.bf16.mxu0 %v5644_v36  ;;  %5239 = vmatprep.mubr.bf16.mxu1 %v6431_v46  ;;  %v5653_v46 = vld [vmem:[%s6884_s3 + $0x210] sm:$0xff]  }
 0x109   : > { %5204 = vmatmul.mubr.bf16.gmra.mrb[76].mxu0 %v6506_v45 }
 0x10a   : > { %5052 = vmatpush3.bf16.msra.mxu0 %v5645_v47  ;;  %3514 = vmatprep.mubr.bf16.mxu0 %v6121_v35  ;;  %v5654_v35 = vld [vmem:[%s6884_s3 + $0x218] sm:$0xff]  }
 0x10b   : > { %5053 = vmatprep.subr.bf16.mxu0 %v5649_v50 }
 0x10e   : > { %5054 = vmatpush3.bf16.msra.mxu0 %v5650_v53  ;;  %5240 = vmatmul.mubr.bf16.vlgmr.msra.gmra.mrb[80].mxu1 %v6441_v26 }
 0x10f   : > { %5272 = vmatpush3.bf16.msra.mxu1 %v6388_v37  ;;  %5243 = vmatprep.mubr.bf16.mxu1 %v6453_v30  ;;  %v5655_v37 = vld [vmem:[%s6884_s3 + $0x220] sm:$0xff]  }
 0x110   : > { %5273 = vmatprep.subr.bf16.mxu1 %v5652_v55 }
 0x111   : > { %3515 = vmatmul.mubr.bf16.vlgmr.msra.gmra.mrb[80].mxu0 %v5669_v49 }
 0x112   : > { %3522 = vmatprep.mubr.bf16.mxu0 %v6209_v63  ;;  %v5656_v63 = vld [vmem:[%s6884_s3 + $0x228] sm:$0xff]  }
 0x113   : > { %5274 = vmatpush3.bf16.msra.mxu1 %v5652_v55 }
 0x114   : > { %5275 = vmatprep.subr.bf16.mxu1 %v5653_v46 }
 0x116   : > { %5244 = vmatmul.mubr.bf16.gmra.mrb[84].mxu1 %v6463_v25 }
 0x117   : > { %5247 = vmatprep.mubr.bf16.mxu1 %v6482_v5  ;;  %5276 = vmatpush3.bf16.msra.mxu1 %v5653_v46 }
 0x118   : > { %5277 = vmatprep.subr.bf16.mxu1 %v5654_v35 }
 0x119   : > { %3523 = vmatmul.mubr.bf16.gmra.mrb[84].mxu0 %v5670_v13 }
 0x11a   : > { %3530 = vmatprep.mubr.bf16.mxu0 %v6275_v7 }
 0x11b   : > { %5278 = vmatpush3.bf16.msra.mxu1 %v5654_v35 }
 0x11c   : > { %5279 = vmatprep.subr.bf16.mxu1 %v5655_v37 }
 0x11e   : > { %5248 = vmatmul.mubr.bf16.gmra.mrb[88].mxu1 %v6492_v43 }
 0x11f   : > { %5251 = vmatprep.mubr.bf16.mxu1 %v6506_v45  ;;  %5280 = vmatpush3.bf16.msra.mxu1 %v5655_v37 }
 0x120   : > { %5281 = vmatprep.subr.bf16.mxu1 %v5656_v63 }
 0x121   : > { %3531 = vmatmul.mubr.bf16.gmra.mrb[88].mxu0 %v6271_v61 }
 0x122   : > { %3538 = vmatprep.mubr.bf16.mxu0 %v6290_v38 }
 0x123   : > { %5282 = vmatpush3.bf16.msra.mxu1 %v5656_v63 }
 0x124   : > { %v4789_v7 = vpop.f32.mrb[4].mxu0  ;;  %5283 = vmatprep.subr.bf16.mxu1 %v5657_v60 }
 0x125   : > { %v4790_v9 = vpop.f32.mrb[5].mxu0 }
 0x126   : > { %v6553_v62 = vadd.f32 %v4790_v9, %v4789_v7  ;;  %v4792_v27 = vpop.f32.mrb[6].mxu0  ;;  %5252 = vmatmul.mubr.bf16.gmra.mrb[92].mxu1 %v5944_v58 }
 0x127   : > { %v4793_v39 = vpop.f32.mrb[7].mxu0  ;;  %5255 = vmatprep.mubr.bf16.mxu1 %v5973_v28  ;;  %5284 = vmatpush3.bf16.msra.mxu1 %v5657_v60  ;;  %v5662_v60 = vld [vmem:[#allocation2 + $0xd4] ss:$0 sps:$4 sm:$0x11]  }
 0x128   : > { %v6556_v24 = vadd.f32 %v4793_v39, %v4792_v27  ;;  %5285 = vmatprep.subr.bf16.mxu1 %v5658_v51 }
 0x129   : > { %3539 = vmatmul.mubr.bf16.gmra.mrb[92].mxu0 %v6293_v42 }
 0x12a   : > { %3546 = vmatprep.mubr.bf16.mxu0 %v6306_v17 }
 0x12b   : > { %5286 = vmatpush3.bf16.msra.mxu1 %v5658_v51 }
 0x12e   : > { %5256 = vmatmul.mubr.bf16.gmra.mrb[0].mxu1 %v6036_v52 }
 0x12f   : > { %5259 = vmatprep.mubr.bf16.mxu1 %v6076_v32 }
 0x131   : > { %3547 = vmatmul.mubr.bf16.gmra.mrb[96].mxu0 %v6308_v34  ;;  %v5660_v34 = vld [vmem:[#allocation2 + $0xc8] ss:$0 sps:$4 sm:$0x11]  }
 0x132   : > { %3554 = vmatprep.mubr.bf16.mxu0 %v6315_v41  ;;  %v1912_v41 = vrot.slane %v5659_v19, 1  ;;  %v1913_v3 = vrot.slane %v5660_v34, 1 }
 0x134   : > { %v4795_v61 = vpop.f32.mrb[8].mxu0  ;;  %v6578_v36 = vsel %vm1863_vm10, %v1912_v41, %v1913_v3 }
 0x135   : > { %v4796_v38 = vpop.f32.mrb[9].mxu0 }
 0x136   : > { %5260 = vmatmul.mubr.bf16.gmra.mrb[4].mxu1 %v6143_v10  ;;  %v6567_v31 = vadd.f32 %v4796_v38, %v4795_v61  ;;  %v4798_v42 = vpop.f32.mrb[10].mxu0 }
 0x137   : > { %5263 = vmatprep.mubr.bf16.mxu1 %v6177_v0  ;;  %v4799_v8 = vpop.f32.mrb[11].mxu0 }
 0x138   : > { %v6570_v17 = vadd.f32 %v4799_v8, %v4798_v42 }
 0x139   : > { %3555 = vmatmul.mubr.bf16.gmra.mrb[100].mxu0 %v6317_v18 }
 0x13a   : > { %3562 = vmatprep.mubr.bf16.mxu0 %v6325_v15 }
 0x13e   : > { %5264 = vmatmul.mubr.bf16.gmra.mrb[8].mxu1 %v6225_v12 }
 0x13f   : > { %5267 = vmatprep.mubr.bf16.mxu1 %v6254_v33 }
 0x141   : > { %3563 = vmatmul.mubr.bf16.gmra.mrb[104].mxu0 %v6333_v40 }
 0x142   : > { %3570 = vmatprep.mubr.bf16.mxu0 %v6340_v48 }
 0x146   : > { %5268 = vmatmul.mubr.bf16.gmra.mrb[12].mxu1 %v6578_v36 }
 0x147   : > { %5287 = vmatprep.mubr.bf16.mxu1 %v6441_v26 }
 0x149   : > { %3571 = vmatmul.mubr.bf16.gmra.mrb[108].mxu0 %v6345_v6 }
 0x14a   : > { %3578 = vmatprep.mubr.bf16.mxu0 %v6349_v56 }
 0x14b   : > { %v4801_v18 = vpop.f32.mrb[12].mxu0 }
 0x14c   : > { %v4802_v15 = vpop.f32.mrb[13].mxu0 }
 0x14d   : > { %v6585_v47 = vadd.f32 %v4802_v15, %v4801_v18  ;;  %v4804_v40 = vpop.f32.mrb[14].mxu0 }
 0x14e   : > { %5288 = vmatmul.mubr.bf16.vlgmr.msra.gmra.mrb[80].mxu1 %v6453_v30  ;;  %v4805_v48 = vpop.f32.mrb[15].mxu0 }
 0x14f   : > { %5291 = vmatprep.mubr.bf16.mxu1 %v6463_v25  ;;  %v6588_v50 = vadd.f32 %v4805_v48, %v4804_v40  ;;  %v5665_v48 = vld [vmem:[#allocation2 + $0xd4] ss:$0 sps:$4 sm:$0x11]  }
 0x151   : > { %3579 = vmatmul.mubr.bf16.gmra.mrb[112].mxu0 %v6354_v1 }
 0x152   : > { %3586 = vmatprep.mubr.bf16.mxu0 %v6358_v4 }
 0x156   : > { %5292 = vmatmul.mubr.bf16.gmra.mrb[84].mxu1 %v6482_v5 }
 0x157   : > { %5295 = vmatprep.mubr.bf16.mxu1 %v6492_v43 }
 0x159   : > { %3587 = vmatmul.mubr.bf16.gmra.mrb[116].mxu0 %v6366_v59 }
 0x15a   : > { %3594 = vmatprep.mubr.bf16.mxu0 %v6370_v21 }
 0x15e   : > { %5296 = vmatmul.mubr.bf16.gmra.mrb[88].mxu1 %v6506_v45 }
 0x15f   : > { %5299 = vmatprep.mubr.bf16.mxu1 %v5944_v58 }
 0x161   : > { %3595 = vmatmul.mubr.bf16.gmra.mrb[120].mxu0 %v6380_v11  ;;  %v4919_v6 = vpop.f32.mrb[16].mxu1 }
 0x162   : > { %v4920_v56 = vpop.f32.mrb[17].mxu1  ;;  %3602 = vmatprep.mubr.bf16.mxu0 %v6391_v44 }
 0x163   : > { %v6600_v1 = vadd.f32 %v4920_v56, %v4919_v6  ;;  %v4922_v4 = vpop.f32.mrb[18].mxu1 }
 0x164   : > { %v4807_v26 = vpop.f32.mrb[16].mxu0  ;;  %v4923_v30 = vpop.f32.mrb[19].mxu1 }
 0x165   : > { %v4808_v25 = vpop.f32.mrb[17].mxu0  ;;  %v6602_v5 = vadd.f32 %v4923_v30, %v4922_v4 }
 0x166   : > { %v6604_v59 = vadd.f32 %v4808_v25, %v4807_v26  ;;  %v4810_v21 = vpop.f32.mrb[18].mxu0  ;;  %5300 = vmatmul.mubr.bf16.gmra.mrb[92].mxu1 %v5973_v28 }
 0x167   : > { %v4811_v58 = vpop.f32.mrb[19].mxu0  ;;  %5303 = vmatprep.mubr.bf16.mxu1 %v6036_v52 }
 0x168   : > { %v6608_v11 = vadd.f32 %v4811_v58, %v4810_v21  ;;  %v1916_v21 = vrot.slane %v5665_v48, 1 }
 0x169   : > { %3603 = vmatmul.mubr.bf16.gmra.mrb[124].mxu0 %v6400_v23  ;;  %v4925_v44 = vpop.f32.mrb[20].mxu1  ;;  %v5661_v23 = vld [vmem:[#allocation2 + $0xcc] sm:$0xff]  }
 0x16a   : > { %v4926_v43 = vpop.f32.mrb[21].mxu1  ;;  %3610 = vmatprep.mubr.bf16.mxu0 %v6404_v14  ;;  %v1620_v51 = vshll.u32 %v5661_v23, 16 }
 0x16b   : > { %v6612_v45 = vadd.f32 %v4926_v43, %v4925_v44  ;;  %v4928_v53 = vpop.f32.mrb[22].mxu1 }
 0x16c   : > { %v4813_v55 = vpop.f32.mrb[20].mxu0  ;;  %v4929_v46 = vpop.f32.mrb[23].mxu1  ;;  %v1622_v8 = vrot.slane %v1620_v51, 1 }
 0x16d   : > { %v4814_v49 = vpop.f32.mrb[21].mxu0  ;;  %v6614_v35 = vadd.f32 %v4929_v46, %v4928_v53 }
 0x16e   : > { %v6616_v28 = vadd.f32 %v4814_v49, %v4813_v55  ;;  %v4816_v37 = vpop.f32.mrb[22].mxu0  ;;  %5304 = vmatmul.mubr.bf16.gmra.mrb[0].mxu1 %v6076_v32 }
 0x16f   : > { %v4817_v52 = vpop.f32.mrb[23].mxu0  ;;  %5307 = vmatprep.mubr.bf16.mxu1 %v6143_v10 }
 0x170   : > { %v6620_v13 = vadd.f32 %v4817_v52, %v4816_v37  ;;  %v5663_v52 = vld [vmem:[#allocation2 + $0xcc] sm:$0xff]  }
 0x171   : > { %3611 = vmatmul.mubr.bf16.gmra.mrb[128].mxu0 %v6415_v2  ;;  %v4931_v14 = vpop.f32.mrb[24].mxu1  ;;  %v1625_v2 = vshll.u32 %v5662_v60, 16 }
 0x172   : > { %v4932_v63 = vpop.f32.mrb[25].mxu1  ;;  %3618 = vmatprep.mubr.bf16.mxu0 %v6419_v54  ;;  %v1618_v54 = vshrl.u32 %v5661_v23, 16 }
 0x173   : > { %v6624_v7 = vadd.f32 %v4932_v63, %v4931_v14  ;;  %v4934_v9 = vpop.f32.mrb[26].mxu1  ;;  %v1627_v3 = vrot.slane %v1625_v2, 1 }
 0x174   : > { %v4819_v27 = vpop.f32.mrb[24].mxu0  ;;  %v4935_v39 = vpop.f32.mrb[27].mxu1  ;;  %v1623_v40 = vor.u32 %v1622_v8, %v1618_v54 }
 0x175   : > { %v4820_v32 = vpop.f32.mrb[25].mxu0  ;;  %v6626_v61 = vadd.f32 %v4935_v39, %v4934_v9 }
 0x176   : > { %v6628_v10 = vadd.f32 %v4820_v32, %v4819_v27  ;;  %v4822_v38 = vpop.f32.mrb[26].mxu0  ;;  %5308 = vmatmul.mubr.bf16.gmra.mrb[4].mxu1 %v6177_v0  ;;  %v5664_v0 = vld [vmem:[#allocation2 + $0xcc] sm:$0xfe]  }
 0x177   : > { %v4823_v42 = vpop.f32.mrb[27].mxu0  ;;  %5311 = vmatprep.mubr.bf16.mxu1 %v6225_v12  ;;  %v1915_v25 = vrot.slane %v5664_v0, 1 }
 0x178   : > { %v6632_v19 = vadd.f32 %v4823_v42, %v4822_v38 }
 0x179   : > { %3619 = vmatmul.mubr.bf16.gmra.mrb[132].mxu0 %v6424_v16  ;;  %v4937_v34 = vpop.f32.mrb[28].mxu1  ;;  %v1917_v46 = vsel %vm1863_vm10, %v1915_v25, %v1916_v21 }
 0x17a   : > { %v4938_v41 = vpop.f32.mrb[29].mxu1  ;;  %3626 = vmatprep.mubr.bf16.mxu0 %v6477_v57  ;;  %v1628_v57 = vsel %vm1412_vm4, %v1623_v40, %v1627_v3 }
 0x17b   : > { %v6636_v18 = vadd.f32 %v4938_v41, %v4937_v34  ;;  %v4940_v15 = vpop.f32.mrb[30].mxu1 }
 0x17c   : > { %v4825_v6 = vpop.f32.mrb[28].mxu0  ;;  %v4941_v56 = vpop.f32.mrb[31].mxu1 }
 0x17d   : > { %v4826_v12 = vpop.f32.mrb[29].mxu0  ;;  %v6638_v4 = vadd.f32 %v4941_v56, %v4940_v15 }
 0x17e   : > { %v6640_v26 = vadd.f32 %v4826_v12, %v4825_v6  ;;  %v4828_v30 = vpop.f32.mrb[30].mxu0  ;;  %5312 = vmatmul.mubr.bf16.gmra.mrb[8].mxu1 %v6254_v33 }
 0x17f   : > { %v4829_v16 = vpop.f32.mrb[31].mxu0  ;;  %5315 = vmatprep.mubr.bf16.mxu1 %v6578_v36 }
 0x180   : > { %v6645_v58 = vadd.f32 %v4829_v16, %v4828_v30 }
 0x181   : > { %3627 = vmatmul.mubr.bf16.gmra.mrb[136].mxu0 %v6500_v20  ;;  %v4943_v44 = vpop.f32.mrb[32].mxu1 }
 0x182   : > { %v4944_v43 = vpop.f32.mrb[33].mxu1  ;;  %3634 = vmatprep.mubr.bf16.mxu0 %v1628_v57 }
 0x183   : > { %v6648_v53 = vadd.f32 %v4944_v43, %v4943_v44  ;;  %v4946_v55 = vpop.f32.mrb[34].mxu1 }
 0x184   : > { %v4831_v33 = vpop.f32.mrb[32].mxu0  ;;  %v4947_v49 = vpop.f32.mrb[35].mxu1 }
 0x185   : > { %v4832_v37 = vpop.f32.mrb[33].mxu0  ;;  %v6651_v23 = vadd.f32 %v4947_v49, %v4946_v55 }
 0x186   : > { %v4833_v36 = vadd.f32 %v4832_v37, %v4831_v33  ;;  %v4834_v14 = vpop.f32.mrb[34].mxu0  ;;  %5316 = vmatmul.mubr.bf16.gmra.mrb[12].mxu1 %v1917_v46 }
 0x187   : > { %v4835_v63 = vpop.f32.mrb[35].mxu0 }
 0x188   : > { %v4836_v60 = vadd.f32 %v4835_v63, %v4834_v14 }
 0x189   : > { %3635 = vmatmul.mubr.bf16.gmra.mrb[140].mxu0 %v5663_v52  ;;  %v4949_v20 = vpop.f32.mrb[36].mxu1 }
 0x18a   : > { %v4950_v9 = vpop.f32.mrb[37].mxu1 }
 0x18b   : > { %v6653_v51 = vadd.f32 %v4950_v9, %v4949_v20  ;;  %v4952_v27 = vpop.f32.mrb[38].mxu1 }
 0x18c   : > { %v4837_v39 = vpop.f32.mrb[36].mxu0  ;;  %v4953_v32 = vpop.f32.mrb[39].mxu1 }
 0x18d   : > { %v4838_v38 = vpop.f32.mrb[37].mxu0  ;;  %v6655_v2 = vadd.f32 %v4953_v32, %v4952_v27 }
 0x18e   : > { %v4839_v42 = vadd.f32 %v4838_v38, %v4837_v39  ;;  %v4840_v54 = vpop.f32.mrb[38].mxu0 }
 0x18f   : > { %v4841_v8 = vpop.f32.mrb[39].mxu0 }
 0x190   : > { %v4842_v34 = vadd.f32 %v4841_v8, %v4840_v54 }
 0x191   : > { %v4955_v41 = vpop.f32.mrb[40].mxu1 }
 0x192   : > { %v4956_v3 = vpop.f32.mrb[41].mxu1 }
 0x193   : > { %v6657_v15 = vadd.f32 %v4956_v3, %v4955_v41  ;;  %v4958_v40 = vpop.f32.mrb[42].mxu1 }
 0x194   : > { %v4843_v0 = vpop.f32.mrb[40].mxu0  ;;  %v4959_v48 = vpop.f32.mrb[43].mxu1 }
 0x195   : > { %v4844_v6 = vpop.f32.mrb[41].mxu0  ;;  %v6659_v56 = vadd.f32 %v4959_v48, %v4958_v40 }
 0x196   : > { %v4845_v12 = vadd.f32 %v4844_v6, %v4843_v0  ;;  %v4846_v30 = vpop.f32.mrb[42].mxu0 }
 0x197   : > { %v4847_v16 = vpop.f32.mrb[43].mxu0 }
 0x198   : > { %v4848_v57 = vadd.f32 %v4847_v16, %v4846_v30 }
 0x199   : > { %v4961_v25 = vpop.f32.mrb[44].mxu1 }
 0x19a   : > { %v4962_v21 = vpop.f32.mrb[45].mxu1 }
 0x19b   : > { %v6661_v44 = vadd.f32 %v4962_v21, %v4961_v25  ;;  %v4964_v43 = vpop.f32.mrb[46].mxu1 }
 0x19c   : > { %v4849_v55 = vpop.f32.mrb[44].mxu0  ;;  %v4965_v46 = vpop.f32.mrb[47].mxu1 }
 0x19d   : > { %v4850_v33 = vpop.f32.mrb[45].mxu0  ;;  %v6663_v49 = vadd.f32 %v4965_v46, %v4964_v43 }
 0x19e   : > { %v4851_v37 = vadd.f32 %v4850_v33, %v4849_v55  ;;  %v4852_v52 = vpop.f32.mrb[46].mxu0 }
 0x19f   : > { %v4853_v14 = vpop.f32.mrb[47].mxu0 }
 0x1a0   : > { %v4854_v63 = vadd.f32 %v4853_v14, %v4852_v52 }
 0x1a1   : > { %v4967_v20 = vpop.f32.mrb[48].mxu1 }
 0x1a2   : > { %v4968_v9 = vpop.f32.mrb[49].mxu1 }
 0x1a3   : > { %v4969_v27 = vadd.f32 %v4968_v9, %v4967_v20  ;;  %v4970_v39 = vpop.f32.mrb[50].mxu1 }
 0x1a4   : > { %v4855_v32 = vpop.f32.mrb[48].mxu0  ;;  %v4971_v38 = vpop.f32.mrb[51].mxu1 }
 0x1a5   : > { %v4856_v54 = vpop.f32.mrb[49].mxu0  ;;  %v6665_v8 = vadd.f32 %v4969_v27, %v4833_v36  ;;  %v4972_v41 = vadd.f32 %v4971_v38, %v4970_v39 }
 0x1a6   : > { %v4857_v3 = vadd.f32 %v4856_v54, %v4855_v32  ;;  %v4858_v40 = vpop.f32.mrb[50].mxu0 }
 0x1a7   : > { %v4859_v0 = vpop.f32.mrb[51].mxu0  ;;  %v6667_v48 = vadd.f32 %v4972_v41, %v4836_v60 }
 0x1a8   : > { %v4860_v6 = vadd.f32 %v4859_v0, %v4858_v40 }
 0x1a9   : > { %v4973_v30 = vpop.f32.mrb[52].mxu1 }
 0x1aa   : > { %v4974_v16 = vpop.f32.mrb[53].mxu1 }
 0x1ab   : > { %v4975_v25 = vadd.f32 %v4974_v16, %v4973_v30  ;;  %v4976_v21 = vpop.f32.mrb[54].mxu1 }
 0x1ac   : > { %v4861_v43 = vpop.f32.mrb[52].mxu0  ;;  %v4977_v55 = vpop.f32.mrb[55].mxu1 }
 0x1ad   : > { %v4862_v46 = vpop.f32.mrb[53].mxu0  ;;  %v6669_v33 = vadd.f32 %v4975_v25, %v4839_v42  ;;  %v4978_v52 = vadd.f32 %v4977_v55, %v4976_v21 }
 0x1ae   : > { %v4863_v14 = vadd.f32 %v4862_v46, %v4861_v43  ;;  %v4864_v36 = vpop.f32.mrb[54].mxu0 }
 0x1af   : > { %v4865_v20 = vpop.f32.mrb[55].mxu0  ;;  %v6671_v9 = vadd.f32 %v4978_v52, %v4842_v34 }
 0x1b0   : > { %v6673_v27 = vadd.f32 %v4865_v20, %v4864_v36 }
 0x1b1   : > { %v4979_v60 = vpop.f32.mrb[56].mxu1 }
 0x1b2   : > { %v4980_v39 = vpop.f32.mrb[57].mxu1 }
 0x1b3   : > { %v4981_v32 = vadd.f32 %v4980_v39, %v4979_v60  ;;  %v4982_v38 = vpop.f32.mrb[58].mxu1 }
 0x1b4   : > { %v4867_v54 = vpop.f32.mrb[56].mxu0  ;;  %v4983_v41 = vpop.f32.mrb[59].mxu1 }
 0x1b5   : > { %v4868_v40 = vpop.f32.mrb[57].mxu0  ;;  %v6675_v0 = vadd.f32 %v4981_v32, %v4845_v12  ;;  %v4984_v30 = vadd.f32 %v4983_v41, %v4982_v38 }
 0x1b6   : > { %v6677_v42 = vadd.f32 %v4868_v40, %v4867_v54  ;;  %v4870_v16 = vpop.f32.mrb[58].mxu0 }
 0x1b7   : > { %6895 = vst [vmem:[#allocation5_spill] sm:$0xff] %v6675_v0  ;;  %v4871_v25 = vpop.f32.mrb[59].mxu0  ;;  %v6679_v21 = vadd.f32 %v4984_v30, %v4848_v57 }
 0x1b8   : > { %v6681_v34 = vadd.f32 %v4871_v25, %v4870_v16 }
 0x1b9   : > { %6896 = vst [vmem:[#allocation6_spill] sm:$0xff] %v6679_v21  ;;  %v4985_v43 = vpop.f32.mrb[60].mxu1 }
 0x1ba   : > { %v4986_v55 = vpop.f32.mrb[61].mxu1 }
 0x1bb   : > { %v4987_v46 = vadd.f32 %v4986_v55, %v4985_v43  ;;  %v4988_v52 = vpop.f32.mrb[62].mxu1 }
 0x1bc   : > { %v4873_v36 = vpop.f32.mrb[60].mxu0  ;;  %v4989_v20 = vpop.f32.mrb[63].mxu1 }
 0x1bd   : > { %v4874_v60 = vpop.f32.mrb[61].mxu0  ;;  %v6683_v39 = vadd.f32 %v4987_v46, %v4851_v37  ;;  %v4990_v12 = vadd.f32 %v4989_v20, %v4988_v52 }
 0x1be   : > { %v6685_v32 = vadd.f32 %v4874_v60, %v4873_v36  ;;  %v4876_v38 = vpop.f32.mrb[62].mxu0 }
 0x1bf   : > { %v4877_v54 = vpop.f32.mrb[63].mxu0  ;;  %v6687_v41 = vadd.f32 %v4990_v12, %v4854_v63 }
 0x1c0   : > { %v6689_v57 = vadd.f32 %v4877_v54, %v4876_v38 }
 0x1c1   : > { %v4991_v40 = vpop.f32.mrb[64].mxu1 }
 0x1c2   : > { %v4992_v30 = vpop.f32.mrb[65].mxu1 }
 0x1c3   : > { %v4993_v16 = vadd.f32 %v4992_v30, %v4991_v40  ;;  %v4994_v25 = vpop.f32.mrb[66].mxu1 }
 0x1c4   : > { %v5193_v43 = vpop.f32.mrb[64].mxu0  ;;  %v4995_v55 = vpop.f32.mrb[67].mxu1 }
 0x1c5   : > { %v2398_v21 = vadd.f32 %v5193_v43, %v6553_v62  ;;  %v2389_v0 = vpop.f32.mrb[65].mxu0  ;;  %v6692_v37 = vadd.f32 %v4993_v16, %v4857_v3  ;;  %v4996_v46 = vadd.f32 %v4995_v55, %v4994_v25 }
 0x1c6   : > { %v2390_v52 = vadd.f32 %v6474_v29, %v2389_v0  ;;  %v5194_v36 = vpop.f32.mrb[66].mxu0 }
 0x1c7   : > { %v6696_v63 = vadd.f32 %v6612_v45, %v2398_v21  ;;  %v2401_v20 = vadd.f32 %v5194_v36, %v6556_v24  ;;  %v2392_v60 = vpop.f32.mrb[67].mxu0  ;;  %v6699_v12 = vadd.f32 %v4996_v46, %v4860_v6 }
 0x1c8   : > { %v6702_v38 = vadd.f32 %v6600_v1, %v2390_v52  ;;  %v2393_v62 = vadd.f32 %v6479_v22, %v2392_v60 }
 0x1c9   : > { %v6706_v3 = vadd.f32 %v6614_v35, %v2401_v20  ;;  %v4997_v54 = vpop.f32.mrb[68].mxu1 }
 0x1ca   : > { %v6709_v29 = vadd.f32 %v6602_v5, %v2393_v62  ;;  %v4998_v0 = vpop.f32.mrb[69].mxu1 }
 0x1cb   : > { %v4999_v45 = vadd.f32 %v4998_v0, %v4997_v54  ;;  %v5000_v21 = vpop.f32.mrb[70].mxu1 }
 0x1cc   : > { %v5197_v40 = vpop.f32.mrb[68].mxu0  ;;  %v5001_v24 = vpop.f32.mrb[71].mxu1 }
 0x1cd   : > { %v2414_v6 = vadd.f32 %v5197_v40, %v6585_v47  ;;  %v2405_v30 = vpop.f32.mrb[69].mxu0  ;;  %v6712_v16 = vadd.f32 %v4999_v45, %v4863_v14  ;;  %v5002_v1 = vadd.f32 %v5001_v24, %v5000_v21 }
 0x1ce   : > { %v2406_v22 = vadd.f32 %v6567_v31, %v2405_v30  ;;  %v5198_v25 = vpop.f32.mrb[70].mxu0 }
 0x1cf   : > { %v6716_v35 = vadd.f32 %v6636_v18, %v2414_v6  ;;  %v2417_v5 = vadd.f32 %v5198_v25, %v6588_v50  ;;  %v2408_v43 = vpop.f32.mrb[71].mxu0  ;;  %v6720_v55 = vadd.f32 %v5002_v1, %v6673_v27 }
 0x1d0   : > { %v6723_v46 = vadd.f32 %v6624_v7, %v2406_v22  ;;  %v2409_v47 = vadd.f32 %v6570_v17, %v2408_v43 }
 0x1d1   : > { %v6727_v14 = vadd.f32 %v6638_v4, %v2417_v5  ;;  %v5003_v52 = vpop.f32.mrb[72].mxu1 }
 0x1d2   : > { %v6730_v31 = vadd.f32 %v6626_v61, %v2409_v47  ;;  %v5004_v18 = vpop.f32.mrb[73].mxu1 }
 0x1d3   : > { %v5005_v36 = vadd.f32 %v5004_v18, %v5003_v52  ;;  %v5006_v20 = vpop.f32.mrb[74].mxu1 }
 0x1d4   : > { %v5201_v50 = vpop.f32.mrb[72].mxu0  ;;  %v5007_v60 = vpop.f32.mrb[75].mxu1 }
 0x1d5   : > { %v2430_v27 = vadd.f32 %v5201_v50, %v6616_v28  ;;  %v2421_v62 = vpop.f32.mrb[73].mxu0  ;;  %v6734_v7 = vadd.f32 %v5005_v36, %v6677_v42  ;;  %v5008_v54 = vadd.f32 %v5007_v60, %v5006_v20 }
 0x1d6   : > { %v2422_v17 = vadd.f32 %v6604_v59, %v2421_v62  ;;  %v5202_v4 = vpop.f32.mrb[74].mxu0 }
 0x1d7   : > { %v6738_v0 = vadd.f32 %v6653_v51, %v2430_v27  ;;  %v2433_v61 = vadd.f32 %v5202_v4, %v6620_v13  ;;  %v2424_v45 = vpop.f32.mrb[75].mxu0  ;;  %v6742_v21 = vadd.f32 %v5008_v54, %v6681_v34 }
 0x1d8   : > { %v5372_v40 = vadd.f32 %v6648_v53, %v2422_v17  ;;  %v2425_v28 = vadd.f32 %v6608_v11, %v2424_v45 }
 0x1d9   : > { %v6747_v42 = vadd.f32 %v6655_v2, %v2433_v61  ;;  %v5009_v24 = vpop.f32.mrb[76].mxu1 }
 0x1da   : > { %v5380_v59 = vadd.f32 %v6651_v23, %v2425_v28  ;;  %v5010_v6 = vpop.f32.mrb[77].mxu1 }
 0x1db   : > { %v5011_v30 = vadd.f32 %v5010_v6, %v5009_v24  ;;  %v5012_v51 = vpop.f32.mrb[78].mxu1 }
 0x1dc   : > { %v5205_v1 = vpop.f32.mrb[76].mxu0  ;;  %v5013_v22 = vpop.f32.mrb[79].mxu1 }
 0x1dd   : > { %v2446_v13 = vadd.f32 %v5205_v1, %v6640_v26  ;;  %v2437_v25 = vpop.f32.mrb[77].mxu0  ;;  %v6752_v34 = vadd.f32 %v5011_v30, %v6685_v32  ;;  %v5014_v53 = vadd.f32 %v5013_v22, %v5012_v51 }
 0x1de   : > { %v2438_v11 = vadd.f32 %v6628_v10, %v2437_v25  ;;  %v5206_v5 = vpop.f32.mrb[78].mxu0 }
 0x1df   : > { %v6756_v2 = vadd.f32 %v6661_v44, %v2446_v13  ;;  %v2449_v23 = vadd.f32 %v5206_v5, %v6645_v58  ;;  %v2440_v43 = vpop.f32.mrb[79].mxu0  ;;  %v6760_v47 = vadd.f32 %v5014_v53, %v6689_v57 }
 0x1e0   : > { %v5388_v52 = vadd.f32 %v6657_v15, %v2438_v11  ;;  %v2441_v26 = vadd.f32 %v6632_v19, %v2440_v43 }
 0x1e1   : > { %v6765_v32 = vadd.f32 %v6663_v49, %v2449_v23 }
 0x1e2   : > { %v5396_v18 = vadd.f32 %v6659_v56, %v2441_v26 }
 0x1e4   : > { %v5055_v10 = vpop.f32.mrb[80].mxu0 }
 0x1e5   : > { %v5056_v36 = vpop.f32.mrb[81].mxu0 }
 0x1e6   : > { %v5057_v20 = vadd.f32 %v5056_v36, %v5055_v10  ;;  %v5058_v44 = vpop.f32.mrb[82].mxu0 }
 0x1e7   : > { %v5059_v50 = vpop.f32.mrb[83].mxu0 }
 0x1e8   : > { %v5060_v60 = vadd.f32 %v5059_v50, %v5058_v44  ;;  %v5341_v58 = vadd.f32 %v6702_v38, %v5057_v20 }
 0x1ea   : > { %v6770_v57 = vadd.f32 %v6709_v29, %v5060_v60 }
 0x1ec   : > { %v5061_v27 = vpop.f32.mrb[84].mxu0 }
 0x1ed   : > { %v5062_v15 = vpop.f32.mrb[85].mxu0 }
 0x1ee   : > { %v5063_v62 = vadd.f32 %v5062_v15, %v5061_v27  ;;  %v5064_v19 = vpop.f32.mrb[86].mxu0 }
 0x1ef   : > { %v5065_v54 = vpop.f32.mrb[87].mxu0 }
 0x1f0   : > { %v5066_v49 = vadd.f32 %v5065_v54, %v5064_v19  ;;  %v5337_v17 = vadd.f32 %v6696_v63, %v5063_v62 }
 0x1f2   : > { %v5345_v56 = vadd.f32 %v6706_v3, %v5066_v49 }
 0x1f4   : > { %v5067_v4 = vpop.f32.mrb[88].mxu0 }
 0x1f5   : > { %v5068_v61 = vpop.f32.mrb[89].mxu0 }
 0x1f6   : > { %v5069_v45 = vadd.f32 %v5068_v61, %v5067_v4  ;;  %v5070_v28 = vpop.f32.mrb[90].mxu0 }
 0x1f7   : > { %v5071_v24 = vpop.f32.mrb[91].mxu0 }
 0x1f8   : > { %v5072_v6 = vadd.f32 %v5071_v24, %v5070_v28  ;;  %v6775_v38 = vadd.f32 %v6723_v46, %v5069_v45 }
 0x1fa   : > { %v6778_v29 = vadd.f32 %v6730_v31, %v5072_v6 }
 0x1fc   : > { %v5073_v30 = vpop.f32.mrb[92].mxu0 }
 0x1fd   : > { %v5074_v51 = vpop.f32.mrb[93].mxu0 }
 0x1fe   : > { %v5075_v1 = vadd.f32 %v5074_v51, %v5073_v30  ;;  %v5076_v22 = vpop.f32.mrb[94].mxu0 }
 0x1ff   : > { %v5077_v13 = vpop.f32.mrb[95].mxu0 }
 0x200   : > { %v5078_v63 = vadd.f32 %v5077_v13, %v5076_v22  ;;  %v5353_v3 = vadd.f32 %v6716_v35, %v5075_v1 }
 0x202   : > { %v6782_v25 = vadd.f32 %v6727_v14, %v5078_v63 }
 0x204   : > { %v5079_v53 = vpop.f32.mrb[96].mxu0 }
 0x205   : > { %v5080_v11 = vpop.f32.mrb[97].mxu0 }
 0x206   : > { %v5081_v5 = vadd.f32 %v5080_v11, %v5079_v53  ;;  %v5082_v23 = vpop.f32.mrb[98].mxu0 }
 0x207   : > { %v5083_v46 = vpop.f32.mrb[99].mxu0 }
 0x208   : > { %v5084_v43 = vadd.f32 %v5083_v46, %v5082_v23  ;;  %v6784_v26 = vadd.f32 %v5372_v40, %v5081_v5 }
 0x20a   : > { %v6786_v31 = vadd.f32 %v5380_v59, %v5084_v43 }
 0x20c   : > { %v5085_v10 = vpop.f32.mrb[100].mxu0 }
 0x20d   : > { %v5086_v36 = vpop.f32.mrb[101].mxu0 }
 0x20e   : > { %v5087_v20 = vadd.f32 %v5086_v36, %v5085_v10  ;;  %v5088_v44 = vpop.f32.mrb[102].mxu0 }
 0x20f   : > { %v5089_v50 = vpop.f32.mrb[103].mxu0 }
 0x210   : > { %v5090_v60 = vadd.f32 %v5089_v50, %v5088_v44  ;;  %v6789_v35 = vadd.f32 %v6738_v0, %v5087_v20 }
 0x212   : > { %v6792_v14 = vadd.f32 %v6747_v42, %v5090_v60 }
 0x214   : > { %v5091_v27 = vpop.f32.mrb[104].mxu0 }
 0x215   : > { %v5092_v15 = vpop.f32.mrb[105].mxu0 }
 0x216   : > { %v5093_v62 = vadd.f32 %v5092_v15, %v5091_v27  ;;  %v5094_v19 = vpop.f32.mrb[106].mxu0 }
 0x217   : > { %v5095_v40 = vpop.f32.mrb[107].mxu0 }
 0x218   : > { %v5096_v54 = vadd.f32 %v5095_v40, %v5094_v19  ;;  %v6794_v59 = vadd.f32 %v5388_v52, %v5093_v62 }
 0x21a   : > { %v6796_v49 = vadd.f32 %v5396_v18, %v5096_v54 }
 0x21c   : > { %v5097_v4 = vpop.f32.mrb[108].mxu0 }
 0x21d   : > { %v5098_v61 = vpop.f32.mrb[109].mxu0 }
 0x21e   : > { %v5099_v45 = vadd.f32 %v5098_v61, %v5097_v4  ;;  %v5100_v28 = vpop.f32.mrb[110].mxu0 }
 0x21f   : > { %v5101_v0 = vpop.f32.mrb[111].mxu0 }
 0x220   : > { %v5102_v24 = vadd.f32 %v5101_v0, %v5100_v28  ;;  %v6799_v42 = vadd.f32 %v6756_v2, %v5099_v45 }
 0x221   : > { %v5289_v6 = vpop.f32.mrb[80].mxu1 }
 0x222   : > { %v5338_v30 = vadd.f32 %v5337_v17, %v5289_v6  ;;  %v3677_v51 = vpop.f32.mrb[81].mxu1  ;;  %v6802_v1 = vadd.f32 %v6765_v32, %v5102_v24 }
 0x223   : > { %v5342_v52 = vadd.f32 %v5341_v58, %v3677_v51  ;;  %v5290_v22 = vpop.f32.mrb[82].mxu1 }
 0x224   : > { %v5103_v18 = vpop.f32.mrb[112].mxu0  ;;  %v5346_v13 = vadd.f32 %v5345_v56, %v5290_v22  ;;  %v3680_v63 = vpop.f32.mrb[83].mxu1  ;;  %v4035_v36 = vmul.f32 %v5338_v30, %v5338_v30 }
 0x225   : > { %v5104_v53 = vpop.f32.mrb[113].mxu0  ;;  %v5350_v2 = vadd.f32 %v6770_v57, %v3680_v63  ;;  %v4033_v58 = vmul.f32 %v5342_v52, %v5342_v52 }
 0x226   : > { %v5105_v17 = vadd.f32 %v5104_v53, %v5103_v18  ;;  %v5106_v11 = vpop.f32.mrb[114].mxu0  ;;  %v4665_v32 = vpack.c.bf16 %v5346_v13, %v5338_v30  ;;  %v4036_v15 = vmul.f32 %v5346_v13, %v5346_v13 }
 0x227   : > { %v5107_v5 = vpop.f32.mrb[115].mxu0  ;;  %v4660_v23 = vpack.c.bf16 %v5350_v2, %v5342_v52  ;;  %v3996_v46 = vadd.f32 %v5350_v2, %v5342_v52  ;;  %v4034_v56 = vmul.f32 %v5350_v2, %v5350_v2 }
 0x228   : > { %v5108_v43 = vadd.f32 %v5107_v5, %v5106_v11  ;;  %4752 = vst [vmem:[%s6809_s26 + $0x8] sm:$0xff] %v4665_v32   ;;  %v6814_v10 = vadd.f32 %v6665_v8, %v5105_v17 }
 0x229   : > { %4661 = vst [vmem:[%s6809_s26] sm:$0xff] %v4660_v23   ;;  %v3997_v20 = vadd.f32 %v5338_v30, %v3996_v46  ;;  %v4065_v44 = vadd.f32 %v4034_v56, %v4033_v58  ;;  %v5293_v50 = vpop.f32.mrb[84].mxu1 }
 0x22a   : > { %v5354_v60 = vadd.f32 %v5353_v3, %v5293_v50  ;;  %v3693_v57 = vpop.f32.mrb[85].mxu1  ;;  %v6818_v27 = vadd.f32 %v6667_v48, %v5108_v43 }
 0x22b   : > { %v4066_v62 = vadd.f32 %v4065_v44, %v4035_v36  ;;  %v5358_v19 = vadd.f32 %v6775_v38, %v3693_v57  ;;  %v3998_v40 = vadd.f32 %v5346_v13, %v3997_v20  ;;  %v5294_v54 = vpop.f32.mrb[86].mxu1 }
 0x22c   : > { %v5109_v4 = vpop.f32.mrb[116].mxu0  ;;  %v5362_v8 = vadd.f32 %v6782_v25, %v5294_v54  ;;  %v3696_v61 = vpop.f32.mrb[87].mxu1  ;;  %v4039_v63 = vmul.f32 %v5354_v60, %v5354_v60 }
 0x22d   : > { %v5110_v45 = vpop.f32.mrb[117].mxu0  ;;  %v3999_v28 = vadd.f32 %v5358_v19, %v3998_v40  ;;  %v4037_v0 = vmul.f32 %v5358_v19, %v5358_v19  ;;  %v4067_v3 = vadd.f32 %v4066_v62, %v4036_v15  ;;  %v5366_v24 = vadd.f32 %v6778_v29, %v3696_v61 }
 0x22e   : > { %v5111_v48 = vadd.f32 %v5110_v45, %v5109_v4  ;;  %v5112_v6 = vpop.f32.mrb[118].mxu0  ;;  %v4675_v30 = vpack.c.bf16 %v5362_v8, %v5354_v60  ;;  %v4040_v5 = vmul.f32 %v5362_v8, %v5362_v8 }
 0x22f   : > { %v5113_v51 = vpop.f32.mrb[119].mxu0  ;;  %v4068_v52 = vadd.f32 %v4067_v3, %v4037_v0  ;;  %v4670_v38 = vpack.c.bf16 %v5366_v24, %v5358_v19  ;;  %v4000_v22 = vadd.f32 %v5366_v24, %v3999_v28  ;;  %v4038_v18 = vmul.f32 %v5366_v24, %v5366_v24  ;;  %v6898_v24 = vld [vmem:[#allocation6_spill] sm:$0xff] }
 0x230   : > { %v5114_v13 = vadd.f32 %v5113_v51, %v5112_v6  ;;  %4754 = vst [vmem:[%s6809_s26 + $0x18] sm:$0xff] %v4675_v30   ;;  %v6825_v25 = vadd.f32 %v6669_v33, %v5111_v48 }
 0x231   : > { %4753 = vst [vmem:[%s6809_s26 + $0x10] sm:$0xff] %v4670_v38   ;;  %v4001_v53 = vadd.f32 %v5354_v60, %v4000_v22  ;;  %v4069_v2 = vadd.f32 %v4068_v52, %v4038_v18  ;;  %v5297_v17 = vpop.f32.mrb[88].mxu1 }
 0x232   : > { %v5370_v29 = vadd.f32 %v6789_v35, %v5297_v17  ;;  %v3709_v11 = vpop.f32.mrb[89].mxu1  ;;  %v6830_v32 = vadd.f32 %v6671_v9, %v5114_v13 }
 0x233   : > { %v4070_v58 = vadd.f32 %v4069_v2, %v4039_v63  ;;  %v5374_v23 = vadd.f32 %v6784_v26, %v3709_v11  ;;  %v4002_v46 = vadd.f32 %v5362_v8, %v4001_v53  ;;  %v5298_v56 = vpop.f32.mrb[90].mxu1 }
 0x234   : > { %v5115_v43 = vpop.f32.mrb[120].mxu0  ;;  %v5378_v33 = vadd.f32 %v6792_v14, %v5298_v56  ;;  %v3712_v36 = vpop.f32.mrb[91].mxu1  ;;  %v6897_v14 = vld [vmem:[#allocation5_spill] sm:$0xff]  ;;  %v4043_v61 = vmul.f32 %v5370_v29, %v5370_v29 }
 0x235   : > { %v5116_v20 = vpop.f32.mrb[121].mxu0  ;;  %v4003_v44 = vadd.f32 %v5374_v23, %v4002_v46  ;;  %v4041_v50 = vmul.f32 %v5374_v23, %v5374_v23  ;;  %v4071_v35 = vadd.f32 %v4070_v58, %v4040_v5  ;;  %v5382_v60 = vadd.f32 %v6786_v31, %v3712_v36 }
 0x236   : > { %v5117_v9 = vadd.f32 %v5116_v20, %v5115_v43  ;;  %v5118_v57 = vpop.f32.mrb[122].mxu0  ;;  %v4685_v15 = vpack.c.bf16 %v5378_v33, %v5370_v29  ;;  %v4044_v6 = vmul.f32 %v5378_v33, %v5378_v33 }
 0x237   : > { %v5119_v62 = vpop.f32.mrb[123].mxu0  ;;  %v4072_v19 = vadd.f32 %v4071_v35, %v4041_v50  ;;  %v4680_v26 = vpack.c.bf16 %v5382_v60, %v5374_v23  ;;  %v4004_v40 = vadd.f32 %v5382_v60, %v4003_v44  ;;  %v4042_v54 = vmul.f32 %v5382_v60, %v5382_v60 }
 0x238   : > { %v5120_v4 = vadd.f32 %v5119_v62, %v5118_v57  ;;  %4756 = vst [vmem:[%s6809_s26 + $0x28] sm:$0xff] %v4685_v15   ;;  %v6837_v8 = vadd.f32 %v6897_v14, %v5117_v9 }
 0x239   : > { %4755 = vst [vmem:[%s6809_s26 + $0x20] sm:$0xff] %v4680_v26   ;;  %v4005_v45 = vadd.f32 %v5370_v29, %v4004_v40  ;;  %v4073_v28 = vadd.f32 %v4072_v19, %v4042_v54  ;;  %v5301_v0 = vpop.f32.mrb[92].mxu1 }
 0x23a   : > { %v5386_v31 = vadd.f32 %v6799_v42, %v5301_v0  ;;  %v3725_v3 = vpop.f32.mrb[93].mxu1  ;;  %v6842_v48 = vadd.f32 %v6898_v24, %v5120_v4 }
 0x23b   : > { %v4074_v30 = vadd.f32 %v4073_v28, %v4043_v61  ;;  %v5390_v51 = vadd.f32 %v6794_v59, %v3725_v3  ;;  %v4006_v52 = vadd.f32 %v5378_v33, %v4005_v45  ;;  %v5302_v38 = vpop.f32.mrb[94].mxu1 }
 0x23c   : > { %v5121_v22 = vpop.f32.mrb[124].mxu0  ;;  %v5394_v18 = vadd.f32 %v6802_v1, %v5302_v38  ;;  %v3728_v13 = vpop.f32.mrb[95].mxu1  ;;  %v4047_v33 = vmul.f32 %v5386_v31, %v5386_v31 }
 0x23d   : > { %v5122_v63 = vpop.f32.mrb[125].mxu0  ;;  %v4007_v53 = vadd.f32 %v5390_v51, %v4006_v52  ;;  %v4045_v2 = vmul.f32 %v5390_v51, %v5390_v51  ;;  %v4075_v42 = vadd.f32 %v4074_v30, %v4044_v6  ;;  %v5398_v17 = vadd.f32 %v6796_v49, %v3728_v13 }
 0x23e   : > { %v5123_v29 = vadd.f32 %v5122_v63, %v5121_v22  ;;  %v5124_v11 = vpop.f32.mrb[126].mxu0  ;;  %v4695_v5 = vpack.c.bf16 %v5394_v18, %v5386_v31  ;;  %v4048_v60 = vmul.f32 %v5394_v18, %v5394_v18 }
 0x23f   : > { %v5125_v58 = vpop.f32.mrb[127].mxu0  ;;  %v4076_v23 = vadd.f32 %v4075_v42, %v4045_v2  ;;  %v4690_v59 = vpack.c.bf16 %v5398_v17, %v5390_v51  ;;  %v4008_v46 = vadd.f32 %v5398_v17, %v4007_v53  ;;  %v4046_v56 = vmul.f32 %v5398_v17, %v5398_v17 }
 0x240   : > { %v5126_v43 = vadd.f32 %v5125_v58, %v5124_v11  ;;  %4758 = vst [vmem:[%s6809_s26 + $0x38] sm:$0xff] %v4695_v5   ;;  %v5412_v1 = vadd.f32 %v6683_v39, %v5123_v29 }
 0x241   : > { %4757 = vst [vmem:[%s6809_s26 + $0x30] sm:$0xff] %v4690_v59   ;;  %v4009_v36 = vadd.f32 %v5386_v31, %v4008_v46  ;;  %v4077_v20 = vadd.f32 %v4076_v23, %v4046_v56  ;;  %v5305_v44 = vpop.f32.mrb[0].mxu1 }
 0x242   : > { %v5401_v50 = vadd.f32 %v6825_v25, %v5305_v44  ;;  %v3741_v49 = vpop.f32.mrb[1].mxu1  ;;  %v5418_v35 = vadd.f32 %v6687_v41, %v5126_v43 }
 0x243   : > { %v4078_v9 = vadd.f32 %v4077_v20, %v4047_v33  ;;  %v5404_v57 = vadd.f32 %v6814_v10, %v3741_v49  ;;  %v4010_v15 = vadd.f32 %v5394_v18, %v4009_v36  ;;  %v5306_v62 = vpop.f32.mrb[2].mxu1 }
 0x244   : > { %v5127_v19 = vpop.f32.mrb[128].mxu0  ;;  %v5407_v26 = vadd.f32 %v6830_v32, %v5306_v62  ;;  %v3744_v39 = vpop.f32.mrb[3].mxu1  ;;  %v4051_v6 = vmul.f32 %v5401_v50, %v5401_v50 }
 0x245   : > { %v5128_v40 = vpop.f32.mrb[129].mxu0  ;;  %v4011_v54 = vadd.f32 %v5404_v57, %v4010_v15  ;;  %v4049_v4 = vmul.f32 %v5404_v57, %v5404_v57  ;;  %v4079_v14 = vadd.f32 %v4078_v9, %v4048_v60  ;;  %v5410_v25 = vadd.f32 %v6818_v27, %v3744_v39 }
 0x246   : > { %v5129_v61 = vadd.f32 %v5128_v40, %v5127_v19  ;;  %v5130_v41 = vpop.f32.mrb[130].mxu0  ;;  %v4705_v45 = vpack.c.bf16 %v5407_v26, %v5401_v50  ;;  %v4052_v18 = vmul.f32 %v5407_v26, %v5407_v26 }
 0x247   : > { %v5131_v28 = vpop.f32.mrb[131].mxu0  ;;  %v4080_v0 = vadd.f32 %v4079_v14, %v4049_v4  ;;  %v4700_v10 = vpack.c.bf16 %v5410_v25, %v5404_v57  ;;  %v4012_v31 = vadd.f32 %v5410_v25, %v4011_v54  ;;  %v4050_v3 = vmul.f32 %v5410_v25, %v5410_v25 }
 0x248   : > { %v5132_v24 = vadd.f32 %v5131_v28, %v5130_v41  ;;  %4760 = vst [vmem:[%s6809_s26 + $0x48] sm:$0xff] %v4705_v45   ;;  %v5427_v32 = vadd.f32 %v6692_v37, %v5129_v61 }
 0x249   : > { %4759 = vst [vmem:[%s6809_s26 + $0x40] sm:$0xff] %v4700_v10   ;;  %v4013_v30 = vadd.f32 %v5401_v50, %v4012_v31  ;;  %v4081_v51 = vadd.f32 %v4080_v0, %v4050_v3  ;;  %v5309_v52 = vpop.f32.mrb[4].mxu1 }
 0x24a   : > { %v5413_v38 = vadd.f32 %v5412_v1, %v5309_v52  ;;  %v3757_v22 = vpop.f32.mrb[5].mxu1  ;;  %v5433_v27 = vadd.f32 %v6699_v12, %v5132_v24 }
 0x24b   : > { %v4082_v13 = vadd.f32 %v4081_v51, %v4051_v6  ;;  %v5416_v63 = vadd.f32 %v6837_v8, %v3757_v22  ;;  %v4014_v53 = vadd.f32 %v5407_v26, %v4013_v30  ;;  %v5310_v2 = vpop.f32.mrb[6].mxu1 }
 0x24c   : > { %v5133_v42 = vpop.f32.mrb[132].mxu0  ;;  %v5419_v17 = vadd.f32 %v5418_v35, %v5310_v2  ;;  %v3760_v29 = vpop.f32.mrb[7].mxu1  ;;  %v4055_v44 = vmul.f32 %v5413_v38, %v5413_v38 }
 0x24d   : > { %v5134_v37 = vpop.f32.mrb[133].mxu0  ;;  %v4015_v11 = vadd.f32 %v5416_v63, %v4014_v53  ;;  %v4053_v5 = vmul.f32 %v5416_v63, %v5416_v63  ;;  %v4083_v58 = vadd.f32 %v4082_v13, %v4052_v18  ;;  %v5422_v23 = vadd.f32 %v6842_v48, %v3760_v29 }
 0x24e   : > { %v5135_v59 = vadd.f32 %v5134_v37, %v5133_v42  ;;  %v5136_v46 = vpop.f32.mrb[134].mxu0  ;;  %v4715_v12 = vpack.c.bf16 %v5419_v17, %v5413_v38  ;;  %v4056_v57 = vmul.f32 %v5419_v17, %v5419_v17 }
 0x24f   : > { %v5137_v56 = vpop.f32.mrb[135].mxu0  ;;  %v4084_v43 = vadd.f32 %v4083_v58, %v4053_v5  ;;  %v4710_v1 = vpack.c.bf16 %v5422_v23, %v5416_v63  ;;  %v4016_v8 = vadd.f32 %v5422_v23, %v4015_v11  ;;  %v4054_v33 = vmul.f32 %v5422_v23, %v5422_v23 }
 0x250   : > { %v5138_v36 = vadd.f32 %v5137_v56, %v5136_v46  ;;  %4762 = vst [vmem:[%s6809_s26 + $0x58] sm:$0xff] %v4715_v12   ;;  %v5424_v20 = vadd.f32 %v6712_v16, %v5135_v59 }
 0x251   : > { %4761 = vst [vmem:[%s6809_s26 + $0x50] sm:$0xff] %v4710_v1   ;;  %v4017_v50 = vadd.f32 %v5413_v38, %v4016_v8  ;;  %v4085_v49 = vadd.f32 %v4084_v43, %v4054_v33  ;;  %v5313_v35 = vpop.f32.mrb[8].mxu1 }
 0x252   : > { %v5425_v60 = vadd.f32 %v5424_v20, %v5313_v35  ;;  %v3773_v9 = vpop.f32.mrb[9].mxu1  ;;  %v5430_v48 = vadd.f32 %v6720_v55, %v5138_v36 }
 0x253   : > { %v4086_v15 = vadd.f32 %v4085_v49, %v4055_v44  ;;  %v5428_v62 = vadd.f32 %v5427_v32, %v3773_v9  ;;  %v4018_v19 = vadd.f32 %v5419_v17, %v4017_v50  ;;  %v5314_v26 = vpop.f32.mrb[10].mxu1 }
 0x254   : > { %v5139_v39 = vpop.f32.mrb[136].mxu0  ;;  %v5431_v40 = vadd.f32 %v5430_v48, %v5314_v26  ;;  %v3776_v54 = vpop.f32.mrb[11].mxu1  ;;  %v4059_v6 = vmul.f32 %v5425_v60, %v5425_v60 }
 0x255   : > { %v5140_v4 = vpop.f32.mrb[137].mxu0  ;;  %v4019_v16 = vadd.f32 %v5428_v62, %v4018_v19  ;;  %v4057_v14 = vmul.f32 %v5428_v62, %v5428_v62  ;;  %v4087_v25 = vadd.f32 %v4086_v15, %v4056_v57  ;;  %v5434_v61 = vadd.f32 %v5433_v27, %v3776_v54 }
 0x256   : > { %v5141_v41 = vadd.f32 %v5140_v4, %v5139_v39  ;;  %v5142_v45 = vpop.f32.mrb[138].mxu0  ;;  %v4725_v28 = vpack.c.bf16 %v5431_v40, %v5425_v60  ;;  %v4060_v27 = vmul.f32 %v5431_v40, %v5431_v40 }
 0x257   : > { %v5143_v0 = vpop.f32.mrb[139].mxu0  ;;  %v4088_v55 = vadd.f32 %v4087_v25, %v4057_v14  ;;  %v4720_v10 = vpack.c.bf16 %v5434_v61, %v5428_v62  ;;  %v4020_v31 = vadd.f32 %v5434_v61, %v4019_v16  ;;  %v4058_v3 = vmul.f32 %v5434_v61, %v5434_v61 }
 0x258   : > { %v5144_v24 = vadd.f32 %v5143_v0, %v5142_v45  ;;  %4764 = vst [vmem:[%s6809_s26 + $0x68] sm:$0xff] %v4725_v28   ;;  %v5439_v32 = vadd.f32 %v6734_v7, %v5141_v41 }
 0x259   : > { %4763 = vst [vmem:[%s6809_s26 + $0x60] sm:$0xff] %v4720_v10   ;;  %v4021_v30 = vadd.f32 %v5425_v60, %v4020_v31  ;;  %v4089_v51 = vadd.f32 %v4088_v55, %v4058_v3  ;;  %v5317_v52 = vpop.f32.mrb[12].mxu1 }
 0x25a   : > { %v3789_v38 = vpop.f32.mrb[13].mxu1  ;;  %v5445_v22 = vadd.f32 %v6742_v21, %v5144_v24 }
 0x25b   : > { %v4090_v18 = vadd.f32 %v4089_v51, %v4059_v6  ;;  %v5440_v13 = vadd.f32 %v5439_v32, %v3789_v38  ;;  %v4022_v63 = vadd.f32 %v5431_v40, %v4021_v30  ;;  %v5318_v53 = vpop.f32.mrb[14].mxu1 }
 0x25c   : > { %v5145_v2 = vpop.f32.mrb[140].mxu0  ;;  %v3792_v42 = vpop.f32.mrb[15].mxu1 }
 0x25d   : > { %v5146_v17 = vpop.f32.mrb[141].mxu0  ;;  %v4023_v29 = vadd.f32 %v5440_v13, %v4022_v63  ;;  %v4061_v37 = vmul.f32 %v5440_v13, %v5440_v13  ;;  %v4091_v7 = vadd.f32 %v4090_v18, %v4060_v27  ;;  %v5446_v11 = vadd.f32 %v5445_v22, %v3792_v42 }
 0x25e   : > { %v5147_v5 = vadd.f32 %v5146_v17, %v5145_v2  ;;  %v5148_v58 = vpop.f32.mrb[142].mxu0 }
 0x25f   : > { %v5149_v23 = vpop.f32.mrb[143].mxu0  ;;  %v4092_v59 = vadd.f32 %v4091_v7, %v4061_v37  ;;  %v4730_v46 = vpack.c.bf16 %v5446_v11, %v5440_v13  ;;  %v4024_v21 = vadd.f32 %v5446_v11, %v4023_v29  ;;  %v4062_v12 = vmul.f32 %v5446_v11, %v5446_v11 }
 0x260   : > { %v5150_v56 = vadd.f32 %v5149_v23, %v5148_v58  ;;  %v5436_v43 = vadd.f32 %v6752_v34, %v5147_v5 }
 0x261   : > { %4765 = vst [vmem:[%s6809_s26 + $0x70] sm:$0xff] %v4730_v46   ;;  %v4093_v1 = vadd.f32 %v4092_v59, %v4062_v12 }
 0x262   : > { %v5437_v8 = vadd.f32 %v5436_v43, %v5317_v52  ;;  %v5442_v33 = vadd.f32 %v6760_v47, %v5150_v56 }
 0x264   : > { %v4063_v36 = vmul.f32 %v5437_v8, %v5437_v8  ;;  %v5443_v20 = vadd.f32 %v5442_v33, %v5318_v53  ;;  %v4025_v44 = vadd.f32 %v5437_v8, %v4024_v21 }
 0x266   : > { %v4735_v50 = vpack.c.bf16 %v5443_v20, %v5437_v8  ;;  %v4064_v49 = vmul.f32 %v5443_v20, %v5443_v20  ;;  %v4026_v35 = vadd.f32 %v5443_v20, %v4025_v44  ;;  %v4094_v60 = vadd.f32 %v4093_v1, %v4063_v36 }
 0x268   : > { %4766 = vst [vmem:[%s6809_s26 + $0x78] sm:$0xff] %v4735_v50   ;;  %v4027_v9 = vrot.slane %v4026_v35, 4  ;;  %v4095_v48 = vadd.f32 %v4094_v60, %v4064_v49 }
 0x26a   : > { %v4028_v57 = vadd.f32 %v4027_v9, %v4026_v35  ;;  %v4096_v15 = vrot.slane %v4095_v48, 4 }
 0x26c   : > { %v4029_v62 = vrot.slane %v4028_v57, 2  ;;  %v4097_v34 = vadd.f32 %v4096_v15, %v4095_v48 }
 0x26e   : > { %v4030_v19 = vadd.f32 %v4029_v62, %v4028_v57  ;;  %v4098_v26 = vrot.slane %v4097_v34, 2 }
 0x270   : > { %v4031_v39 = vrot.slane %v4030_v19, 1  ;;  %v4099_v40 = vadd.f32 %v4098_v26, %v4097_v34 }
 0x272   : > { %v4100_v47 = vrot.slane %v4099_v40, 1  ;;  %v4032_v54 = vadd.f32 %v4031_v39, %v4030_v19 }
 0x274   : > { %v4101_v4 = vadd.f32 %v4100_v47, %v4099_v40 }
 0x276   : > { %v4103_v16 = vsel %vm435_vm0, %v4032_v54, %v4101_v4 }
 0x277   : > { %4104 = vst [vmem:[%s235_s29] sm:$0x3] %v4103_v16 }
 0x278 PF: > { %s16_s18 = sadd.s32 1, %s5677_s18  }
 0x279   : > { %p13_p4 = scmp.ge.s32.totalorder %s16_s18, 4  }
 0x27b   :  { %15 = sbr.rel (!%p13_p4) target bundleno = 1 (0x1), region = 84 }

</bundles_post_ra>
